<compile_context>
chip_gen: v6e
topology: v6e:2x2x1
jax: 0.10.0
libtpu: 0.0.40
codegen_flags: <defaults>
</compile_context>

<pallas_src>
import functools
import numpy as np

import jax
import jax.numpy as jnp
from jax import lax
from jax.experimental import pallas as pl
from jax.experimental.pallas import tpu as pltpu

# 3x3x3 tap order (kd major) — must match weight/mask packing below.
_TAPS = [(kd, kh, kw) for kd in range(3) for kh in range(3) for kw in range(3)]


def _tap_boundary_masks(dp, hp, wp):
    """(27, dp*hp*wp) float32 masks: 1.0 where the tap reads a real (non-pad)
    voxel of the pooled volume, 0.0 where Conv3d padding=1 would supply zero."""
    d = np.arange(dp)[:, None, None]
    h = np.arange(hp)[None, :, None]
    w = np.arange(wp)[None, None, :]
    rows = []
    for kd, kh, kw in _TAPS:
        valid = ((0 <= d + kd - 1) & (d + kd - 1 < dp) &
                 (0 <= h + kh - 1) & (h + kh - 1 < hp) &
                 (0 <= w + kw - 1) & (w + kw - 1 < wp))
        rows.append(valid.reshape(-1))
    return np.stack(rows).astype(np.float32)


def _fused_downsample_kernel(x_ref, mask_ref, w1_ref, b1_ref, w2_ref, b2_ref,
                             o_ref, buf1_ref, buf2_ref,
                             *, cin, cmid, cout, hp, wp, sp, pad):
    # ---- 2x2x2 max-pool: pairwise max tree over the 8 pooling offsets -------
    xv = x_ref[0]                                  # (8, Cin, Sp)
    m01 = jnp.maximum(xv[0], xv[1])
    m23 = jnp.maximum(xv[2], xv[3])
    m45 = jnp.maximum(xv[4], xv[5])
    m67 = jnp.maximum(xv[6], xv[7])
    pooled = jnp.maximum(jnp.maximum(m01, m23), jnp.maximum(m45, m67))  # (Cin, Sp)

    masks = mask_ref[...]                          # (27, Sp)

    def conv3x3x3_relu(src, buf_ref, w, b, c_in, c_out):
        # src: (c_in, Sp).  Zero-padded flat copy in VMEM so every 3x3x3 tap is
        # a contiguous lane-slice; H/W wrap + D overflow are killed by `masks`.
        buf_ref[...] = jnp.zeros_like(buf_ref)
        buf_ref[:, pl.ds(pad, sp)] = src.astype(jnp.float32)
        acc = jnp.zeros((c_out, sp), jnp.float32)
        for t, (kd, kh, kw) in enumerate(_TAPS):
            off = (kd - 1) * hp * wp + (kh - 1) * wp + (kw - 1)
            slab = buf_ref[:, pl.ds(pad + off, sp)] * masks[t:t + 1, :]  # (c_in, Sp)
            base = t * c_in
            for ci in range(c_in):
                # (c_out, 1) * (1, Sp) broadcast multiply-accumulate on the VPU.
                acc = acc + w[:, base + ci:base + ci + 1] * slab[ci:ci + 1, :]
        return jnp.maximum(acc + b, 0.0)           # bias + ReLU, f32

    h1 = conv3x3x3_relu(pooled, buf1_ref, w1_ref[...], b1_ref[...], cin, cmid)
    out = conv3x3x3_relu(h1, buf2_ref, w2_ref[...], b2_ref[...], cmid, cout)
    o_ref[0] = out.astype(o_ref.dtype)             # (Cout, Sp) lane-dense store


def downsampling_forward(x_ncdhw, params):
    n, cin, d, h, w = x_ncdhw.shape
    assert d % 2 == 0 and h % 2 == 0 and w % 2 == 0
    dp, hp, wp = d // 2, h // 2, w // 2
    sp = dp * hp * wp
    cmid = params["w1"].shape[0]
    cout = params["w2"].shape[0]
    pad = hp * wp + wp + 1                 # max |flat offset| of any 3x3x3 tap
    lpad = sp + 2 * pad

    # One free reshape + one transpose: expose the 8 pooling offsets as a
    # leading reduction axis and flatten the pooled volume onto the lane axis.
    xt = x_ncdhw.reshape(n, cin, dp, 2, hp, 2, wp, 2)
    xt = jnp.transpose(xt, (0, 3, 5, 7, 1, 2, 4, 6)).reshape(n, 8, cin, sp)

    # Conv weights as (C_out, 27*C_in) with column = tap*C_in + ci; bias columns.
    w1 = jnp.transpose(params["w1"], (0, 2, 3, 4, 1)).reshape(cmid, 27 * cin)
    w2 = jnp.transpose(params["w2"], (0, 2, 3, 4, 1)).reshape(cout, 27 * cmid)
    b1 = params["b1"].reshape(cmid, 1).astype(jnp.float32)
    b2 = params["b2"].reshape(cout, 1).astype(jnp.float32)

    masks = jnp.asarray(_tap_boundary_masks(dp, hp, wp))     # (27, Sp) constant

    kernel = functools.partial(
        _fused_downsample_kernel,
        cin=cin, cmid=cmid, cout=cout, hp=hp, wp=wp, sp=sp, pad=pad)

    out = pl.pallas_call(
        kernel,
        out_shape=jax.ShapeDtypeStruct((n, cout, sp), x_ncdhw.dtype),
        grid=(n,),
        in_specs=[
            pl.BlockSpec((1, 8, cin, sp), lambda i: (i, 0, 0, 0)),
            pl.BlockSpec((27, sp), lambda i: (0, 0)),
            pl.BlockSpec((cmid, 27 * cin), lambda i: (0, 0)),
            pl.BlockSpec((cmid, 1), lambda i: (0, 0)),
            pl.BlockSpec((cout, 27 * cmid), lambda i: (0, 0)),
            pl.BlockSpec((cout, 1), lambda i: (0, 0)),
        ],
        out_specs=pl.BlockSpec((1, cout, sp), lambda i: (i, 0, 0)),
        scratch_shapes=[
            pltpu.VMEM((cin, lpad), jnp.float32),    # padded pooled activation
            pltpu.VMEM((cmid, lpad), jnp.float32),   # padded conv1 activation
        ],
        compiler_params=pltpu.CompilerParams(
            dimension_semantics=("parallel",),       # v7x: split batch over 2 TCs
            vmem_limit_bytes=32 * 1024 * 1024,
        ),
    )(xt, masks, w1, b1, w2, b2)

    # Free reshape: (N, Cout, Dp*Hp*Wp) -> NCDHW.
    return out.reshape(n, cout, dp, hp, wp)


# Pure-JAX reference for verification.
def reference_forward(x_ncdhw, params):
    x = jnp.transpose(x_ncdhw, (0, 2, 3, 4, 1))
    x = lax.reduce_window(x, -jnp.inf, lax.max,
                          window_dimensions=(1, 2, 2, 2, 1),
                          window_strides=(1, 2, 2, 2, 1),
                          padding="VALID")

    def conv(x, w, b):
        w_dhwio = jnp.transpose(w, (2, 3, 4, 1, 0))
        y = lax.conv_general_dilated(
            x, w_dhwio, window_strides=(1, 1, 1),
            padding=((1, 1), (1, 1), (1, 1)),
            dimension_numbers=("NDHWC", "DHWIO", "NDHWC"))
        return jnp.maximum(y + b, 0.0)

    x = conv(x, params["w1"], params["b1"])
    x = conv(x, params["w2"], params["b2"])
    return jnp.transpose(x, (0, 4, 1, 2, 3))


if __name__ == "__main__":
    # DownSampling(in_channels=4, out_channels=8), input NCDHW = (2, 4, 8, 8, 8).
    n, cin, d, h, w = 2, 4, 8, 8, 8
    cout = 8
    cmid = cin // 2 if cin > cout else cout // 2   # DoubleConv mid channels

    key = jax.random.PRNGKey(0)
    kx, k1, k2, k3, k4 = jax.random.split(key, 5)
    x = jax.random.normal(kx, (n, cin, d, h, w), jnp.float32)
    params = {
        "w1": 0.1 * jax.random.normal(k1, (cmid, cin, 3, 3, 3), jnp.float32),
        "b1": 0.1 * jax.random.normal(k2, (cmid,), jnp.float32),
        "w2": 0.1 * jax.random.normal(k3, (cout, cmid, 3, 3, 3), jnp.float32),
        "b2": 0.1 * jax.random.normal(k4, (cout,), jnp.float32),
    }

    out = jax.jit(downsampling_forward)(x, params)
    out = jax.block_until_ready(out)

    ref = reference_forward(x, params)
    np.testing.assert_allclose(np.asarray(out), np.asarray(ref), atol=1e-4, rtol=1e-4)
    assert out.shape == (n, cout, d // 2, h // 2, w // 2)
    print("KERNEL_OK")
</pallas_src>

<mosaic_0001>
module attributes {stable_mosaic.version = 11 : i64} {
  func.func @_fused_downsample_kernel(%arg0: i32, %arg1: memref<1x8x4x64xf32, #tpu.memory_space<vmem>>, %arg2: memref<27x64xf32, #tpu.memory_space<vmem>>, %arg3: memref<4x108xf32, #tpu.memory_space<vmem>>, %arg4: memref<4x1xf32, #tpu.memory_space<vmem>>, %arg5: memref<8x108xf32, #tpu.memory_space<vmem>>, %arg6: memref<8x1xf32, #tpu.memory_space<vmem>>, %arg7: memref<1x8x64xf32, #tpu.memory_space<vmem>>, %arg8: memref<4x106xf32, #tpu.memory_space<vmem>>, %arg9: memref<4x106xf32, #tpu.memory_space<vmem>>) attributes {dimension_semantics = [#tpu.dimension_semantics<parallel>], iteration_bounds = array<i64: 2>, scalar_prefetch = 0 : i64, scratch_operands = 2 : i64, tpu.core_type = #tpu.core_type<tc>, window_params = [{transform_indices = @transform_0, window_bounds = array<i64: 1, 8, 4, 64>}, {pipeline_mode = #tpu.pipeline_mode<synchronous>, transform_indices = @transform_1, window_bounds = array<i64: 27, 64>}, {pipeline_mode = #tpu.pipeline_mode<synchronous>, transform_indices = @transform_2, window_bounds = array<i64: 4, 108>}, {pipeline_mode = #tpu.pipeline_mode<synchronous>, transform_indices = @transform_3, window_bounds = array<i64: 4, 1>}, {pipeline_mode = #tpu.pipeline_mode<synchronous>, transform_indices = @transform_4, window_bounds = array<i64: 8, 108>}, {pipeline_mode = #tpu.pipeline_mode<synchronous>, transform_indices = @transform_5, window_bounds = array<i64: 8, 1>}, {transform_indices = @transform_6, window_bounds = array<i64: 1, 8, 64>}]} {
    %c0 = arith.constant 0 : index
    %c0_0 = arith.constant 0 : index
    %c0_1 = arith.constant 0 : index
    %c0_2 = arith.constant 0 : index
    %0 = vector.load %arg1[%c0, %c0_0, %c0_1, %c0_2] : memref<1x8x4x64xf32, #tpu.memory_space<vmem>>, vector<1x8x4x64xf32>
    %1 = vector.shape_cast %0 : vector<1x8x4x64xf32> to vector<8x4x64xf32>
    %2 = vector.extract_strided_slice %1 {offsets = [0, 0, 0], sizes = [1, 4, 64], strides = [1, 1, 1]} : vector<8x4x64xf32> to vector<1x4x64xf32>
    %3 = vector.shape_cast %2 : vector<1x4x64xf32> to vector<4x64xf32>
    %4 = vector.extract_strided_slice %1 {offsets = [1, 0, 0], sizes = [1, 4, 64], strides = [1, 1, 1]} : vector<8x4x64xf32> to vector<1x4x64xf32>
    %5 = vector.shape_cast %4 : vector<1x4x64xf32> to vector<4x64xf32>
    %6 = arith.maximumf %3, %5 : vector<4x64xf32>
    %7 = vector.extract_strided_slice %1 {offsets = [2, 0, 0], sizes = [1, 4, 64], strides = [1, 1, 1]} : vector<8x4x64xf32> to vector<1x4x64xf32>
    %8 = vector.shape_cast %7 : vector<1x4x64xf32> to vector<4x64xf32>
    %9 = vector.extract_strided_slice %1 {offsets = [3, 0, 0], sizes = [1, 4, 64], strides = [1, 1, 1]} : vector<8x4x64xf32> to vector<1x4x64xf32>
    %10 = vector.shape_cast %9 : vector<1x4x64xf32> to vector<4x64xf32>
    %11 = arith.maximumf %8, %10 : vector<4x64xf32>
    %12 = vector.extract_strided_slice %1 {offsets = [4, 0, 0], sizes = [1, 4, 64], strides = [1, 1, 1]} : vector<8x4x64xf32> to vector<1x4x64xf32>
    %13 = vector.shape_cast %12 : vector<1x4x64xf32> to vector<4x64xf32>
    %14 = vector.extract_strided_slice %1 {offsets = [5, 0, 0], sizes = [1, 4, 64], strides = [1, 1, 1]} : vector<8x4x64xf32> to vector<1x4x64xf32>
    %15 = vector.shape_cast %14 : vector<1x4x64xf32> to vector<4x64xf32>
    %16 = arith.maximumf %13, %15 : vector<4x64xf32>
    %17 = vector.extract_strided_slice %1 {offsets = [6, 0, 0], sizes = [1, 4, 64], strides = [1, 1, 1]} : vector<8x4x64xf32> to vector<1x4x64xf32>
    %18 = vector.shape_cast %17 : vector<1x4x64xf32> to vector<4x64xf32>
    %19 = vector.extract_strided_slice %1 {offsets = [7, 0, 0], sizes = [1, 4, 64], strides = [1, 1, 1]} : vector<8x4x64xf32> to vector<1x4x64xf32>
    %20 = vector.shape_cast %19 : vector<1x4x64xf32> to vector<4x64xf32>
    %21 = arith.maximumf %18, %20 : vector<4x64xf32>
    %22 = arith.maximumf %6, %11 : vector<4x64xf32>
    %23 = arith.maximumf %16, %21 : vector<4x64xf32>
    %24 = arith.maximumf %22, %23 : vector<4x64xf32>
    %c0_3 = arith.constant 0 : index
    %c0_4 = arith.constant 0 : index
    %25 = vector.load %arg2[%c0_3, %c0_4] : memref<27x64xf32, #tpu.memory_space<vmem>>, vector<27x64xf32>
    %c0_5 = arith.constant 0 : index
    %c0_6 = arith.constant 0 : index
    %26 = vector.load %arg3[%c0_5, %c0_6] : memref<4x108xf32, #tpu.memory_space<vmem>>, vector<4x108xf32>
    %c0_7 = arith.constant 0 : index
    %c0_8 = arith.constant 0 : index
    %27 = vector.load %arg4[%c0_7, %c0_8] : memref<4x1xf32, #tpu.memory_space<vmem>>, vector<4x1xf32>
    %cst = arith.constant 0.000000e+00 : f32
    %28 = vector.broadcast %cst : f32 to vector<4x106xf32>
    %c0_9 = arith.constant 0 : index
    %c0_10 = arith.constant 0 : index
    %29 = vector.load %arg8[%c0_9, %c0_10] : memref<4x106xf32, #tpu.memory_space<vmem>>, vector<4x106xf32>
    tpu.vector_store %arg8[%c0_9, %c0_10], %28 {strides = array<i32>} : memref<4x106xf32, #tpu.memory_space<vmem>>, vector<4x106xf32>,
    %c0_11 = arith.constant 0 : index
    %c21 = arith.constant 21 : index
    %30 = vector.load %arg8[%c0_11, %c21] : memref<4x106xf32, #tpu.memory_space<vmem>>, vector<4x64xf32>
    tpu.vector_store %arg8[%c0_11, %c21], %24 {strides = array<i32>} : memref<4x106xf32, #tpu.memory_space<vmem>>, vector<4x64xf32>,
    %cst_12 = arith.constant 0.000000e+00 : f32
    %31 = vector.broadcast %cst_12 : f32 to vector<4x64xf32>
    %c0_13 = arith.constant 0 : index
    %c0_14 = arith.constant 0 : index
    %32 = vector.load %arg8[%c0_13, %c0_14] : memref<4x106xf32, #tpu.memory_space<vmem>>, vector<4x64xf32>
    %33 = vector.extract_strided_slice %25 {offsets = [0, 0], sizes = [1, 64], strides = [1, 1]} : vector<27x64xf32> to vector<1x64xf32>
    %34 = vector.broadcast %33 : vector<1x64xf32> to vector<4x64xf32>
    %35 = arith.mulf %32, %34 : vector<4x64xf32>
    %36 = vector.extract_strided_slice %26 {offsets = [0, 0], sizes = [4, 1], strides = [1, 1]} : vector<4x108xf32> to vector<4x1xf32>
    %37 = vector.extract_strided_slice %35 {offsets = [0, 0], sizes = [1, 64], strides = [1, 1]} : vector<4x64xf32> to vector<1x64xf32>
    %38 = vector.broadcast %36 : vector<4x1xf32> to vector<4x64xf32>
    %39 = vector.broadcast %37 : vector<1x64xf32> to vector<4x64xf32>
    %40 = arith.mulf %38, %39 : vector<4x64xf32>
    %41 = arith.addf %31, %40 : vector<4x64xf32>
    %42 = vector.extract_strided_slice %26 {offsets = [0, 1], sizes = [4, 1], strides = [1, 1]} : vector<4x108xf32> to vector<4x1xf32>
    %43 = vector.extract_strided_slice %35 {offsets = [1, 0], sizes = [1, 64], strides = [1, 1]} : vector<4x64xf32> to vector<1x64xf32>
    %44 = vector.broadcast %42 : vector<4x1xf32> to vector<4x64xf32>
    %45 = vector.broadcast %43 : vector<1x64xf32> to vector<4x64xf32>
    %46 = arith.mulf %44, %45 : vector<4x64xf32>
    %47 = arith.addf %41, %46 : vector<4x64xf32>
    %48 = vector.extract_strided_slice %26 {offsets = [0, 2], sizes = [4, 1], strides = [1, 1]} : vector<4x108xf32> to vector<4x1xf32>
    %49 = vector.extract_strided_slice %35 {offsets = [2, 0], sizes = [1, 64], strides = [1, 1]} : vector<4x64xf32> to vector<1x64xf32>
    %50 = vector.broadcast %48 : vector<4x1xf32> to vector<4x64xf32>
    %51 = vector.broadcast %49 : vector<1x64xf32> to vector<4x64xf32>
    %52 = arith.mulf %50, %51 : vector<4x64xf32>
    %53 = arith.addf %47, %52 : vector<4x64xf32>
    %54 = vector.extract_strided_slice %26 {offsets = [0, 3], sizes = [4, 1], strides = [1, 1]} : vector<4x108xf32> to vector<4x1xf32>
    %55 = vector.extract_strided_slice %35 {offsets = [3, 0], sizes = [1, 64], strides = [1, 1]} : vector<4x64xf32> to vector<1x64xf32>
    %56 = vector.broadcast %54 : vector<4x1xf32> to vector<4x64xf32>
    %57 = vector.broadcast %55 : vector<1x64xf32> to vector<4x64xf32>
    %58 = arith.mulf %56, %57 : vector<4x64xf32>
    %59 = arith.addf %53, %58 : vector<4x64xf32>
    %c0_15 = arith.constant 0 : index
    %c1 = arith.constant 1 : index
    %60 = vector.load %arg8[%c0_15, %c1] : memref<4x106xf32, #tpu.memory_space<vmem>>, vector<4x64xf32>
    %61 = vector.extract_strided_slice %25 {offsets = [1, 0], sizes = [1, 64], strides = [1, 1]} : vector<27x64xf32> to vector<1x64xf32>
    %62 = vector.broadcast %61 : vector<1x64xf32> to vector<4x64xf32>
    %63 = arith.mulf %60, %62 : vector<4x64xf32>
    %64 = vector.extract_strided_slice %26 {offsets = [0, 4], sizes = [4, 1], strides = [1, 1]} : vector<4x108xf32> to vector<4x1xf32>
    %65 = vector.extract_strided_slice %63 {offsets = [0, 0], sizes = [1, 64], strides = [1, 1]} : vector<4x64xf32> to vector<1x64xf32>
    %66 = vector.broadcast %64 : vector<4x1xf32> to vector<4x64xf32>
    %67 = vector.broadcast %65 : vector<1x64xf32> to vector<4x64xf32>
    %68 = arith.mulf %66, %67 : vector<4x64xf32>
    %69 = arith.addf %59, %68 : vector<4x64xf32>
    %70 = vector.extract_strided_slice %26 {offsets = [0, 5], sizes = [4, 1], strides = [1, 1]} : vector<4x108xf32> to vector<4x1xf32>
    %71 = vector.extract_strided_slice %63 {offsets = [1, 0], sizes = [1, 64], strides = [1, 1]} : vector<4x64xf32> to vector<1x64xf32>
    %72 = vector.broadcast %70 : vector<4x1xf32> to vector<4x64xf32>
    %73 = vector.broadcast %71 : vector<1x64xf32> to vector<4x64xf32>
    %74 = arith.mulf %72, %73 : vector<4x64xf32>
    %75 = arith.addf %69, %74 : vector<4x64xf32>
    %76 = vector.extract_strided_slice %26 {offsets = [0, 6], sizes = [4, 1], strides = [1, 1]} : vector<4x108xf32> to vector<4x1xf32>
    %77 = vector.extract_strided_slice %63 {offsets = [2, 0], sizes = [1, 64], strides = [1, 1]} : vector<4x64xf32> to vector<1x64xf32>
    %78 = vector.broadcast %76 : vector<4x1xf32> to vector<4x64xf32>
    %79 = vector.broadcast %77 : vector<1x64xf32> to vector<4x64xf32>
    %80 = arith.mulf %78, %79 : vector<4x64xf32>
    %81 = arith.addf %75, %80 : vector<4x64xf32>
    %82 = vector.extract_strided_slice %26 {offsets = [0, 7], sizes = [4, 1], strides = [1, 1]} : vector<4x108xf32> to vector<4x1xf32>
    %83 = vector.extract_strided_slice %63 {offsets = [3, 0], sizes = [1, 64], strides = [1, 1]} : vector<4x64xf32> to vector<1x64xf32>
    %84 = vector.broadcast %82 : vector<4x1xf32> to vector<4x64xf32>
    %85 = vector.broadcast %83 : vector<1x64xf32> to vector<4x64xf32>
    %86 = arith.mulf %84, %85 : vector<4x64xf32>
    %87 = arith.addf %81, %86 : vector<4x64xf32>
    %c0_16 = arith.constant 0 : index
    %c2 = arith.constant 2 : index
    %88 = vector.load %arg8[%c0_16, %c2] : memref<4x106xf32, #tpu.memory_space<vmem>>, vector<4x64xf32>
    %89 = vector.extract_strided_slice %25 {offsets = [2, 0], sizes = [1, 64], strides = [1, 1]} : vector<27x64xf32> to vector<1x64xf32>
    %90 = vector.broadcast %89 : vector<1x64xf32> to vector<4x64xf32>
    %91 = arith.mulf %88, %90 : vector<4x64xf32>
    %92 = vector.extract_strided_slice %26 {offsets = [0, 8], sizes = [4, 1], strides = [1, 1]} : vector<4x108xf32> to vector<4x1xf32>
    %93 = vector.extract_strided_slice %91 {offsets = [0, 0], sizes = [1, 64], strides = [1, 1]} : vector<4x64xf32> to vector<1x64xf32>
    %94 = vector.broadcast %92 : vector<4x1xf32> to vector<4x64xf32>
    %95 = vector.broadcast %93 : vector<1x64xf32> to vector<4x64xf32>
    %96 = arith.mulf %94, %95 : vector<4x64xf32>
    %97 = arith.addf %87, %96 : vector<4x64xf32>
    %98 = vector.extract_strided_slice %26 {offsets = [0, 9], sizes = [4, 1], strides = [1, 1]} : vector<4x108xf32> to vector<4x1xf32>
    %99 = vector.extract_strided_slice %91 {offsets = [1, 0], sizes = [1, 64], strides = [1, 1]} : vector<4x64xf32> to vector<1x64xf32>
    %100 = vector.broadcast %98 : vector<4x1xf32> to vector<4x64xf32>
    %101 = vector.broadcast %99 : vector<1x64xf32> to vector<4x64xf32>
    %102 = arith.mulf %100, %101 : vector<4x64xf32>
    %103 = arith.addf %97, %102 : vector<4x64xf32>
    %104 = vector.extract_strided_slice %26 {offsets = [0, 10], sizes = [4, 1], strides = [1, 1]} : vector<4x108xf32> to vector<4x1xf32>
    %105 = vector.extract_strided_slice %91 {offsets = [2, 0], sizes = [1, 64], strides = [1, 1]} : vector<4x64xf32> to vector<1x64xf32>
    %106 = vector.broadcast %104 : vector<4x1xf32> to vector<4x64xf32>
    %107 = vector.broadcast %105 : vector<1x64xf32> to vector<4x64xf32>
    %108 = arith.mulf %106, %107 : vector<4x64xf32>
    %109 = arith.addf %103, %108 : vector<4x64xf32>
    %110 = vector.extract_strided_slice %26 {offsets = [0, 11], sizes = [4, 1], strides = [1, 1]} : vector<4x108xf32> to vector<4x1xf32>
    %111 = vector.extract_strided_slice %91 {offsets = [3, 0], sizes = [1, 64], strides = [1, 1]} : vector<4x64xf32> to vector<1x64xf32>
    %112 = vector.broadcast %110 : vector<4x1xf32> to vector<4x64xf32>
    %113 = vector.broadcast %111 : vector<1x64xf32> to vector<4x64xf32>
    %114 = arith.mulf %112, %113 : vector<4x64xf32>
    %115 = arith.addf %109, %114 : vector<4x64xf32>
    %c0_17 = arith.constant 0 : index
    %c4 = arith.constant 4 : index
    %116 = vector.load %arg8[%c0_17, %c4] : memref<4x106xf32, #tpu.memory_space<vmem>>, vector<4x64xf32>
    %117 = vector.extract_strided_slice %25 {offsets = [3, 0], sizes = [1, 64], strides = [1, 1]} : vector<27x64xf32> to vector<1x64xf32>
    %118 = vector.broadcast %117 : vector<1x64xf32> to vector<4x64xf32>
    %119 = arith.mulf %116, %118 : vector<4x64xf32>
    %120 = vector.extract_strided_slice %26 {offsets = [0, 12], sizes = [4, 1], strides = [1, 1]} : vector<4x108xf32> to vector<4x1xf32>
    %121 = vector.extract_strided_slice %119 {offsets = [0, 0], sizes = [1, 64], strides = [1, 1]} : vector<4x64xf32> to vector<1x64xf32>
    %122 = vector.broadcast %120 : vector<4x1xf32> to vector<4x64xf32>
    %123 = vector.broadcast %121 : vector<1x64xf32> to vector<4x64xf32>
    %124 = arith.mulf %122, %123 : vector<4x64xf32>
    %125 = arith.addf %115, %124 : vector<4x64xf32>
    %126 = vector.extract_strided_slice %26 {offsets = [0, 13], sizes = [4, 1], strides = [1, 1]} : vector<4x108xf32> to vector<4x1xf32>
    %127 = vector.extract_strided_slice %119 {offsets = [1, 0], sizes = [1, 64], strides = [1, 1]} : vector<4x64xf32> to vector<1x64xf32>
    %128 = vector.broadcast %126 : vector<4x1xf32> to vector<4x64xf32>
    %129 = vector.broadcast %127 : vector<1x64xf32> to vector<4x64xf32>
    %130 = arith.mulf %128, %129 : vector<4x64xf32>
    %131 = arith.addf %125, %130 : vector<4x64xf32>
    %132 = vector.extract_strided_slice %26 {offsets = [0, 14], sizes = [4, 1], strides = [1, 1]} : vector<4x108xf32> to vector<4x1xf32>
    %133 = vector.extract_strided_slice %119 {offsets = [2, 0], sizes = [1, 64], strides = [1, 1]} : vector<4x64xf32> to vector<1x64xf32>
    %134 = vector.broadcast %132 : vector<4x1xf32> to vector<4x64xf32>
    %135 = vector.broadcast %133 : vector<1x64xf32> to vector<4x64xf32>
    %136 = arith.mulf %134, %135 : vector<4x64xf32>
    %137 = arith.addf %131, %136 : vector<4x64xf32>
    %138 = vector.extract_strided_slice %26 {offsets = [0, 15], sizes = [4, 1], strides = [1, 1]} : vector<4x108xf32> to vector<4x1xf32>
    %139 = vector.extract_strided_slice %119 {offsets = [3, 0], sizes = [1, 64], strides = [1, 1]} : vector<4x64xf32> to vector<1x64xf32>
    %140 = vector.broadcast %138 : vector<4x1xf32> to vector<4x64xf32>
    %141 = vector.broadcast %139 : vector<1x64xf32> to vector<4x64xf32>
    %142 = arith.mulf %140, %141 : vector<4x64xf32>
    %143 = arith.addf %137, %142 : vector<4x64xf32>
    %c0_18 = arith.constant 0 : index
    %c5 = arith.constant 5 : index
    %144 = vector.load %arg8[%c0_18, %c5] : memref<4x106xf32, #tpu.memory_space<vmem>>, vector<4x64xf32>
    %145 = vector.extract_strided_slice %25 {offsets = [4, 0], sizes = [1, 64], strides = [1, 1]} : vector<27x64xf32> to vector<1x64xf32>
    %146 = vector.broadcast %145 : vector<1x64xf32> to vector<4x64xf32>
    %147 = arith.mulf %144, %146 : vector<4x64xf32>
    %148 = vector.extract_strided_slice %26 {offsets = [0, 16], sizes = [4, 1], strides = [1, 1]} : vector<4x108xf32> to vector<4x1xf32>
    %149 = vector.extract_strided_slice %147 {offsets = [0, 0], sizes = [1, 64], strides = [1, 1]} : vector<4x64xf32> to vector<1x64xf32>
    %150 = vector.broadcast %148 : vector<4x1xf32> to vector<4x64xf32>
    %151 = vector.broadcast %149 : vector<1x64xf32> to vector<4x64xf32>
    %152 = arith.mulf %150, %151 : vector<4x64xf32>
    %153 = arith.addf %143, %152 : vector<4x64xf32>
    %154 = vector.extract_strided_slice %26 {offsets = [0, 17], sizes = [4, 1], strides = [1, 1]} : vector<4x108xf32> to vector<4x1xf32>
    %155 = vector.extract_strided_slice %147 {offsets = [1, 0], sizes = [1, 64], strides = [1, 1]} : vector<4x64xf32> to vector<1x64xf32>
    %156 = vector.broadcast %154 : vector<4x1xf32> to vector<4x64xf32>
    %157 = vector.broadcast %155 : vector<1x64xf32> to vector<4x64xf32>
    %158 = arith.mulf %156, %157 : vector<4x64xf32>
    %159 = arith.addf %153, %158 : vector<4x64xf32>
    %160 = vector.extract_strided_slice %26 {offsets = [0, 18], sizes = [4, 1], strides = [1, 1]} : vector<4x108xf32> to vector<4x1xf32>
    %161 = vector.extract_strided_slice %147 {offsets = [2, 0], sizes = [1, 64], strides = [1, 1]} : vector<4x64xf32> to vector<1x64xf32>
    %162 = vector.broadcast %160 : vector<4x1xf32> to vector<4x64xf32>
    %163 = vector.broadcast %161 : vector<1x64xf32> to vector<4x64xf32>
    %164 = arith.mulf %162, %163 : vector<4x64xf32>
    %165 = arith.addf %159, %164 : vector<4x64xf32>
    %166 = vector.extract_strided_slice %26 {offsets = [0, 19], sizes = [4, 1], strides = [1, 1]} : vector<4x108xf32> to vector<4x1xf32>
    %167 = vector.extract_strided_slice %147 {offsets = [3, 0], sizes = [1, 64], strides = [1, 1]} : vector<4x64xf32> to vector<1x64xf32>
    %168 = vector.broadcast %166 : vector<4x1xf32> to vector<4x64xf32>
    %169 = vector.broadcast %167 : vector<1x64xf32> to vector<4x64xf32>
    %170 = arith.mulf %168, %169 : vector<4x64xf32>
    %171 = arith.addf %165, %170 : vector<4x64xf32>
    %c0_19 = arith.constant 0 : index
    %c6 = arith.constant 6 : index
    %172 = vector.load %arg8[%c0_19, %c6] : memref<4x106xf32, #tpu.memory_space<vmem>>, vector<4x64xf32>
    %173 = vector.extract_strided_slice %25 {offsets = [5, 0], sizes = [1, 64], strides = [1, 1]} : vector<27x64xf32> to vector<1x64xf32>
    %174 = vector.broadcast %173 : vector<1x64xf32> to vector<4x64xf32>
    %175 = arith.mulf %172, %174 : vector<4x64xf32>
    %176 = vector.extract_strided_slice %26 {offsets = [0, 20], sizes = [4, 1], strides = [1, 1]} : vector<4x108xf32> to vector<4x1xf32>
    %177 = vector.extract_strided_slice %175 {offsets = [0, 0], sizes = [1, 64], strides = [1, 1]} : vector<4x64xf32> to vector<1x64xf32>
    %178 = vector.broadcast %176 : vector<4x1xf32> to vector<4x64xf32>
    %179 = vector.broadcast %177 : vector<1x64xf32> to vector<4x64xf32>
    %180 = arith.mulf %178, %179 : vector<4x64xf32>
    %181 = arith.addf %171, %180 : vector<4x64xf32>
    %182 = vector.extract_strided_slice %26 {offsets = [0, 21], sizes = [4, 1], strides = [1, 1]} : vector<4x108xf32> to vector<4x1xf32>
    %183 = vector.extract_strided_slice %175 {offsets = [1, 0], sizes = [1, 64], strides = [1, 1]} : vector<4x64xf32> to vector<1x64xf32>
    %184 = vector.broadcast %182 : vector<4x1xf32> to vector<4x64xf32>
    %185 = vector.broadcast %183 : vector<1x64xf32> to vector<4x64xf32>
    %186 = arith.mulf %184, %185 : vector<4x64xf32>
    %187 = arith.addf %181, %186 : vector<4x64xf32>
    %188 = vector.extract_strided_slice %26 {offsets = [0, 22], sizes = [4, 1], strides = [1, 1]} : vector<4x108xf32> to vector<4x1xf32>
    %189 = vector.extract_strided_slice %175 {offsets = [2, 0], sizes = [1, 64], strides = [1, 1]} : vector<4x64xf32> to vector<1x64xf32>
    %190 = vector.broadcast %188 : vector<4x1xf32> to vector<4x64xf32>
    %191 = vector.broadcast %189 : vector<1x64xf32> to vector<4x64xf32>
    %192 = arith.mulf %190, %191 : vector<4x64xf32>
    %193 = arith.addf %187, %192 : vector<4x64xf32>
    %194 = vector.extract_strided_slice %26 {offsets = [0, 23], sizes = [4, 1], strides = [1, 1]} : vector<4x108xf32> to vector<4x1xf32>
    %195 = vector.extract_strided_slice %175 {offsets = [3, 0], sizes = [1, 64], strides = [1, 1]} : vector<4x64xf32> to vector<1x64xf32>
    %196 = vector.broadcast %194 : vector<4x1xf32> to vector<4x64xf32>
    %197 = vector.broadcast %195 : vector<1x64xf32> to vector<4x64xf32>
    %198 = arith.mulf %196, %197 : vector<4x64xf32>
    %199 = arith.addf %193, %198 : vector<4x64xf32>
    %c0_20 = arith.constant 0 : index
    %c8 = arith.constant 8 : index
    %200 = vector.load %arg8[%c0_20, %c8] : memref<4x106xf32, #tpu.memory_space<vmem>>, vector<4x64xf32>
    %201 = vector.extract_strided_slice %25 {offsets = [6, 0], sizes = [1, 64], strides = [1, 1]} : vector<27x64xf32> to vector<1x64xf32>
    %202 = vector.broadcast %201 : vector<1x64xf32> to vector<4x64xf32>
    %203 = arith.mulf %200, %202 : vector<4x64xf32>
    %204 = vector.extract_strided_slice %26 {offsets = [0, 24], sizes = [4, 1], strides = [1, 1]} : vector<4x108xf32> to vector<4x1xf32>
    %205 = vector.extract_strided_slice %203 {offsets = [0, 0], sizes = [1, 64], strides = [1, 1]} : vector<4x64xf32> to vector<1x64xf32>
    %206 = vector.broadcast %204 : vector<4x1xf32> to vector<4x64xf32>
    %207 = vector.broadcast %205 : vector<1x64xf32> to vector<4x64xf32>
    %208 = arith.mulf %206, %207 : vector<4x64xf32>
    %209 = arith.addf %199, %208 : vector<4x64xf32>
    %210 = vector.extract_strided_slice %26 {offsets = [0, 25], sizes = [4, 1], strides = [1, 1]} : vector<4x108xf32> to vector<4x1xf32>
    %211 = vector.extract_strided_slice %203 {offsets = [1, 0], sizes = [1, 64], strides = [1, 1]} : vector<4x64xf32> to vector<1x64xf32>
    %212 = vector.broadcast %210 : vector<4x1xf32> to vector<4x64xf32>
    %213 = vector.broadcast %211 : vector<1x64xf32> to vector<4x64xf32>
    %214 = arith.mulf %212, %213 : vector<4x64xf32>
    %215 = arith.addf %209, %214 : vector<4x64xf32>
    %216 = vector.extract_strided_slice %26 {offsets = [0, 26], sizes = [4, 1], strides = [1, 1]} : vector<4x108xf32> to vector<4x1xf32>
    %217 = vector.extract_strided_slice %203 {offsets = [2, 0], sizes = [1, 64], strides = [1, 1]} : vector<4x64xf32> to vector<1x64xf32>
    %218 = vector.broadcast %216 : vector<4x1xf32> to vector<4x64xf32>
    %219 = vector.broadcast %217 : vector<1x64xf32> to vector<4x64xf32>
    %220 = arith.mulf %218, %219 : vector<4x64xf32>
    %221 = arith.addf %215, %220 : vector<4x64xf32>
    %222 = vector.extract_strided_slice %26 {offsets = [0, 27], sizes = [4, 1], strides = [1, 1]} : vector<4x108xf32> to vector<4x1xf32>
    %223 = vector.extract_strided_slice %203 {offsets = [3, 0], sizes = [1, 64], strides = [1, 1]} : vector<4x64xf32> to vector<1x64xf32>
    %224 = vector.broadcast %222 : vector<4x1xf32> to vector<4x64xf32>
    %225 = vector.broadcast %223 : vector<1x64xf32> to vector<4x64xf32>
    %226 = arith.mulf %224, %225 : vector<4x64xf32>
    %227 = arith.addf %221, %226 : vector<4x64xf32>
    %c0_21 = arith.constant 0 : index
    %c9 = arith.constant 9 : index
    %228 = vector.load %arg8[%c0_21, %c9] : memref<4x106xf32, #tpu.memory_space<vmem>>, vector<4x64xf32>
    %229 = vector.extract_strided_slice %25 {offsets = [7, 0], sizes = [1, 64], strides = [1, 1]} : vector<27x64xf32> to vector<1x64xf32>
    %230 = vector.broadcast %229 : vector<1x64xf32> to vector<4x64xf32>
    %231 = arith.mulf %228, %230 : vector<4x64xf32>
    %232 = vector.extract_strided_slice %26 {offsets = [0, 28], sizes = [4, 1], strides = [1, 1]} : vector<4x108xf32> to vector<4x1xf32>
    %233 = vector.extract_strided_slice %231 {offsets = [0, 0], sizes = [1, 64], strides = [1, 1]} : vector<4x64xf32> to vector<1x64xf32>
    %234 = vector.broadcast %232 : vector<4x1xf32> to vector<4x64xf32>
    %235 = vector.broadcast %233 : vector<1x64xf32> to vector<4x64xf32>
    %236 = arith.mulf %234, %235 : vector<4x64xf32>
    %237 = arith.addf %227, %236 : vector<4x64xf32>
    %238 = vector.extract_strided_slice %26 {offsets = [0, 29], sizes = [4, 1], strides = [1, 1]} : vector<4x108xf32> to vector<4x1xf32>
    %239 = vector.extract_strided_slice %231 {offsets = [1, 0], sizes = [1, 64], strides = [1, 1]} : vector<4x64xf32> to vector<1x64xf32>
    %240 = vector.broadcast %238 : vector<4x1xf32> to vector<4x64xf32>
    %241 = vector.broadcast %239 : vector<1x64xf32> to vector<4x64xf32>
    %242 = arith.mulf %240, %241 : vector<4x64xf32>
    %243 = arith.addf %237, %242 : vector<4x64xf32>
    %244 = vector.extract_strided_slice %26 {offsets = [0, 30], sizes = [4, 1], strides = [1, 1]} : vector<4x108xf32> to vector<4x1xf32>
    %245 = vector.extract_strided_slice %231 {offsets = [2, 0], sizes = [1, 64], strides = [1, 1]} : vector<4x64xf32> to vector<1x64xf32>
    %246 = vector.broadcast %244 : vector<4x1xf32> to vector<4x64xf32>
    %247 = vector.broadcast %245 : vector<1x64xf32> to vector<4x64xf32>
    %248 = arith.mulf %246, %247 : vector<4x64xf32>
    %249 = arith.addf %243, %248 : vector<4x64xf32>
    %250 = vector.extract_strided_slice %26 {offsets = [0, 31], sizes = [4, 1], strides = [1, 1]} : vector<4x108xf32> to vector<4x1xf32>
    %251 = vector.extract_strided_slice %231 {offsets = [3, 0], sizes = [1, 64], strides = [1, 1]} : vector<4x64xf32> to vector<1x64xf32>
    %252 = vector.broadcast %250 : vector<4x1xf32> to vector<4x64xf32>
    %253 = vector.broadcast %251 : vector<1x64xf32> to vector<4x64xf32>
    %254 = arith.mulf %252, %253 : vector<4x64xf32>
    %255 = arith.addf %249, %254 : vector<4x64xf32>
    %c0_22 = arith.constant 0 : index
    %c10 = arith.constant 10 : index
    %256 = vector.load %arg8[%c0_22, %c10] : memref<4x106xf32, #tpu.memory_space<vmem>>, vector<4x64xf32>
    %257 = vector.extract_strided_slice %25 {offsets = [8, 0], sizes = [1, 64], strides = [1, 1]} : vector<27x64xf32> to vector<1x64xf32>
    %258 = vector.broadcast %257 : vector<1x64xf32> to vector<4x64xf32>
    %259 = arith.mulf %256, %258 : vector<4x64xf32>
    %260 = vector.extract_strided_slice %26 {offsets = [0, 32], sizes = [4, 1], strides = [1, 1]} : vector<4x108xf32> to vector<4x1xf32>
    %261 = vector.extract_strided_slice %259 {offsets = [0, 0], sizes = [1, 64], strides = [1, 1]} : vector<4x64xf32> to vector<1x64xf32>
    %262 = vector.broadcast %260 : vector<4x1xf32> to vector<4x64xf32>
    %263 = vector.broadcast %261 : vector<1x64xf32> to vector<4x64xf32>
    %264 = arith.mulf %262, %263 : vector<4x64xf32>
    %265 = arith.addf %255, %264 : vector<4x64xf32>
    %266 = vector.extract_strided_slice %26 {offsets = [0, 33], sizes = [4, 1], strides = [1, 1]} : vector<4x108xf32> to vector<4x1xf32>
    %267 = vector.extract_strided_slice %259 {offsets = [1, 0], sizes = [1, 64], strides = [1, 1]} : vector<4x64xf32> to vector<1x64xf32>
    %268 = vector.broadcast %266 : vector<4x1xf32> to vector<4x64xf32>
    %269 = vector.broadcast %267 : vector<1x64xf32> to vector<4x64xf32>
    %270 = arith.mulf %268, %269 : vector<4x64xf32>
    %271 = arith.addf %265, %270 : vector<4x64xf32>
    %272 = vector.extract_strided_slice %26 {offsets = [0, 34], sizes = [4, 1], strides = [1, 1]} : vector<4x108xf32> to vector<4x1xf32>
    %273 = vector.extract_strided_slice %259 {offsets = [2, 0], sizes = [1, 64], strides = [1, 1]} : vector<4x64xf32> to vector<1x64xf32>
    %274 = vector.broadcast %272 : vector<4x1xf32> to vector<4x64xf32>
    %275 = vector.broadcast %273 : vector<1x64xf32> to vector<4x64xf32>
    %276 = arith.mulf %274, %275 : vector<4x64xf32>
    %277 = arith.addf %271, %276 : vector<4x64xf32>
    %278 = vector.extract_strided_slice %26 {offsets = [0, 35], sizes = [4, 1], strides = [1, 1]} : vector<4x108xf32> to vector<4x1xf32>
    %279 = vector.extract_strided_slice %259 {offsets = [3, 0], sizes = [1, 64], strides = [1, 1]} : vector<4x64xf32> to vector<1x64xf32>
    %280 = vector.broadcast %278 : vector<4x1xf32> to vector<4x64xf32>
    %281 = vector.broadcast %279 : vector<1x64xf32> to vector<4x64xf32>
    %282 = arith.mulf %280, %281 : vector<4x64xf32>
    %283 = arith.addf %277, %282 : vector<4x64xf32>
    %c0_23 = arith.constant 0 : index
    %c16 = arith.constant 16 : index
    %284 = vector.load %arg8[%c0_23, %c16] : memref<4x106xf32, #tpu.memory_space<vmem>>, vector<4x64xf32>
    %285 = vector.extract_strided_slice %25 {offsets = [9, 0], sizes = [1, 64], strides = [1, 1]} : vector<27x64xf32> to vector<1x64xf32>
    %286 = vector.broadcast %285 : vector<1x64xf32> to vector<4x64xf32>
    %287 = arith.mulf %284, %286 : vector<4x64xf32>
    %288 = vector.extract_strided_slice %26 {offsets = [0, 36], sizes = [4, 1], strides = [1, 1]} : vector<4x108xf32> to vector<4x1xf32>
    %289 = vector.extract_strided_slice %287 {offsets = [0, 0], sizes = [1, 64], strides = [1, 1]} : vector<4x64xf32> to vector<1x64xf32>
    %290 = vector.broadcast %288 : vector<4x1xf32> to vector<4x64xf32>
    %291 = vector.broadcast %289 : vector<1x64xf32> to vector<4x64xf32>
    %292 = arith.mulf %290, %291 : vector<4x64xf32>
    %293 = arith.addf %283, %292 : vector<4x64xf32>
    %294 = vector.extract_strided_slice %26 {offsets = [0, 37], sizes = [4, 1], strides = [1, 1]} : vector<4x108xf32> to vector<4x1xf32>
    %295 = vector.extract_strided_slice %287 {offsets = [1, 0], sizes = [1, 64], strides = [1, 1]} : vector<4x64xf32> to vector<1x64xf32>
    %296 = vector.broadcast %294 : vector<4x1xf32> to vector<4x64xf32>
    %297 = vector.broadcast %295 : vector<1x64xf32> to vector<4x64xf32>
    %298 = arith.mulf %296, %297 : vector<4x64xf32>
    %299 = arith.addf %293, %298 : vector<4x64xf32>
    %300 = vector.extract_strided_slice %26 {offsets = [0, 38], sizes = [4, 1], strides = [1, 1]} : vector<4x108xf32> to vector<4x1xf32>
    %301 = vector.extract_strided_slice %287 {offsets = [2, 0], sizes = [1, 64], strides = [1, 1]} : vector<4x64xf32> to vector<1x64xf32>
    %302 = vector.broadcast %300 : vector<4x1xf32> to vector<4x64xf32>
    %303 = vector.broadcast %301 : vector<1x64xf32> to vector<4x64xf32>
    %304 = arith.mulf %302, %303 : vector<4x64xf32>
    %305 = arith.addf %299, %304 : vector<4x64xf32>
    %306 = vector.extract_strided_slice %26 {offsets = [0, 39], sizes = [4, 1], strides = [1, 1]} : vector<4x108xf32> to vector<4x1xf32>
    %307 = vector.extract_strided_slice %287 {offsets = [3, 0], sizes = [1, 64], strides = [1, 1]} : vector<4x64xf32> to vector<1x64xf32>
    %308 = vector.broadcast %306 : vector<4x1xf32> to vector<4x64xf32>
    %309 = vector.broadcast %307 : vector<1x64xf32> to vector<4x64xf32>
    %310 = arith.mulf %308, %309 : vector<4x64xf32>
    %311 = arith.addf %305, %310 : vector<4x64xf32>
    %c0_24 = arith.constant 0 : index
    %c17 = arith.constant 17 : index
    %312 = vector.load %arg8[%c0_24, %c17] : memref<4x106xf32, #tpu.memory_space<vmem>>, vector<4x64xf32>
    %313 = vector.extract_strided_slice %25 {offsets = [10, 0], sizes = [1, 64], strides = [1, 1]} : vector<27x64xf32> to vector<1x64xf32>
    %314 = vector.broadcast %313 : vector<1x64xf32> to vector<4x64xf32>
    %315 = arith.mulf %312, %314 : vector<4x64xf32>
    %316 = vector.extract_strided_slice %26 {offsets = [0, 40], sizes = [4, 1], strides = [1, 1]} : vector<4x108xf32> to vector<4x1xf32>
    %317 = vector.extract_strided_slice %315 {offsets = [0, 0], sizes = [1, 64], strides = [1, 1]} : vector<4x64xf32> to vector<1x64xf32>
    %318 = vector.broadcast %316 : vector<4x1xf32> to vector<4x64xf32>
    %319 = vector.broadcast %317 : vector<1x64xf32> to vector<4x64xf32>
    %320 = arith.mulf %318, %319 : vector<4x64xf32>
    %321 = arith.addf %311, %320 : vector<4x64xf32>
    %322 = vector.extract_strided_slice %26 {offsets = [0, 41], sizes = [4, 1], strides = [1, 1]} : vector<4x108xf32> to vector<4x1xf32>
    %323 = vector.extract_strided_slice %315 {offsets = [1, 0], sizes = [1, 64], strides = [1, 1]} : vector<4x64xf32> to vector<1x64xf32>
    %324 = vector.broadcast %322 : vector<4x1xf32> to vector<4x64xf32>
    %325 = vector.broadcast %323 : vector<1x64xf32> to vector<4x64xf32>
    %326 = arith.mulf %324, %325 : vector<4x64xf32>
    %327 = arith.addf %321, %326 : vector<4x64xf32>
    %328 = vector.extract_strided_slice %26 {offsets = [0, 42], sizes = [4, 1], strides = [1, 1]} : vector<4x108xf32> to vector<4x1xf32>
    %329 = vector.extract_strided_slice %315 {offsets = [2, 0], sizes = [1, 64], strides = [1, 1]} : vector<4x64xf32> to vector<1x64xf32>
    %330 = vector.broadcast %328 : vector<4x1xf32> to vector<4x64xf32>
    %331 = vector.broadcast %329 : vector<1x64xf32> to vector<4x64xf32>
    %332 = arith.mulf %330, %331 : vector<4x64xf32>
    %333 = arith.addf %327, %332 : vector<4x64xf32>
    %334 = vector.extract_strided_slice %26 {offsets = [0, 43], sizes = [4, 1], strides = [1, 1]} : vector<4x108xf32> to vector<4x1xf32>
    %335 = vector.extract_strided_slice %315 {offsets = [3, 0], sizes = [1, 64], strides = [1, 1]} : vector<4x64xf32> to vector<1x64xf32>
    %336 = vector.broadcast %334 : vector<4x1xf32> to vector<4x64xf32>
    %337 = vector.broadcast %335 : vector<1x64xf32> to vector<4x64xf32>
    %338 = arith.mulf %336, %337 : vector<4x64xf32>
    %339 = arith.addf %333, %338 : vector<4x64xf32>
    %c0_25 = arith.constant 0 : index
    %c18 = arith.constant 18 : index
    %340 = vector.load %arg8[%c0_25, %c18] : memref<4x106xf32, #tpu.memory_space<vmem>>, vector<4x64xf32>
    %341 = vector.extract_strided_slice %25 {offsets = [11, 0], sizes = [1, 64], strides = [1, 1]} : vector<27x64xf32> to vector<1x64xf32>
    %342 = vector.broadcast %341 : vector<1x64xf32> to vector<4x64xf32>
    %343 = arith.mulf %340, %342 : vector<4x64xf32>
    %344 = vector.extract_strided_slice %26 {offsets = [0, 44], sizes = [4, 1], strides = [1, 1]} : vector<4x108xf32> to vector<4x1xf32>
    %345 = vector.extract_strided_slice %343 {offsets = [0, 0], sizes = [1, 64], strides = [1, 1]} : vector<4x64xf32> to vector<1x64xf32>
    %346 = vector.broadcast %344 : vector<4x1xf32> to vector<4x64xf32>
    %347 = vector.broadcast %345 : vector<1x64xf32> to vector<4x64xf32>
    %348 = arith.mulf %346, %347 : vector<4x64xf32>
    %349 = arith.addf %339, %348 : vector<4x64xf32>
    %350 = vector.extract_strided_slice %26 {offsets = [0, 45], sizes = [4, 1], strides = [1, 1]} : vector<4x108xf32> to vector<4x1xf32>
    %351 = vector.extract_strided_slice %343 {offsets = [1, 0], sizes = [1, 64], strides = [1, 1]} : vector<4x64xf32> to vector<1x64xf32>
    %352 = vector.broadcast %350 : vector<4x1xf32> to vector<4x64xf32>
    %353 = vector.broadcast %351 : vector<1x64xf32> to vector<4x64xf32>
    %354 = arith.mulf %352, %353 : vector<4x64xf32>
    %355 = arith.addf %349, %354 : vector<4x64xf32>
    %356 = vector.extract_strided_slice %26 {offsets = [0, 46], sizes = [4, 1], strides = [1, 1]} : vector<4x108xf32> to vector<4x1xf32>
    %357 = vector.extract_strided_slice %343 {offsets = [2, 0], sizes = [1, 64], strides = [1, 1]} : vector<4x64xf32> to vector<1x64xf32>
    %358 = vector.broadcast %356 : vector<4x1xf32> to vector<4x64xf32>
    %359 = vector.broadcast %357 : vector<1x64xf32> to vector<4x64xf32>
    %360 = arith.mulf %358, %359 : vector<4x64xf32>
    %361 = arith.addf %355, %360 : vector<4x64xf32>
    %362 = vector.extract_strided_slice %26 {offsets = [0, 47], sizes = [4, 1], strides = [1, 1]} : vector<4x108xf32> to vector<4x1xf32>
    %363 = vector.extract_strided_slice %343 {offsets = [3, 0], sizes = [1, 64], strides = [1, 1]} : vector<4x64xf32> to vector<1x64xf32>
    %364 = vector.broadcast %362 : vector<4x1xf32> to vector<4x64xf32>
    %365 = vector.broadcast %363 : vector<1x64xf32> to vector<4x64xf32>
    %366 = arith.mulf %364, %365 : vector<4x64xf32>
    %367 = arith.addf %361, %366 : vector<4x64xf32>
    %c0_26 = arith.constant 0 : index
    %c20 = arith.constant 20 : index
    %368 = vector.load %arg8[%c0_26, %c20] : memref<4x106xf32, #tpu.memory_space<vmem>>, vector<4x64xf32>
    %369 = vector.extract_strided_slice %25 {offsets = [12, 0], sizes = [1, 64], strides = [1, 1]} : vector<27x64xf32> to vector<1x64xf32>
    %370 = vector.broadcast %369 : vector<1x64xf32> to vector<4x64xf32>
    %371 = arith.mulf %368, %370 : vector<4x64xf32>
    %372 = vector.extract_strided_slice %26 {offsets = [0, 48], sizes = [4, 1], strides = [1, 1]} : vector<4x108xf32> to vector<4x1xf32>
    %373 = vector.extract_strided_slice %371 {offsets = [0, 0], sizes = [1, 64], strides = [1, 1]} : vector<4x64xf32> to vector<1x64xf32>
    %374 = vector.broadcast %372 : vector<4x1xf32> to vector<4x64xf32>
    %375 = vector.broadcast %373 : vector<1x64xf32> to vector<4x64xf32>
    %376 = arith.mulf %374, %375 : vector<4x64xf32>
    %377 = arith.addf %367, %376 : vector<4x64xf32>
    %378 = vector.extract_strided_slice %26 {offsets = [0, 49], sizes = [4, 1], strides = [1, 1]} : vector<4x108xf32> to vector<4x1xf32>
    %379 = vector.extract_strided_slice %371 {offsets = [1, 0], sizes = [1, 64], strides = [1, 1]} : vector<4x64xf32> to vector<1x64xf32>
    %380 = vector.broadcast %378 : vector<4x1xf32> to vector<4x64xf32>
    %381 = vector.broadcast %379 : vector<1x64xf32> to vector<4x64xf32>
    %382 = arith.mulf %380, %381 : vector<4x64xf32>
    %383 = arith.addf %377, %382 : vector<4x64xf32>
    %384 = vector.extract_strided_slice %26 {offsets = [0, 50], sizes = [4, 1], strides = [1, 1]} : vector<4x108xf32> to vector<4x1xf32>
    %385 = vector.extract_strided_slice %371 {offsets = [2, 0], sizes = [1, 64], strides = [1, 1]} : vector<4x64xf32> to vector<1x64xf32>
    %386 = vector.broadcast %384 : vector<4x1xf32> to vector<4x64xf32>
    %387 = vector.broadcast %385 : vector<1x64xf32> to vector<4x64xf32>
    %388 = arith.mulf %386, %387 : vector<4x64xf32>
    %389 = arith.addf %383, %388 : vector<4x64xf32>
    %390 = vector.extract_strided_slice %26 {offsets = [0, 51], sizes = [4, 1], strides = [1, 1]} : vector<4x108xf32> to vector<4x1xf32>
    %391 = vector.extract_strided_slice %371 {offsets = [3, 0], sizes = [1, 64], strides = [1, 1]} : vector<4x64xf32> to vector<1x64xf32>
    %392 = vector.broadcast %390 : vector<4x1xf32> to vector<4x64xf32>
    %393 = vector.broadcast %391 : vector<1x64xf32> to vector<4x64xf32>
    %394 = arith.mulf %392, %393 : vector<4x64xf32>
    %395 = arith.addf %389, %394 : vector<4x64xf32>
    %c0_27 = arith.constant 0 : index
    %c21_28 = arith.constant 21 : index
    %396 = vector.load %arg8[%c0_27, %c21_28] : memref<4x106xf32, #tpu.memory_space<vmem>>, vector<4x64xf32>
    %397 = vector.extract_strided_slice %25 {offsets = [13, 0], sizes = [1, 64], strides = [1, 1]} : vector<27x64xf32> to vector<1x64xf32>
    %398 = vector.broadcast %397 : vector<1x64xf32> to vector<4x64xf32>
    %399 = arith.mulf %396, %398 : vector<4x64xf32>
    %400 = vector.extract_strided_slice %26 {offsets = [0, 52], sizes = [4, 1], strides = [1, 1]} : vector<4x108xf32> to vector<4x1xf32>
    %401 = vector.extract_strided_slice %399 {offsets = [0, 0], sizes = [1, 64], strides = [1, 1]} : vector<4x64xf32> to vector<1x64xf32>
    %402 = vector.broadcast %400 : vector<4x1xf32> to vector<4x64xf32>
    %403 = vector.broadcast %401 : vector<1x64xf32> to vector<4x64xf32>
    %404 = arith.mulf %402, %403 : vector<4x64xf32>
    %405 = arith.addf %395, %404 : vector<4x64xf32>
    %406 = vector.extract_strided_slice %26 {offsets = [0, 53], sizes = [4, 1], strides = [1, 1]} : vector<4x108xf32> to vector<4x1xf32>
    %407 = vector.extract_strided_slice %399 {offsets = [1, 0], sizes = [1, 64], strides = [1, 1]} : vector<4x64xf32> to vector<1x64xf32>
    %408 = vector.broadcast %406 : vector<4x1xf32> to vector<4x64xf32>
    %409 = vector.broadcast %407 : vector<1x64xf32> to vector<4x64xf32>
    %410 = arith.mulf %408, %409 : vector<4x64xf32>
    %411 = arith.addf %405, %410 : vector<4x64xf32>
    %412 = vector.extract_strided_slice %26 {offsets = [0, 54], sizes = [4, 1], strides = [1, 1]} : vector<4x108xf32> to vector<4x1xf32>
    %413 = vector.extract_strided_slice %399 {offsets = [2, 0], sizes = [1, 64], strides = [1, 1]} : vector<4x64xf32> to vector<1x64xf32>
    %414 = vector.broadcast %412 : vector<4x1xf32> to vector<4x64xf32>
    %415 = vector.broadcast %413 : vector<1x64xf32> to vector<4x64xf32>
    %416 = arith.mulf %414, %415 : vector<4x64xf32>
    %417 = arith.addf %411, %416 : vector<4x64xf32>
    %418 = vector.extract_strided_slice %26 {offsets = [0, 55], sizes = [4, 1], strides = [1, 1]} : vector<4x108xf32> to vector<4x1xf32>
    %419 = vector.extract_strided_slice %399 {offsets = [3, 0], sizes = [1, 64], strides = [1, 1]} : vector<4x64xf32> to vector<1x64xf32>
    %420 = vector.broadcast %418 : vector<4x1xf32> to vector<4x64xf32>
    %421 = vector.broadcast %419 : vector<1x64xf32> to vector<4x64xf32>
    %422 = arith.mulf %420, %421 : vector<4x64xf32>
    %423 = arith.addf %417, %422 : vector<4x64xf32>
    %c0_29 = arith.constant 0 : index
    %c22 = arith.constant 22 : index
    %424 = vector.load %arg8[%c0_29, %c22] : memref<4x106xf32, #tpu.memory_space<vmem>>, vector<4x64xf32>
    %425 = vector.extract_strided_slice %25 {offsets = [14, 0], sizes = [1, 64], strides = [1, 1]} : vector<27x64xf32> to vector<1x64xf32>
    %426 = vector.broadcast %425 : vector<1x64xf32> to vector<4x64xf32>
    %427 = arith.mulf %424, %426 : vector<4x64xf32>
    %428 = vector.extract_strided_slice %26 {offsets = [0, 56], sizes = [4, 1], strides = [1, 1]} : vector<4x108xf32> to vector<4x1xf32>
    %429 = vector.extract_strided_slice %427 {offsets = [0, 0], sizes = [1, 64], strides = [1, 1]} : vector<4x64xf32> to vector<1x64xf32>
    %430 = vector.broadcast %428 : vector<4x1xf32> to vector<4x64xf32>
    %431 = vector.broadcast %429 : vector<1x64xf32> to vector<4x64xf32>
    %432 = arith.mulf %430, %431 : vector<4x64xf32>
    %433 = arith.addf %423, %432 : vector<4x64xf32>
    %434 = vector.extract_strided_slice %26 {offsets = [0, 57], sizes = [4, 1], strides = [1, 1]} : vector<4x108xf32> to vector<4x1xf32>
    %435 = vector.extract_strided_slice %427 {offsets = [1, 0], sizes = [1, 64], strides = [1, 1]} : vector<4x64xf32> to vector<1x64xf32>
    %436 = vector.broadcast %434 : vector<4x1xf32> to vector<4x64xf32>
    %437 = vector.broadcast %435 : vector<1x64xf32> to vector<4x64xf32>
    %438 = arith.mulf %436, %437 : vector<4x64xf32>
    %439 = arith.addf %433, %438 : vector<4x64xf32>
    %440 = vector.extract_strided_slice %26 {offsets = [0, 58], sizes = [4, 1], strides = [1, 1]} : vector<4x108xf32> to vector<4x1xf32>
    %441 = vector.extract_strided_slice %427 {offsets = [2, 0], sizes = [1, 64], strides = [1, 1]} : vector<4x64xf32> to vector<1x64xf32>
    %442 = vector.broadcast %440 : vector<4x1xf32> to vector<4x64xf32>
    %443 = vector.broadcast %441 : vector<1x64xf32> to vector<4x64xf32>
    %444 = arith.mulf %442, %443 : vector<4x64xf32>
    %445 = arith.addf %439, %444 : vector<4x64xf32>
    %446 = vector.extract_strided_slice %26 {offsets = [0, 59], sizes = [4, 1], strides = [1, 1]} : vector<4x108xf32> to vector<4x1xf32>
    %447 = vector.extract_strided_slice %427 {offsets = [3, 0], sizes = [1, 64], strides = [1, 1]} : vector<4x64xf32> to vector<1x64xf32>
    %448 = vector.broadcast %446 : vector<4x1xf32> to vector<4x64xf32>
    %449 = vector.broadcast %447 : vector<1x64xf32> to vector<4x64xf32>
    %450 = arith.mulf %448, %449 : vector<4x64xf32>
    %451 = arith.addf %445, %450 : vector<4x64xf32>
    %c0_30 = arith.constant 0 : index
    %c24 = arith.constant 24 : index
    %452 = vector.load %arg8[%c0_30, %c24] : memref<4x106xf32, #tpu.memory_space<vmem>>, vector<4x64xf32>
    %453 = vector.extract_strided_slice %25 {offsets = [15, 0], sizes = [1, 64], strides = [1, 1]} : vector<27x64xf32> to vector<1x64xf32>
    %454 = vector.broadcast %453 : vector<1x64xf32> to vector<4x64xf32>
    %455 = arith.mulf %452, %454 : vector<4x64xf32>
    %456 = vector.extract_strided_slice %26 {offsets = [0, 60], sizes = [4, 1], strides = [1, 1]} : vector<4x108xf32> to vector<4x1xf32>
    %457 = vector.extract_strided_slice %455 {offsets = [0, 0], sizes = [1, 64], strides = [1, 1]} : vector<4x64xf32> to vector<1x64xf32>
    %458 = vector.broadcast %456 : vector<4x1xf32> to vector<4x64xf32>
    %459 = vector.broadcast %457 : vector<1x64xf32> to vector<4x64xf32>
    %460 = arith.mulf %458, %459 : vector<4x64xf32>
    %461 = arith.addf %451, %460 : vector<4x64xf32>
    %462 = vector.extract_strided_slice %26 {offsets = [0, 61], sizes = [4, 1], strides = [1, 1]} : vector<4x108xf32> to vector<4x1xf32>
    %463 = vector.extract_strided_slice %455 {offsets = [1, 0], sizes = [1, 64], strides = [1, 1]} : vector<4x64xf32> to vector<1x64xf32>
    %464 = vector.broadcast %462 : vector<4x1xf32> to vector<4x64xf32>
    %465 = vector.broadcast %463 : vector<1x64xf32> to vector<4x64xf32>
    %466 = arith.mulf %464, %465 : vector<4x64xf32>
    %467 = arith.addf %461, %466 : vector<4x64xf32>
    %468 = vector.extract_strided_slice %26 {offsets = [0, 62], sizes = [4, 1], strides = [1, 1]} : vector<4x108xf32> to vector<4x1xf32>
    %469 = vector.extract_strided_slice %455 {offsets = [2, 0], sizes = [1, 64], strides = [1, 1]} : vector<4x64xf32> to vector<1x64xf32>
    %470 = vector.broadcast %468 : vector<4x1xf32> to vector<4x64xf32>
    %471 = vector.broadcast %469 : vector<1x64xf32> to vector<4x64xf32>
    %472 = arith.mulf %470, %471 : vector<4x64xf32>
    %473 = arith.addf %467, %472 : vector<4x64xf32>
    %474 = vector.extract_strided_slice %26 {offsets = [0, 63], sizes = [4, 1], strides = [1, 1]} : vector<4x108xf32> to vector<4x1xf32>
    %475 = vector.extract_strided_slice %455 {offsets = [3, 0], sizes = [1, 64], strides = [1, 1]} : vector<4x64xf32> to vector<1x64xf32>
    %476 = vector.broadcast %474 : vector<4x1xf32> to vector<4x64xf32>
    %477 = vector.broadcast %475 : vector<1x64xf32> to vector<4x64xf32>
    %478 = arith.mulf %476, %477 : vector<4x64xf32>
    %479 = arith.addf %473, %478 : vector<4x64xf32>
    %c0_31 = arith.constant 0 : index
    %c25 = arith.constant 25 : index
    %480 = vector.load %arg8[%c0_31, %c25] : memref<4x106xf32, #tpu.memory_space<vmem>>, vector<4x64xf32>
    %481 = vector.extract_strided_slice %25 {offsets = [16, 0], sizes = [1, 64], strides = [1, 1]} : vector<27x64xf32> to vector<1x64xf32>
    %482 = vector.broadcast %481 : vector<1x64xf32> to vector<4x64xf32>
    %483 = arith.mulf %480, %482 : vector<4x64xf32>
    %484 = vector.extract_strided_slice %26 {offsets = [0, 64], sizes = [4, 1], strides = [1, 1]} : vector<4x108xf32> to vector<4x1xf32>
    %485 = vector.extract_strided_slice %483 {offsets = [0, 0], sizes = [1, 64], strides = [1, 1]} : vector<4x64xf32> to vector<1x64xf32>
    %486 = vector.broadcast %484 : vector<4x1xf32> to vector<4x64xf32>
    %487 = vector.broadcast %485 : vector<1x64xf32> to vector<4x64xf32>
    %488 = arith.mulf %486, %487 : vector<4x64xf32>
    %489 = arith.addf %479, %488 : vector<4x64xf32>
    %490 = vector.extract_strided_slice %26 {offsets = [0, 65], sizes = [4, 1], strides = [1, 1]} : vector<4x108xf32> to vector<4x1xf32>
    %491 = vector.extract_strided_slice %483 {offsets = [1, 0], sizes = [1, 64], strides = [1, 1]} : vector<4x64xf32> to vector<1x64xf32>
    %492 = vector.broadcast %490 : vector<4x1xf32> to vector<4x64xf32>
    %493 = vector.broadcast %491 : vector<1x64xf32> to vector<4x64xf32>
    %494 = arith.mulf %492, %493 : vector<4x64xf32>
    %495 = arith.addf %489, %494 : vector<4x64xf32>
    %496 = vector.extract_strided_slice %26 {offsets = [0, 66], sizes = [4, 1], strides = [1, 1]} : vector<4x108xf32> to vector<4x1xf32>
    %497 = vector.extract_strided_slice %483 {offsets = [2, 0], sizes = [1, 64], strides = [1, 1]} : vector<4x64xf32> to vector<1x64xf32>
    %498 = vector.broadcast %496 : vector<4x1xf32> to vector<4x64xf32>
    %499 = vector.broadcast %497 : vector<1x64xf32> to vector<4x64xf32>
    %500 = arith.mulf %498, %499 : vector<4x64xf32>
    %501 = arith.addf %495, %500 : vector<4x64xf32>
    %502 = vector.extract_strided_slice %26 {offsets = [0, 67], sizes = [4, 1], strides = [1, 1]} : vector<4x108xf32> to vector<4x1xf32>
    %503 = vector.extract_strided_slice %483 {offsets = [3, 0], sizes = [1, 64], strides = [1, 1]} : vector<4x64xf32> to vector<1x64xf32>
    %504 = vector.broadcast %502 : vector<4x1xf32> to vector<4x64xf32>
    %505 = vector.broadcast %503 : vector<1x64xf32> to vector<4x64xf32>
    %506 = arith.mulf %504, %505 : vector<4x64xf32>
    %507 = arith.addf %501, %506 : vector<4x64xf32>
    %c0_32 = arith.constant 0 : index
    %c26 = arith.constant 26 : index
    %508 = vector.load %arg8[%c0_32, %c26] : memref<4x106xf32, #tpu.memory_space<vmem>>, vector<4x64xf32>
    %509 = vector.extract_strided_slice %25 {offsets = [17, 0], sizes = [1, 64], strides = [1, 1]} : vector<27x64xf32> to vector<1x64xf32>
    %510 = vector.broadcast %509 : vector<1x64xf32> to vector<4x64xf32>
    %511 = arith.mulf %508, %510 : vector<4x64xf32>
    %512 = vector.extract_strided_slice %26 {offsets = [0, 68], sizes = [4, 1], strides = [1, 1]} : vector<4x108xf32> to vector<4x1xf32>
    %513 = vector.extract_strided_slice %511 {offsets = [0, 0], sizes = [1, 64], strides = [1, 1]} : vector<4x64xf32> to vector<1x64xf32>
    %514 = vector.broadcast %512 : vector<4x1xf32> to vector<4x64xf32>
    %515 = vector.broadcast %513 : vector<1x64xf32> to vector<4x64xf32>
    %516 = arith.mulf %514, %515 : vector<4x64xf32>
    %517 = arith.addf %507, %516 : vector<4x64xf32>
    %518 = vector.extract_strided_slice %26 {offsets = [0, 69], sizes = [4, 1], strides = [1, 1]} : vector<4x108xf32> to vector<4x1xf32>
    %519 = vector.extract_strided_slice %511 {offsets = [1, 0], sizes = [1, 64], strides = [1, 1]} : vector<4x64xf32> to vector<1x64xf32>
    %520 = vector.broadcast %518 : vector<4x1xf32> to vector<4x64xf32>
    %521 = vector.broadcast %519 : vector<1x64xf32> to vector<4x64xf32>
    %522 = arith.mulf %520, %521 : vector<4x64xf32>
    %523 = arith.addf %517, %522 : vector<4x64xf32>
    %524 = vector.extract_strided_slice %26 {offsets = [0, 70], sizes = [4, 1], strides = [1, 1]} : vector<4x108xf32> to vector<4x1xf32>
    %525 = vector.extract_strided_slice %511 {offsets = [2, 0], sizes = [1, 64], strides = [1, 1]} : vector<4x64xf32> to vector<1x64xf32>
    %526 = vector.broadcast %524 : vector<4x1xf32> to vector<4x64xf32>
    %527 = vector.broadcast %525 : vector<1x64xf32> to vector<4x64xf32>
    %528 = arith.mulf %526, %527 : vector<4x64xf32>
    %529 = arith.addf %523, %528 : vector<4x64xf32>
    %530 = vector.extract_strided_slice %26 {offsets = [0, 71], sizes = [4, 1], strides = [1, 1]} : vector<4x108xf32> to vector<4x1xf32>
    %531 = vector.extract_strided_slice %511 {offsets = [3, 0], sizes = [1, 64], strides = [1, 1]} : vector<4x64xf32> to vector<1x64xf32>
    %532 = vector.broadcast %530 : vector<4x1xf32> to vector<4x64xf32>
    %533 = vector.broadcast %531 : vector<1x64xf32> to vector<4x64xf32>
    %534 = arith.mulf %532, %533 : vector<4x64xf32>
    %535 = arith.addf %529, %534 : vector<4x64xf32>
    %c0_33 = arith.constant 0 : index
    %c32 = arith.constant 32 : index
    %536 = vector.load %arg8[%c0_33, %c32] : memref<4x106xf32, #tpu.memory_space<vmem>>, vector<4x64xf32>
    %537 = vector.extract_strided_slice %25 {offsets = [18, 0], sizes = [1, 64], strides = [1, 1]} : vector<27x64xf32> to vector<1x64xf32>
    %538 = vector.broadcast %537 : vector<1x64xf32> to vector<4x64xf32>
    %539 = arith.mulf %536, %538 : vector<4x64xf32>
    %540 = vector.extract_strided_slice %26 {offsets = [0, 72], sizes = [4, 1], strides = [1, 1]} : vector<4x108xf32> to vector<4x1xf32>
    %541 = vector.extract_strided_slice %539 {offsets = [0, 0], sizes = [1, 64], strides = [1, 1]} : vector<4x64xf32> to vector<1x64xf32>
    %542 = vector.broadcast %540 : vector<4x1xf32> to vector<4x64xf32>
    %543 = vector.broadcast %541 : vector<1x64xf32> to vector<4x64xf32>
    %544 = arith.mulf %542, %543 : vector<4x64xf32>
    %545 = arith.addf %535, %544 : vector<4x64xf32>
    %546 = vector.extract_strided_slice %26 {offsets = [0, 73], sizes = [4, 1], strides = [1, 1]} : vector<4x108xf32> to vector<4x1xf32>
    %547 = vector.extract_strided_slice %539 {offsets = [1, 0], sizes = [1, 64], strides = [1, 1]} : vector<4x64xf32> to vector<1x64xf32>
    %548 = vector.broadcast %546 : vector<4x1xf32> to vector<4x64xf32>
    %549 = vector.broadcast %547 : vector<1x64xf32> to vector<4x64xf32>
    %550 = arith.mulf %548, %549 : vector<4x64xf32>
    %551 = arith.addf %545, %550 : vector<4x64xf32>
    %552 = vector.extract_strided_slice %26 {offsets = [0, 74], sizes = [4, 1], strides = [1, 1]} : vector<4x108xf32> to vector<4x1xf32>
    %553 = vector.extract_strided_slice %539 {offsets = [2, 0], sizes = [1, 64], strides = [1, 1]} : vector<4x64xf32> to vector<1x64xf32>
    %554 = vector.broadcast %552 : vector<4x1xf32> to vector<4x64xf32>
    %555 = vector.broadcast %553 : vector<1x64xf32> to vector<4x64xf32>
    %556 = arith.mulf %554, %555 : vector<4x64xf32>
    %557 = arith.addf %551, %556 : vector<4x64xf32>
    %558 = vector.extract_strided_slice %26 {offsets = [0, 75], sizes = [4, 1], strides = [1, 1]} : vector<4x108xf32> to vector<4x1xf32>
    %559 = vector.extract_strided_slice %539 {offsets = [3, 0], sizes = [1, 64], strides = [1, 1]} : vector<4x64xf32> to vector<1x64xf32>
    %560 = vector.broadcast %558 : vector<4x1xf32> to vector<4x64xf32>
    %561 = vector.broadcast %559 : vector<1x64xf32> to vector<4x64xf32>
    %562 = arith.mulf %560, %561 : vector<4x64xf32>
    %563 = arith.addf %557, %562 : vector<4x64xf32>
    %c0_34 = arith.constant 0 : index
    %c33 = arith.constant 33 : index
    %564 = vector.load %arg8[%c0_34, %c33] : memref<4x106xf32, #tpu.memory_space<vmem>>, vector<4x64xf32>
    %565 = vector.extract_strided_slice %25 {offsets = [19, 0], sizes = [1, 64], strides = [1, 1]} : vector<27x64xf32> to vector<1x64xf32>
    %566 = vector.broadcast %565 : vector<1x64xf32> to vector<4x64xf32>
    %567 = arith.mulf %564, %566 : vector<4x64xf32>
    %568 = vector.extract_strided_slice %26 {offsets = [0, 76], sizes = [4, 1], strides = [1, 1]} : vector<4x108xf32> to vector<4x1xf32>
    %569 = vector.extract_strided_slice %567 {offsets = [0, 0], sizes = [1, 64], strides = [1, 1]} : vector<4x64xf32> to vector<1x64xf32>
    %570 = vector.broadcast %568 : vector<4x1xf32> to vector<4x64xf32>
    %571 = vector.broadcast %569 : vector<1x64xf32> to vector<4x64xf32>
    %572 = arith.mulf %570, %571 : vector<4x64xf32>
    %573 = arith.addf %563, %572 : vector<4x64xf32>
    %574 = vector.extract_strided_slice %26 {offsets = [0, 77], sizes = [4, 1], strides = [1, 1]} : vector<4x108xf32> to vector<4x1xf32>
    %575 = vector.extract_strided_slice %567 {offsets = [1, 0], sizes = [1, 64], strides = [1, 1]} : vector<4x64xf32> to vector<1x64xf32>
    %576 = vector.broadcast %574 : vector<4x1xf32> to vector<4x64xf32>
    %577 = vector.broadcast %575 : vector<1x64xf32> to vector<4x64xf32>
    %578 = arith.mulf %576, %577 : vector<4x64xf32>
    %579 = arith.addf %573, %578 : vector<4x64xf32>
    %580 = vector.extract_strided_slice %26 {offsets = [0, 78], sizes = [4, 1], strides = [1, 1]} : vector<4x108xf32> to vector<4x1xf32>
    %581 = vector.extract_strided_slice %567 {offsets = [2, 0], sizes = [1, 64], strides = [1, 1]} : vector<4x64xf32> to vector<1x64xf32>
    %582 = vector.broadcast %580 : vector<4x1xf32> to vector<4x64xf32>
    %583 = vector.broadcast %581 : vector<1x64xf32> to vector<4x64xf32>
    %584 = arith.mulf %582, %583 : vector<4x64xf32>
    %585 = arith.addf %579, %584 : vector<4x64xf32>
    %586 = vector.extract_strided_slice %26 {offsets = [0, 79], sizes = [4, 1], strides = [1, 1]} : vector<4x108xf32> to vector<4x1xf32>
    %587 = vector.extract_strided_slice %567 {offsets = [3, 0], sizes = [1, 64], strides = [1, 1]} : vector<4x64xf32> to vector<1x64xf32>
    %588 = vector.broadcast %586 : vector<4x1xf32> to vector<4x64xf32>
    %589 = vector.broadcast %587 : vector<1x64xf32> to vector<4x64xf32>
    %590 = arith.mulf %588, %589 : vector<4x64xf32>
    %591 = arith.addf %585, %590 : vector<4x64xf32>
    %c0_35 = arith.constant 0 : index
    %c34 = arith.constant 34 : index
    %592 = vector.load %arg8[%c0_35, %c34] : memref<4x106xf32, #tpu.memory_space<vmem>>, vector<4x64xf32>
    %593 = vector.extract_strided_slice %25 {offsets = [20, 0], sizes = [1, 64], strides = [1, 1]} : vector<27x64xf32> to vector<1x64xf32>
    %594 = vector.broadcast %593 : vector<1x64xf32> to vector<4x64xf32>
    %595 = arith.mulf %592, %594 : vector<4x64xf32>
    %596 = vector.extract_strided_slice %26 {offsets = [0, 80], sizes = [4, 1], strides = [1, 1]} : vector<4x108xf32> to vector<4x1xf32>
    %597 = vector.extract_strided_slice %595 {offsets = [0, 0], sizes = [1, 64], strides = [1, 1]} : vector<4x64xf32> to vector<1x64xf32>
    %598 = vector.broadcast %596 : vector<4x1xf32> to vector<4x64xf32>
    %599 = vector.broadcast %597 : vector<1x64xf32> to vector<4x64xf32>
    %600 = arith.mulf %598, %599 : vector<4x64xf32>
    %601 = arith.addf %591, %600 : vector<4x64xf32>
    %602 = vector.extract_strided_slice %26 {offsets = [0, 81], sizes = [4, 1], strides = [1, 1]} : vector<4x108xf32> to vector<4x1xf32>
    %603 = vector.extract_strided_slice %595 {offsets = [1, 0], sizes = [1, 64], strides = [1, 1]} : vector<4x64xf32> to vector<1x64xf32>
    %604 = vector.broadcast %602 : vector<4x1xf32> to vector<4x64xf32>
    %605 = vector.broadcast %603 : vector<1x64xf32> to vector<4x64xf32>
    %606 = arith.mulf %604, %605 : vector<4x64xf32>
    %607 = arith.addf %601, %606 : vector<4x64xf32>
    %608 = vector.extract_strided_slice %26 {offsets = [0, 82], sizes = [4, 1], strides = [1, 1]} : vector<4x108xf32> to vector<4x1xf32>
    %609 = vector.extract_strided_slice %595 {offsets = [2, 0], sizes = [1, 64], strides = [1, 1]} : vector<4x64xf32> to vector<1x64xf32>
    %610 = vector.broadcast %608 : vector<4x1xf32> to vector<4x64xf32>
    %611 = vector.broadcast %609 : vector<1x64xf32> to vector<4x64xf32>
    %612 = arith.mulf %610, %611 : vector<4x64xf32>
    %613 = arith.addf %607, %612 : vector<4x64xf32>
    %614 = vector.extract_strided_slice %26 {offsets = [0, 83], sizes = [4, 1], strides = [1, 1]} : vector<4x108xf32> to vector<4x1xf32>
    %615 = vector.extract_strided_slice %595 {offsets = [3, 0], sizes = [1, 64], strides = [1, 1]} : vector<4x64xf32> to vector<1x64xf32>
    %616 = vector.broadcast %614 : vector<4x1xf32> to vector<4x64xf32>
    %617 = vector.broadcast %615 : vector<1x64xf32> to vector<4x64xf32>
    %618 = arith.mulf %616, %617 : vector<4x64xf32>
    %619 = arith.addf %613, %618 : vector<4x64xf32>
    %c0_36 = arith.constant 0 : index
    %c36 = arith.constant 36 : index
    %620 = vector.load %arg8[%c0_36, %c36] : memref<4x106xf32, #tpu.memory_space<vmem>>, vector<4x64xf32>
    %621 = vector.extract_strided_slice %25 {offsets = [21, 0], sizes = [1, 64], strides = [1, 1]} : vector<27x64xf32> to vector<1x64xf32>
    %622 = vector.broadcast %621 : vector<1x64xf32> to vector<4x64xf32>
    %623 = arith.mulf %620, %622 : vector<4x64xf32>
    %624 = vector.extract_strided_slice %26 {offsets = [0, 84], sizes = [4, 1], strides = [1, 1]} : vector<4x108xf32> to vector<4x1xf32>
    %625 = vector.extract_strided_slice %623 {offsets = [0, 0], sizes = [1, 64], strides = [1, 1]} : vector<4x64xf32> to vector<1x64xf32>
    %626 = vector.broadcast %624 : vector<4x1xf32> to vector<4x64xf32>
    %627 = vector.broadcast %625 : vector<1x64xf32> to vector<4x64xf32>
    %628 = arith.mulf %626, %627 : vector<4x64xf32>
    %629 = arith.addf %619, %628 : vector<4x64xf32>
    %630 = vector.extract_strided_slice %26 {offsets = [0, 85], sizes = [4, 1], strides = [1, 1]} : vector<4x108xf32> to vector<4x1xf32>
    %631 = vector.extract_strided_slice %623 {offsets = [1, 0], sizes = [1, 64], strides = [1, 1]} : vector<4x64xf32> to vector<1x64xf32>
    %632 = vector.broadcast %630 : vector<4x1xf32> to vector<4x64xf32>
    %633 = vector.broadcast %631 : vector<1x64xf32> to vector<4x64xf32>
    %634 = arith.mulf %632, %633 : vector<4x64xf32>
    %635 = arith.addf %629, %634 : vector<4x64xf32>
    %636 = vector.extract_strided_slice %26 {offsets = [0, 86], sizes = [4, 1], strides = [1, 1]} : vector<4x108xf32> to vector<4x1xf32>
    %637 = vector.extract_strided_slice %623 {offsets = [2, 0], sizes = [1, 64], strides = [1, 1]} : vector<4x64xf32> to vector<1x64xf32>
    %638 = vector.broadcast %636 : vector<4x1xf32> to vector<4x64xf32>
    %639 = vector.broadcast %637 : vector<1x64xf32> to vector<4x64xf32>
    %640 = arith.mulf %638, %639 : vector<4x64xf32>
    %641 = arith.addf %635, %640 : vector<4x64xf32>
    %642 = vector.extract_strided_slice %26 {offsets = [0, 87], sizes = [4, 1], strides = [1, 1]} : vector<4x108xf32> to vector<4x1xf32>
    %643 = vector.extract_strided_slice %623 {offsets = [3, 0], sizes = [1, 64], strides = [1, 1]} : vector<4x64xf32> to vector<1x64xf32>
    %644 = vector.broadcast %642 : vector<4x1xf32> to vector<4x64xf32>
    %645 = vector.broadcast %643 : vector<1x64xf32> to vector<4x64xf32>
    %646 = arith.mulf %644, %645 : vector<4x64xf32>
    %647 = arith.addf %641, %646 : vector<4x64xf32>
    %c0_37 = arith.constant 0 : index
    %c37 = arith.constant 37 : index
    %648 = vector.load %arg8[%c0_37, %c37] : memref<4x106xf32, #tpu.memory_space<vmem>>, vector<4x64xf32>
    %649 = vector.extract_strided_slice %25 {offsets = [22, 0], sizes = [1, 64], strides = [1, 1]} : vector<27x64xf32> to vector<1x64xf32>
    %650 = vector.broadcast %649 : vector<1x64xf32> to vector<4x64xf32>
    %651 = arith.mulf %648, %650 : vector<4x64xf32>
    %652 = vector.extract_strided_slice %26 {offsets = [0, 88], sizes = [4, 1], strides = [1, 1]} : vector<4x108xf32> to vector<4x1xf32>
    %653 = vector.extract_strided_slice %651 {offsets = [0, 0], sizes = [1, 64], strides = [1, 1]} : vector<4x64xf32> to vector<1x64xf32>
    %654 = vector.broadcast %652 : vector<4x1xf32> to vector<4x64xf32>
    %655 = vector.broadcast %653 : vector<1x64xf32> to vector<4x64xf32>
    %656 = arith.mulf %654, %655 : vector<4x64xf32>
    %657 = arith.addf %647, %656 : vector<4x64xf32>
    %658 = vector.extract_strided_slice %26 {offsets = [0, 89], sizes = [4, 1], strides = [1, 1]} : vector<4x108xf32> to vector<4x1xf32>
    %659 = vector.extract_strided_slice %651 {offsets = [1, 0], sizes = [1, 64], strides = [1, 1]} : vector<4x64xf32> to vector<1x64xf32>
    %660 = vector.broadcast %658 : vector<4x1xf32> to vector<4x64xf32>
    %661 = vector.broadcast %659 : vector<1x64xf32> to vector<4x64xf32>
    %662 = arith.mulf %660, %661 : vector<4x64xf32>
    %663 = arith.addf %657, %662 : vector<4x64xf32>
    %664 = vector.extract_strided_slice %26 {offsets = [0, 90], sizes = [4, 1], strides = [1, 1]} : vector<4x108xf32> to vector<4x1xf32>
    %665 = vector.extract_strided_slice %651 {offsets = [2, 0], sizes = [1, 64], strides = [1, 1]} : vector<4x64xf32> to vector<1x64xf32>
    %666 = vector.broadcast %664 : vector<4x1xf32> to vector<4x64xf32>
    %667 = vector.broadcast %665 : vector<1x64xf32> to vector<4x64xf32>
    %668 = arith.mulf %666, %667 : vector<4x64xf32>
    %669 = arith.addf %663, %668 : vector<4x64xf32>
    %670 = vector.extract_strided_slice %26 {offsets = [0, 91], sizes = [4, 1], strides = [1, 1]} : vector<4x108xf32> to vector<4x1xf32>
    %671 = vector.extract_strided_slice %651 {offsets = [3, 0], sizes = [1, 64], strides = [1, 1]} : vector<4x64xf32> to vector<1x64xf32>
    %672 = vector.broadcast %670 : vector<4x1xf32> to vector<4x64xf32>
    %673 = vector.broadcast %671 : vector<1x64xf32> to vector<4x64xf32>
    %674 = arith.mulf %672, %673 : vector<4x64xf32>
    %675 = arith.addf %669, %674 : vector<4x64xf32>
    %c0_38 = arith.constant 0 : index
    %c38 = arith.constant 38 : index
    %676 = vector.load %arg8[%c0_38, %c38] : memref<4x106xf32, #tpu.memory_space<vmem>>, vector<4x64xf32>
    %677 = vector.extract_strided_slice %25 {offsets = [23, 0], sizes = [1, 64], strides = [1, 1]} : vector<27x64xf32> to vector<1x64xf32>
    %678 = vector.broadcast %677 : vector<1x64xf32> to vector<4x64xf32>
    %679 = arith.mulf %676, %678 : vector<4x64xf32>
    %680 = vector.extract_strided_slice %26 {offsets = [0, 92], sizes = [4, 1], strides = [1, 1]} : vector<4x108xf32> to vector<4x1xf32>
    %681 = vector.extract_strided_slice %679 {offsets = [0, 0], sizes = [1, 64], strides = [1, 1]} : vector<4x64xf32> to vector<1x64xf32>
    %682 = vector.broadcast %680 : vector<4x1xf32> to vector<4x64xf32>
    %683 = vector.broadcast %681 : vector<1x64xf32> to vector<4x64xf32>
    %684 = arith.mulf %682, %683 : vector<4x64xf32>
    %685 = arith.addf %675, %684 : vector<4x64xf32>
    %686 = vector.extract_strided_slice %26 {offsets = [0, 93], sizes = [4, 1], strides = [1, 1]} : vector<4x108xf32> to vector<4x1xf32>
    %687 = vector.extract_strided_slice %679 {offsets = [1, 0], sizes = [1, 64], strides = [1, 1]} : vector<4x64xf32> to vector<1x64xf32>
    %688 = vector.broadcast %686 : vector<4x1xf32> to vector<4x64xf32>
    %689 = vector.broadcast %687 : vector<1x64xf32> to vector<4x64xf32>
    %690 = arith.mulf %688, %689 : vector<4x64xf32>
    %691 = arith.addf %685, %690 : vector<4x64xf32>
    %692 = vector.extract_strided_slice %26 {offsets = [0, 94], sizes = [4, 1], strides = [1, 1]} : vector<4x108xf32> to vector<4x1xf32>
    %693 = vector.extract_strided_slice %679 {offsets = [2, 0], sizes = [1, 64], strides = [1, 1]} : vector<4x64xf32> to vector<1x64xf32>
    %694 = vector.broadcast %692 : vector<4x1xf32> to vector<4x64xf32>
    %695 = vector.broadcast %693 : vector<1x64xf32> to vector<4x64xf32>
    %696 = arith.mulf %694, %695 : vector<4x64xf32>
    %697 = arith.addf %691, %696 : vector<4x64xf32>
    %698 = vector.extract_strided_slice %26 {offsets = [0, 95], sizes = [4, 1], strides = [1, 1]} : vector<4x108xf32> to vector<4x1xf32>
    %699 = vector.extract_strided_slice %679 {offsets = [3, 0], sizes = [1, 64], strides = [1, 1]} : vector<4x64xf32> to vector<1x64xf32>
    %700 = vector.broadcast %698 : vector<4x1xf32> to vector<4x64xf32>
    %701 = vector.broadcast %699 : vector<1x64xf32> to vector<4x64xf32>
    %702 = arith.mulf %700, %701 : vector<4x64xf32>
    %703 = arith.addf %697, %702 : vector<4x64xf32>
    %c0_39 = arith.constant 0 : index
    %c40 = arith.constant 40 : index
    %704 = vector.load %arg8[%c0_39, %c40] : memref<4x106xf32, #tpu.memory_space<vmem>>, vector<4x64xf32>
    %705 = vector.extract_strided_slice %25 {offsets = [24, 0], sizes = [1, 64], strides = [1, 1]} : vector<27x64xf32> to vector<1x64xf32>
    %706 = vector.broadcast %705 : vector<1x64xf32> to vector<4x64xf32>
    %707 = arith.mulf %704, %706 : vector<4x64xf32>
    %708 = vector.extract_strided_slice %26 {offsets = [0, 96], sizes = [4, 1], strides = [1, 1]} : vector<4x108xf32> to vector<4x1xf32>
    %709 = vector.extract_strided_slice %707 {offsets = [0, 0], sizes = [1, 64], strides = [1, 1]} : vector<4x64xf32> to vector<1x64xf32>
    %710 = vector.broadcast %708 : vector<4x1xf32> to vector<4x64xf32>
    %711 = vector.broadcast %709 : vector<1x64xf32> to vector<4x64xf32>
    %712 = arith.mulf %710, %711 : vector<4x64xf32>
    %713 = arith.addf %703, %712 : vector<4x64xf32>
    %714 = vector.extract_strided_slice %26 {offsets = [0, 97], sizes = [4, 1], strides = [1, 1]} : vector<4x108xf32> to vector<4x1xf32>
    %715 = vector.extract_strided_slice %707 {offsets = [1, 0], sizes = [1, 64], strides = [1, 1]} : vector<4x64xf32> to vector<1x64xf32>
    %716 = vector.broadcast %714 : vector<4x1xf32> to vector<4x64xf32>
    %717 = vector.broadcast %715 : vector<1x64xf32> to vector<4x64xf32>
    %718 = arith.mulf %716, %717 : vector<4x64xf32>
    %719 = arith.addf %713, %718 : vector<4x64xf32>
    %720 = vector.extract_strided_slice %26 {offsets = [0, 98], sizes = [4, 1], strides = [1, 1]} : vector<4x108xf32> to vector<4x1xf32>
    %721 = vector.extract_strided_slice %707 {offsets = [2, 0], sizes = [1, 64], strides = [1, 1]} : vector<4x64xf32> to vector<1x64xf32>
    %722 = vector.broadcast %720 : vector<4x1xf32> to vector<4x64xf32>
    %723 = vector.broadcast %721 : vector<1x64xf32> to vector<4x64xf32>
    %724 = arith.mulf %722, %723 : vector<4x64xf32>
    %725 = arith.addf %719, %724 : vector<4x64xf32>
    %726 = vector.extract_strided_slice %26 {offsets = [0, 99], sizes = [4, 1], strides = [1, 1]} : vector<4x108xf32> to vector<4x1xf32>
    %727 = vector.extract_strided_slice %707 {offsets = [3, 0], sizes = [1, 64], strides = [1, 1]} : vector<4x64xf32> to vector<1x64xf32>
    %728 = vector.broadcast %726 : vector<4x1xf32> to vector<4x64xf32>
    %729 = vector.broadcast %727 : vector<1x64xf32> to vector<4x64xf32>
    %730 = arith.mulf %728, %729 : vector<4x64xf32>
    %731 = arith.addf %725, %730 : vector<4x64xf32>
    %c0_40 = arith.constant 0 : index
    %c41 = arith.constant 41 : index
    %732 = vector.load %arg8[%c0_40, %c41] : memref<4x106xf32, #tpu.memory_space<vmem>>, vector<4x64xf32>
    %733 = vector.extract_strided_slice %25 {offsets = [25, 0], sizes = [1, 64], strides = [1, 1]} : vector<27x64xf32> to vector<1x64xf32>
    %734 = vector.broadcast %733 : vector<1x64xf32> to vector<4x64xf32>
    %735 = arith.mulf %732, %734 : vector<4x64xf32>
    %736 = vector.extract_strided_slice %26 {offsets = [0, 100], sizes = [4, 1], strides = [1, 1]} : vector<4x108xf32> to vector<4x1xf32>
    %737 = vector.extract_strided_slice %735 {offsets = [0, 0], sizes = [1, 64], strides = [1, 1]} : vector<4x64xf32> to vector<1x64xf32>
    %738 = vector.broadcast %736 : vector<4x1xf32> to vector<4x64xf32>
    %739 = vector.broadcast %737 : vector<1x64xf32> to vector<4x64xf32>
    %740 = arith.mulf %738, %739 : vector<4x64xf32>
    %741 = arith.addf %731, %740 : vector<4x64xf32>
    %742 = vector.extract_strided_slice %26 {offsets = [0, 101], sizes = [4, 1], strides = [1, 1]} : vector<4x108xf32> to vector<4x1xf32>
    %743 = vector.extract_strided_slice %735 {offsets = [1, 0], sizes = [1, 64], strides = [1, 1]} : vector<4x64xf32> to vector<1x64xf32>
    %744 = vector.broadcast %742 : vector<4x1xf32> to vector<4x64xf32>
    %745 = vector.broadcast %743 : vector<1x64xf32> to vector<4x64xf32>
    %746 = arith.mulf %744, %745 : vector<4x64xf32>
    %747 = arith.addf %741, %746 : vector<4x64xf32>
    %748 = vector.extract_strided_slice %26 {offsets = [0, 102], sizes = [4, 1], strides = [1, 1]} : vector<4x108xf32> to vector<4x1xf32>
    %749 = vector.extract_strided_slice %735 {offsets = [2, 0], sizes = [1, 64], strides = [1, 1]} : vector<4x64xf32> to vector<1x64xf32>
    %750 = vector.broadcast %748 : vector<4x1xf32> to vector<4x64xf32>
    %751 = vector.broadcast %749 : vector<1x64xf32> to vector<4x64xf32>
    %752 = arith.mulf %750, %751 : vector<4x64xf32>
    %753 = arith.addf %747, %752 : vector<4x64xf32>
    %754 = vector.extract_strided_slice %26 {offsets = [0, 103], sizes = [4, 1], strides = [1, 1]} : vector<4x108xf32> to vector<4x1xf32>
    %755 = vector.extract_strided_slice %735 {offsets = [3, 0], sizes = [1, 64], strides = [1, 1]} : vector<4x64xf32> to vector<1x64xf32>
    %756 = vector.broadcast %754 : vector<4x1xf32> to vector<4x64xf32>
    %757 = vector.broadcast %755 : vector<1x64xf32> to vector<4x64xf32>
    %758 = arith.mulf %756, %757 : vector<4x64xf32>
    %759 = arith.addf %753, %758 : vector<4x64xf32>
    %c0_41 = arith.constant 0 : index
    %c42 = arith.constant 42 : index
    %760 = vector.load %arg8[%c0_41, %c42] : memref<4x106xf32, #tpu.memory_space<vmem>>, vector<4x64xf32>
    %761 = vector.extract_strided_slice %25 {offsets = [26, 0], sizes = [1, 64], strides = [1, 1]} : vector<27x64xf32> to vector<1x64xf32>
    %762 = vector.broadcast %761 : vector<1x64xf32> to vector<4x64xf32>
    %763 = arith.mulf %760, %762 : vector<4x64xf32>
    %764 = vector.extract_strided_slice %26 {offsets = [0, 104], sizes = [4, 1], strides = [1, 1]} : vector<4x108xf32> to vector<4x1xf32>
    %765 = vector.extract_strided_slice %763 {offsets = [0, 0], sizes = [1, 64], strides = [1, 1]} : vector<4x64xf32> to vector<1x64xf32>
    %766 = vector.broadcast %764 : vector<4x1xf32> to vector<4x64xf32>
    %767 = vector.broadcast %765 : vector<1x64xf32> to vector<4x64xf32>
    %768 = arith.mulf %766, %767 : vector<4x64xf32>
    %769 = arith.addf %759, %768 : vector<4x64xf32>
    %770 = vector.extract_strided_slice %26 {offsets = [0, 105], sizes = [4, 1], strides = [1, 1]} : vector<4x108xf32> to vector<4x1xf32>
    %771 = vector.extract_strided_slice %763 {offsets = [1, 0], sizes = [1, 64], strides = [1, 1]} : vector<4x64xf32> to vector<1x64xf32>
    %772 = vector.broadcast %770 : vector<4x1xf32> to vector<4x64xf32>
    %773 = vector.broadcast %771 : vector<1x64xf32> to vector<4x64xf32>
    %774 = arith.mulf %772, %773 : vector<4x64xf32>
    %775 = arith.addf %769, %774 : vector<4x64xf32>
    %776 = vector.extract_strided_slice %26 {offsets = [0, 106], sizes = [4, 1], strides = [1, 1]} : vector<4x108xf32> to vector<4x1xf32>
    %777 = vector.extract_strided_slice %763 {offsets = [2, 0], sizes = [1, 64], strides = [1, 1]} : vector<4x64xf32> to vector<1x64xf32>
    %778 = vector.broadcast %776 : vector<4x1xf32> to vector<4x64xf32>
    %779 = vector.broadcast %777 : vector<1x64xf32> to vector<4x64xf32>
    %780 = arith.mulf %778, %779 : vector<4x64xf32>
    %781 = arith.addf %775, %780 : vector<4x64xf32>
    %782 = vector.extract_strided_slice %26 {offsets = [0, 107], sizes = [4, 1], strides = [1, 1]} : vector<4x108xf32> to vector<4x1xf32>
    %783 = vector.extract_strided_slice %763 {offsets = [3, 0], sizes = [1, 64], strides = [1, 1]} : vector<4x64xf32> to vector<1x64xf32>
    %784 = vector.broadcast %782 : vector<4x1xf32> to vector<4x64xf32>
    %785 = vector.broadcast %783 : vector<1x64xf32> to vector<4x64xf32>
    %786 = arith.mulf %784, %785 : vector<4x64xf32>
    %787 = arith.addf %781, %786 : vector<4x64xf32>
    %788 = vector.broadcast %27 : vector<4x1xf32> to vector<4x64xf32>
    %789 = arith.addf %787, %788 : vector<4x64xf32>
    %cst_42 = arith.constant 0.000000e+00 : f32
    %790 = vector.broadcast %cst_42 : f32 to vector<4x64xf32>
    %791 = arith.maximumf %789, %790 : vector<4x64xf32>
    %c0_43 = arith.constant 0 : index
    %c0_44 = arith.constant 0 : index
    %792 = vector.load %arg5[%c0_43, %c0_44] : memref<8x108xf32, #tpu.memory_space<vmem>>, vector<8x108xf32>
    %c0_45 = arith.constant 0 : index
    %c0_46 = arith.constant 0 : index
    %793 = vector.load %arg6[%c0_45, %c0_46] : memref<8x1xf32, #tpu.memory_space<vmem>>, vector<8x1xf32>
    %cst_47 = arith.constant 0.000000e+00 : f32
    %794 = vector.broadcast %cst_47 : f32 to vector<4x106xf32>
    %c0_48 = arith.constant 0 : index
    %c0_49 = arith.constant 0 : index
    %795 = vector.load %arg9[%c0_48, %c0_49] : memref<4x106xf32, #tpu.memory_space<vmem>>, vector<4x106xf32>
    tpu.vector_store %arg9[%c0_48, %c0_49], %794 {strides = array<i32>} : memref<4x106xf32, #tpu.memory_space<vmem>>, vector<4x106xf32>,
    %c0_50 = arith.constant 0 : index
    %c21_51 = arith.constant 21 : index
    %796 = vector.load %arg9[%c0_50, %c21_51] : memref<4x106xf32, #tpu.memory_space<vmem>>, vector<4x64xf32>
    tpu.vector_store %arg9[%c0_50, %c21_51], %791 {strides = array<i32>} : memref<4x106xf32, #tpu.memory_space<vmem>>, vector<4x64xf32>,
    %cst_52 = arith.constant 0.000000e+00 : f32
    %797 = vector.broadcast %cst_52 : f32 to vector<8x64xf32>
    %c0_53 = arith.constant 0 : index
    %c0_54 = arith.constant 0 : index
    %798 = vector.load %arg9[%c0_53, %c0_54] : memref<4x106xf32, #tpu.memory_space<vmem>>, vector<4x64xf32>
    %799 = vector.extract_strided_slice %25 {offsets = [0, 0], sizes = [1, 64], strides = [1, 1]} : vector<27x64xf32> to vector<1x64xf32>
    %800 = vector.broadcast %799 : vector<1x64xf32> to vector<4x64xf32>
    %801 = arith.mulf %798, %800 : vector<4x64xf32>
    %802 = vector.extract_strided_slice %792 {offsets = [0, 0], sizes = [8, 1], strides = [1, 1]} : vector<8x108xf32> to vector<8x1xf32>
    %803 = vector.extract_strided_slice %801 {offsets = [0, 0], sizes = [1, 64], strides = [1, 1]} : vector<4x64xf32> to vector<1x64xf32>
    %804 = vector.broadcast %802 : vector<8x1xf32> to vector<8x64xf32>
    %805 = vector.broadcast %803 : vector<1x64xf32> to vector<8x64xf32>
    %806 = arith.mulf %804, %805 : vector<8x64xf32>
    %807 = arith.addf %797, %806 : vector<8x64xf32>
    %808 = vector.extract_strided_slice %792 {offsets = [0, 1], sizes = [8, 1], strides = [1, 1]} : vector<8x108xf32> to vector<8x1xf32>
    %809 = vector.extract_strided_slice %801 {offsets = [1, 0], sizes = [1, 64], strides = [1, 1]} : vector<4x64xf32> to vector<1x64xf32>
    %810 = vector.broadcast %808 : vector<8x1xf32> to vector<8x64xf32>
    %811 = vector.broadcast %809 : vector<1x64xf32> to vector<8x64xf32>
    %812 = arith.mulf %810, %811 : vector<8x64xf32>
    %813 = arith.addf %807, %812 : vector<8x64xf32>
    %814 = vector.extract_strided_slice %792 {offsets = [0, 2], sizes = [8, 1], strides = [1, 1]} : vector<8x108xf32> to vector<8x1xf32>
    %815 = vector.extract_strided_slice %801 {offsets = [2, 0], sizes = [1, 64], strides = [1, 1]} : vector<4x64xf32> to vector<1x64xf32>
    %816 = vector.broadcast %814 : vector<8x1xf32> to vector<8x64xf32>
    %817 = vector.broadcast %815 : vector<1x64xf32> to vector<8x64xf32>
    %818 = arith.mulf %816, %817 : vector<8x64xf32>
    %819 = arith.addf %813, %818 : vector<8x64xf32>
    %820 = vector.extract_strided_slice %792 {offsets = [0, 3], sizes = [8, 1], strides = [1, 1]} : vector<8x108xf32> to vector<8x1xf32>
    %821 = vector.extract_strided_slice %801 {offsets = [3, 0], sizes = [1, 64], strides = [1, 1]} : vector<4x64xf32> to vector<1x64xf32>
    %822 = vector.broadcast %820 : vector<8x1xf32> to vector<8x64xf32>
    %823 = vector.broadcast %821 : vector<1x64xf32> to vector<8x64xf32>
    %824 = arith.mulf %822, %823 : vector<8x64xf32>
    %825 = arith.addf %819, %824 : vector<8x64xf32>
    %c0_55 = arith.constant 0 : index
    %c1_56 = arith.constant 1 : index
    %826 = vector.load %arg9[%c0_55, %c1_56] : memref<4x106xf32, #tpu.memory_space<vmem>>, vector<4x64xf32>
    %827 = vector.extract_strided_slice %25 {offsets = [1, 0], sizes = [1, 64], strides = [1, 1]} : vector<27x64xf32> to vector<1x64xf32>
    %828 = vector.broadcast %827 : vector<1x64xf32> to vector<4x64xf32>
    %829 = arith.mulf %826, %828 : vector<4x64xf32>
    %830 = vector.extract_strided_slice %792 {offsets = [0, 4], sizes = [8, 1], strides = [1, 1]} : vector<8x108xf32> to vector<8x1xf32>
    %831 = vector.extract_strided_slice %829 {offsets = [0, 0], sizes = [1, 64], strides = [1, 1]} : vector<4x64xf32> to vector<1x64xf32>
    %832 = vector.broadcast %830 : vector<8x1xf32> to vector<8x64xf32>
    %833 = vector.broadcast %831 : vector<1x64xf32> to vector<8x64xf32>
    %834 = arith.mulf %832, %833 : vector<8x64xf32>
    %835 = arith.addf %825, %834 : vector<8x64xf32>
    %836 = vector.extract_strided_slice %792 {offsets = [0, 5], sizes = [8, 1], strides = [1, 1]} : vector<8x108xf32> to vector<8x1xf32>
    %837 = vector.extract_strided_slice %829 {offsets = [1, 0], sizes = [1, 64], strides = [1, 1]} : vector<4x64xf32> to vector<1x64xf32>
    %838 = vector.broadcast %836 : vector<8x1xf32> to vector<8x64xf32>
    %839 = vector.broadcast %837 : vector<1x64xf32> to vector<8x64xf32>
    %840 = arith.mulf %838, %839 : vector<8x64xf32>
    %841 = arith.addf %835, %840 : vector<8x64xf32>
    %842 = vector.extract_strided_slice %792 {offsets = [0, 6], sizes = [8, 1], strides = [1, 1]} : vector<8x108xf32> to vector<8x1xf32>
    %843 = vector.extract_strided_slice %829 {offsets = [2, 0], sizes = [1, 64], strides = [1, 1]} : vector<4x64xf32> to vector<1x64xf32>
    %844 = vector.broadcast %842 : vector<8x1xf32> to vector<8x64xf32>
    %845 = vector.broadcast %843 : vector<1x64xf32> to vector<8x64xf32>
    %846 = arith.mulf %844, %845 : vector<8x64xf32>
    %847 = arith.addf %841, %846 : vector<8x64xf32>
    %848 = vector.extract_strided_slice %792 {offsets = [0, 7], sizes = [8, 1], strides = [1, 1]} : vector<8x108xf32> to vector<8x1xf32>
    %849 = vector.extract_strided_slice %829 {offsets = [3, 0], sizes = [1, 64], strides = [1, 1]} : vector<4x64xf32> to vector<1x64xf32>
    %850 = vector.broadcast %848 : vector<8x1xf32> to vector<8x64xf32>
    %851 = vector.broadcast %849 : vector<1x64xf32> to vector<8x64xf32>
    %852 = arith.mulf %850, %851 : vector<8x64xf32>
    %853 = arith.addf %847, %852 : vector<8x64xf32>
    %c0_57 = arith.constant 0 : index
    %c2_58 = arith.constant 2 : index
    %854 = vector.load %arg9[%c0_57, %c2_58] : memref<4x106xf32, #tpu.memory_space<vmem>>, vector<4x64xf32>
    %855 = vector.extract_strided_slice %25 {offsets = [2, 0], sizes = [1, 64], strides = [1, 1]} : vector<27x64xf32> to vector<1x64xf32>
    %856 = vector.broadcast %855 : vector<1x64xf32> to vector<4x64xf32>
    %857 = arith.mulf %854, %856 : vector<4x64xf32>
    %858 = vector.extract_strided_slice %792 {offsets = [0, 8], sizes = [8, 1], strides = [1, 1]} : vector<8x108xf32> to vector<8x1xf32>
    %859 = vector.extract_strided_slice %857 {offsets = [0, 0], sizes = [1, 64], strides = [1, 1]} : vector<4x64xf32> to vector<1x64xf32>
    %860 = vector.broadcast %858 : vector<8x1xf32> to vector<8x64xf32>
    %861 = vector.broadcast %859 : vector<1x64xf32> to vector<8x64xf32>
    %862 = arith.mulf %860, %861 : vector<8x64xf32>
    %863 = arith.addf %853, %862 : vector<8x64xf32>
    %864 = vector.extract_strided_slice %792 {offsets = [0, 9], sizes = [8, 1], strides = [1, 1]} : vector<8x108xf32> to vector<8x1xf32>
    %865 = vector.extract_strided_slice %857 {offsets = [1, 0], sizes = [1, 64], strides = [1, 1]} : vector<4x64xf32> to vector<1x64xf32>
    %866 = vector.broadcast %864 : vector<8x1xf32> to vector<8x64xf32>
    %867 = vector.broadcast %865 : vector<1x64xf32> to vector<8x64xf32>
    %868 = arith.mulf %866, %867 : vector<8x64xf32>
    %869 = arith.addf %863, %868 : vector<8x64xf32>
    %870 = vector.extract_strided_slice %792 {offsets = [0, 10], sizes = [8, 1], strides = [1, 1]} : vector<8x108xf32> to vector<8x1xf32>
    %871 = vector.extract_strided_slice %857 {offsets = [2, 0], sizes = [1, 64], strides = [1, 1]} : vector<4x64xf32> to vector<1x64xf32>
    %872 = vector.broadcast %870 : vector<8x1xf32> to vector<8x64xf32>
    %873 = vector.broadcast %871 : vector<1x64xf32> to vector<8x64xf32>
    %874 = arith.mulf %872, %873 : vector<8x64xf32>
    %875 = arith.addf %869, %874 : vector<8x64xf32>
    %876 = vector.extract_strided_slice %792 {offsets = [0, 11], sizes = [8, 1], strides = [1, 1]} : vector<8x108xf32> to vector<8x1xf32>
    %877 = vector.extract_strided_slice %857 {offsets = [3, 0], sizes = [1, 64], strides = [1, 1]} : vector<4x64xf32> to vector<1x64xf32>
    %878 = vector.broadcast %876 : vector<8x1xf32> to vector<8x64xf32>
    %879 = vector.broadcast %877 : vector<1x64xf32> to vector<8x64xf32>
    %880 = arith.mulf %878, %879 : vector<8x64xf32>
    %881 = arith.addf %875, %880 : vector<8x64xf32>
    %c0_59 = arith.constant 0 : index
    %c4_60 = arith.constant 4 : index
    %882 = vector.load %arg9[%c0_59, %c4_60] : memref<4x106xf32, #tpu.memory_space<vmem>>, vector<4x64xf32>
    %883 = vector.extract_strided_slice %25 {offsets = [3, 0], sizes = [1, 64], strides = [1, 1]} : vector<27x64xf32> to vector<1x64xf32>
    %884 = vector.broadcast %883 : vector<1x64xf32> to vector<4x64xf32>
    %885 = arith.mulf %882, %884 : vector<4x64xf32>
    %886 = vector.extract_strided_slice %792 {offsets = [0, 12], sizes = [8, 1], strides = [1, 1]} : vector<8x108xf32> to vector<8x1xf32>
    %887 = vector.extract_strided_slice %885 {offsets = [0, 0], sizes = [1, 64], strides = [1, 1]} : vector<4x64xf32> to vector<1x64xf32>
    %888 = vector.broadcast %886 : vector<8x1xf32> to vector<8x64xf32>
    %889 = vector.broadcast %887 : vector<1x64xf32> to vector<8x64xf32>
    %890 = arith.mulf %888, %889 : vector<8x64xf32>
    %891 = arith.addf %881, %890 : vector<8x64xf32>
    %892 = vector.extract_strided_slice %792 {offsets = [0, 13], sizes = [8, 1], strides = [1, 1]} : vector<8x108xf32> to vector<8x1xf32>
    %893 = vector.extract_strided_slice %885 {offsets = [1, 0], sizes = [1, 64], strides = [1, 1]} : vector<4x64xf32> to vector<1x64xf32>
    %894 = vector.broadcast %892 : vector<8x1xf32> to vector<8x64xf32>
    %895 = vector.broadcast %893 : vector<1x64xf32> to vector<8x64xf32>
    %896 = arith.mulf %894, %895 : vector<8x64xf32>
    %897 = arith.addf %891, %896 : vector<8x64xf32>
    %898 = vector.extract_strided_slice %792 {offsets = [0, 14], sizes = [8, 1], strides = [1, 1]} : vector<8x108xf32> to vector<8x1xf32>
    %899 = vector.extract_strided_slice %885 {offsets = [2, 0], sizes = [1, 64], strides = [1, 1]} : vector<4x64xf32> to vector<1x64xf32>
    %900 = vector.broadcast %898 : vector<8x1xf32> to vector<8x64xf32>
    %901 = vector.broadcast %899 : vector<1x64xf32> to vector<8x64xf32>
    %902 = arith.mulf %900, %901 : vector<8x64xf32>
    %903 = arith.addf %897, %902 : vector<8x64xf32>
    %904 = vector.extract_strided_slice %792 {offsets = [0, 15], sizes = [8, 1], strides = [1, 1]} : vector<8x108xf32> to vector<8x1xf32>
    %905 = vector.extract_strided_slice %885 {offsets = [3, 0], sizes = [1, 64], strides = [1, 1]} : vector<4x64xf32> to vector<1x64xf32>
    %906 = vector.broadcast %904 : vector<8x1xf32> to vector<8x64xf32>
    %907 = vector.broadcast %905 : vector<1x64xf32> to vector<8x64xf32>
    %908 = arith.mulf %906, %907 : vector<8x64xf32>
    %909 = arith.addf %903, %908 : vector<8x64xf32>
    %c0_61 = arith.constant 0 : index
    %c5_62 = arith.constant 5 : index
    %910 = vector.load %arg9[%c0_61, %c5_62] : memref<4x106xf32, #tpu.memory_space<vmem>>, vector<4x64xf32>
    %911 = vector.extract_strided_slice %25 {offsets = [4, 0], sizes = [1, 64], strides = [1, 1]} : vector<27x64xf32> to vector<1x64xf32>
    %912 = vector.broadcast %911 : vector<1x64xf32> to vector<4x64xf32>
    %913 = arith.mulf %910, %912 : vector<4x64xf32>
    %914 = vector.extract_strided_slice %792 {offsets = [0, 16], sizes = [8, 1], strides = [1, 1]} : vector<8x108xf32> to vector<8x1xf32>
    %915 = vector.extract_strided_slice %913 {offsets = [0, 0], sizes = [1, 64], strides = [1, 1]} : vector<4x64xf32> to vector<1x64xf32>
    %916 = vector.broadcast %914 : vector<8x1xf32> to vector<8x64xf32>
    %917 = vector.broadcast %915 : vector<1x64xf32> to vector<8x64xf32>
    %918 = arith.mulf %916, %917 : vector<8x64xf32>
    %919 = arith.addf %909, %918 : vector<8x64xf32>
    %920 = vector.extract_strided_slice %792 {offsets = [0, 17], sizes = [8, 1], strides = [1, 1]} : vector<8x108xf32> to vector<8x1xf32>
    %921 = vector.extract_strided_slice %913 {offsets = [1, 0], sizes = [1, 64], strides = [1, 1]} : vector<4x64xf32> to vector<1x64xf32>
    %922 = vector.broadcast %920 : vector<8x1xf32> to vector<8x64xf32>
    %923 = vector.broadcast %921 : vector<1x64xf32> to vector<8x64xf32>
    %924 = arith.mulf %922, %923 : vector<8x64xf32>
    %925 = arith.addf %919, %924 : vector<8x64xf32>
    %926 = vector.extract_strided_slice %792 {offsets = [0, 18], sizes = [8, 1], strides = [1, 1]} : vector<8x108xf32> to vector<8x1xf32>
    %927 = vector.extract_strided_slice %913 {offsets = [2, 0], sizes = [1, 64], strides = [1, 1]} : vector<4x64xf32> to vector<1x64xf32>
    %928 = vector.broadcast %926 : vector<8x1xf32> to vector<8x64xf32>
    %929 = vector.broadcast %927 : vector<1x64xf32> to vector<8x64xf32>
    %930 = arith.mulf %928, %929 : vector<8x64xf32>
    %931 = arith.addf %925, %930 : vector<8x64xf32>
    %932 = vector.extract_strided_slice %792 {offsets = [0, 19], sizes = [8, 1], strides = [1, 1]} : vector<8x108xf32> to vector<8x1xf32>
    %933 = vector.extract_strided_slice %913 {offsets = [3, 0], sizes = [1, 64], strides = [1, 1]} : vector<4x64xf32> to vector<1x64xf32>
    %934 = vector.broadcast %932 : vector<8x1xf32> to vector<8x64xf32>
    %935 = vector.broadcast %933 : vector<1x64xf32> to vector<8x64xf32>
    %936 = arith.mulf %934, %935 : vector<8x64xf32>
    %937 = arith.addf %931, %936 : vector<8x64xf32>
    %c0_63 = arith.constant 0 : index
    %c6_64 = arith.constant 6 : index
    %938 = vector.load %arg9[%c0_63, %c6_64] : memref<4x106xf32, #tpu.memory_space<vmem>>, vector<4x64xf32>
    %939 = vector.extract_strided_slice %25 {offsets = [5, 0], sizes = [1, 64], strides = [1, 1]} : vector<27x64xf32> to vector<1x64xf32>
    %940 = vector.broadcast %939 : vector<1x64xf32> to vector<4x64xf32>
    %941 = arith.mulf %938, %940 : vector<4x64xf32>
    %942 = vector.extract_strided_slice %792 {offsets = [0, 20], sizes = [8, 1], strides = [1, 1]} : vector<8x108xf32> to vector<8x1xf32>
    %943 = vector.extract_strided_slice %941 {offsets = [0, 0], sizes = [1, 64], strides = [1, 1]} : vector<4x64xf32> to vector<1x64xf32>
    %944 = vector.broadcast %942 : vector<8x1xf32> to vector<8x64xf32>
    %945 = vector.broadcast %943 : vector<1x64xf32> to vector<8x64xf32>
    %946 = arith.mulf %944, %945 : vector<8x64xf32>
    %947 = arith.addf %937, %946 : vector<8x64xf32>
    %948 = vector.extract_strided_slice %792 {offsets = [0, 21], sizes = [8, 1], strides = [1, 1]} : vector<8x108xf32> to vector<8x1xf32>
    %949 = vector.extract_strided_slice %941 {offsets = [1, 0], sizes = [1, 64], strides = [1, 1]} : vector<4x64xf32> to vector<1x64xf32>
    %950 = vector.broadcast %948 : vector<8x1xf32> to vector<8x64xf32>
    %951 = vector.broadcast %949 : vector<1x64xf32> to vector<8x64xf32>
    %952 = arith.mulf %950, %951 : vector<8x64xf32>
    %953 = arith.addf %947, %952 : vector<8x64xf32>
    %954 = vector.extract_strided_slice %792 {offsets = [0, 22], sizes = [8, 1], strides = [1, 1]} : vector<8x108xf32> to vector<8x1xf32>
    %955 = vector.extract_strided_slice %941 {offsets = [2, 0], sizes = [1, 64], strides = [1, 1]} : vector<4x64xf32> to vector<1x64xf32>
    %956 = vector.broadcast %954 : vector<8x1xf32> to vector<8x64xf32>
    %957 = vector.broadcast %955 : vector<1x64xf32> to vector<8x64xf32>
    %958 = arith.mulf %956, %957 : vector<8x64xf32>
    %959 = arith.addf %953, %958 : vector<8x64xf32>
    %960 = vector.extract_strided_slice %792 {offsets = [0, 23], sizes = [8, 1], strides = [1, 1]} : vector<8x108xf32> to vector<8x1xf32>
    %961 = vector.extract_strided_slice %941 {offsets = [3, 0], sizes = [1, 64], strides = [1, 1]} : vector<4x64xf32> to vector<1x64xf32>
    %962 = vector.broadcast %960 : vector<8x1xf32> to vector<8x64xf32>
    %963 = vector.broadcast %961 : vector<1x64xf32> to vector<8x64xf32>
    %964 = arith.mulf %962, %963 : vector<8x64xf32>
    %965 = arith.addf %959, %964 : vector<8x64xf32>
    %c0_65 = arith.constant 0 : index
    %c8_66 = arith.constant 8 : index
    %966 = vector.load %arg9[%c0_65, %c8_66] : memref<4x106xf32, #tpu.memory_space<vmem>>, vector<4x64xf32>
    %967 = vector.extract_strided_slice %25 {offsets = [6, 0], sizes = [1, 64], strides = [1, 1]} : vector<27x64xf32> to vector<1x64xf32>
    %968 = vector.broadcast %967 : vector<1x64xf32> to vector<4x64xf32>
    %969 = arith.mulf %966, %968 : vector<4x64xf32>
    %970 = vector.extract_strided_slice %792 {offsets = [0, 24], sizes = [8, 1], strides = [1, 1]} : vector<8x108xf32> to vector<8x1xf32>
    %971 = vector.extract_strided_slice %969 {offsets = [0, 0], sizes = [1, 64], strides = [1, 1]} : vector<4x64xf32> to vector<1x64xf32>
    %972 = vector.broadcast %970 : vector<8x1xf32> to vector<8x64xf32>
    %973 = vector.broadcast %971 : vector<1x64xf32> to vector<8x64xf32>
    %974 = arith.mulf %972, %973 : vector<8x64xf32>
    %975 = arith.addf %965, %974 : vector<8x64xf32>
    %976 = vector.extract_strided_slice %792 {offsets = [0, 25], sizes = [8, 1], strides = [1, 1]} : vector<8x108xf32> to vector<8x1xf32>
    %977 = vector.extract_strided_slice %969 {offsets = [1, 0], sizes = [1, 64], strides = [1, 1]} : vector<4x64xf32> to vector<1x64xf32>
    %978 = vector.broadcast %976 : vector<8x1xf32> to vector<8x64xf32>
    %979 = vector.broadcast %977 : vector<1x64xf32> to vector<8x64xf32>
    %980 = arith.mulf %978, %979 : vector<8x64xf32>
    %981 = arith.addf %975, %980 : vector<8x64xf32>
    %982 = vector.extract_strided_slice %792 {offsets = [0, 26], sizes = [8, 1], strides = [1, 1]} : vector<8x108xf32> to vector<8x1xf32>
    %983 = vector.extract_strided_slice %969 {offsets = [2, 0], sizes = [1, 64], strides = [1, 1]} : vector<4x64xf32> to vector<1x64xf32>
    %984 = vector.broadcast %982 : vector<8x1xf32> to vector<8x64xf32>
    %985 = vector.broadcast %983 : vector<1x64xf32> to vector<8x64xf32>
    %986 = arith.mulf %984, %985 : vector<8x64xf32>
    %987 = arith.addf %981, %986 : vector<8x64xf32>
    %988 = vector.extract_strided_slice %792 {offsets = [0, 27], sizes = [8, 1], strides = [1, 1]} : vector<8x108xf32> to vector<8x1xf32>
    %989 = vector.extract_strided_slice %969 {offsets = [3, 0], sizes = [1, 64], strides = [1, 1]} : vector<4x64xf32> to vector<1x64xf32>
    %990 = vector.broadcast %988 : vector<8x1xf32> to vector<8x64xf32>
    %991 = vector.broadcast %989 : vector<1x64xf32> to vector<8x64xf32>
    %992 = arith.mulf %990, %991 : vector<8x64xf32>
    %993 = arith.addf %987, %992 : vector<8x64xf32>
    %c0_67 = arith.constant 0 : index
    %c9_68 = arith.constant 9 : index
    %994 = vector.load %arg9[%c0_67, %c9_68] : memref<4x106xf32, #tpu.memory_space<vmem>>, vector<4x64xf32>
    %995 = vector.extract_strided_slice %25 {offsets = [7, 0], sizes = [1, 64], strides = [1, 1]} : vector<27x64xf32> to vector<1x64xf32>
    %996 = vector.broadcast %995 : vector<1x64xf32> to vector<4x64xf32>
    %997 = arith.mulf %994, %996 : vector<4x64xf32>
    %998 = vector.extract_strided_slice %792 {offsets = [0, 28], sizes = [8, 1], strides = [1, 1]} : vector<8x108xf32> to vector<8x1xf32>
    %999 = vector.extract_strided_slice %997 {offsets = [0, 0], sizes = [1, 64], strides = [1, 1]} : vector<4x64xf32> to vector<1x64xf32>
    %1000 = vector.broadcast %998 : vector<8x1xf32> to vector<8x64xf32>
    %1001 = vector.broadcast %999 : vector<1x64xf32> to vector<8x64xf32>
    %1002 = arith.mulf %1000, %1001 : vector<8x64xf32>
    %1003 = arith.addf %993, %1002 : vector<8x64xf32>
    %1004 = vector.extract_strided_slice %792 {offsets = [0, 29], sizes = [8, 1], strides = [1, 1]} : vector<8x108xf32> to vector<8x1xf32>
    %1005 = vector.extract_strided_slice %997 {offsets = [1, 0], sizes = [1, 64], strides = [1, 1]} : vector<4x64xf32> to vector<1x64xf32>
    %1006 = vector.broadcast %1004 : vector<8x1xf32> to vector<8x64xf32>
    %1007 = vector.broadcast %1005 : vector<1x64xf32> to vector<8x64xf32>
    %1008 = arith.mulf %1006, %1007 : vector<8x64xf32>
    %1009 = arith.addf %1003, %1008 : vector<8x64xf32>
    %1010 = vector.extract_strided_slice %792 {offsets = [0, 30], sizes = [8, 1], strides = [1, 1]} : vector<8x108xf32> to vector<8x1xf32>
    %1011 = vector.extract_strided_slice %997 {offsets = [2, 0], sizes = [1, 64], strides = [1, 1]} : vector<4x64xf32> to vector<1x64xf32>
    %1012 = vector.broadcast %1010 : vector<8x1xf32> to vector<8x64xf32>
    %1013 = vector.broadcast %1011 : vector<1x64xf32> to vector<8x64xf32>
    %1014 = arith.mulf %1012, %1013 : vector<8x64xf32>
    %1015 = arith.addf %1009, %1014 : vector<8x64xf32>
    %1016 = vector.extract_strided_slice %792 {offsets = [0, 31], sizes = [8, 1], strides = [1, 1]} : vector<8x108xf32> to vector<8x1xf32>
    %1017 = vector.extract_strided_slice %997 {offsets = [3, 0], sizes = [1, 64], strides = [1, 1]} : vector<4x64xf32> to vector<1x64xf32>
    %1018 = vector.broadcast %1016 : vector<8x1xf32> to vector<8x64xf32>
    %1019 = vector.broadcast %1017 : vector<1x64xf32> to vector<8x64xf32>
    %1020 = arith.mulf %1018, %1019 : vector<8x64xf32>
    %1021 = arith.addf %1015, %1020 : vector<8x64xf32>
    %c0_69 = arith.constant 0 : index
    %c10_70 = arith.constant 10 : index
    %1022 = vector.load %arg9[%c0_69, %c10_70] : memref<4x106xf32, #tpu.memory_space<vmem>>, vector<4x64xf32>
    %1023 = vector.extract_strided_slice %25 {offsets = [8, 0], sizes = [1, 64], strides = [1, 1]} : vector<27x64xf32> to vector<1x64xf32>
    %1024 = vector.broadcast %1023 : vector<1x64xf32> to vector<4x64xf32>
    %1025 = arith.mulf %1022, %1024 : vector<4x64xf32>
    %1026 = vector.extract_strided_slice %792 {offsets = [0, 32], sizes = [8, 1], strides = [1, 1]} : vector<8x108xf32> to vector<8x1xf32>
    %1027 = vector.extract_strided_slice %1025 {offsets = [0, 0], sizes = [1, 64], strides = [1, 1]} : vector<4x64xf32> to vector<1x64xf32>
    %1028 = vector.broadcast %1026 : vector<8x1xf32> to vector<8x64xf32>
    %1029 = vector.broadcast %1027 : vector<1x64xf32> to vector<8x64xf32>
    %1030 = arith.mulf %1028, %1029 : vector<8x64xf32>
    %1031 = arith.addf %1021, %1030 : vector<8x64xf32>
    %1032 = vector.extract_strided_slice %792 {offsets = [0, 33], sizes = [8, 1], strides = [1, 1]} : vector<8x108xf32> to vector<8x1xf32>
    %1033 = vector.extract_strided_slice %1025 {offsets = [1, 0], sizes = [1, 64], strides = [1, 1]} : vector<4x64xf32> to vector<1x64xf32>
    %1034 = vector.broadcast %1032 : vector<8x1xf32> to vector<8x64xf32>
    %1035 = vector.broadcast %1033 : vector<1x64xf32> to vector<8x64xf32>
    %1036 = arith.mulf %1034, %1035 : vector<8x64xf32>
    %1037 = arith.addf %1031, %1036 : vector<8x64xf32>
    %1038 = vector.extract_strided_slice %792 {offsets = [0, 34], sizes = [8, 1], strides = [1, 1]} : vector<8x108xf32> to vector<8x1xf32>
    %1039 = vector.extract_strided_slice %1025 {offsets = [2, 0], sizes = [1, 64], strides = [1, 1]} : vector<4x64xf32> to vector<1x64xf32>
    %1040 = vector.broadcast %1038 : vector<8x1xf32> to vector<8x64xf32>
    %1041 = vector.broadcast %1039 : vector<1x64xf32> to vector<8x64xf32>
    %1042 = arith.mulf %1040, %1041 : vector<8x64xf32>
    %1043 = arith.addf %1037, %1042 : vector<8x64xf32>
    %1044 = vector.extract_strided_slice %792 {offsets = [0, 35], sizes = [8, 1], strides = [1, 1]} : vector<8x108xf32> to vector<8x1xf32>
    %1045 = vector.extract_strided_slice %1025 {offsets = [3, 0], sizes = [1, 64], strides = [1, 1]} : vector<4x64xf32> to vector<1x64xf32>
    %1046 = vector.broadcast %1044 : vector<8x1xf32> to vector<8x64xf32>
    %1047 = vector.broadcast %1045 : vector<1x64xf32> to vector<8x64xf32>
    %1048 = arith.mulf %1046, %1047 : vector<8x64xf32>
    %1049 = arith.addf %1043, %1048 : vector<8x64xf32>
    %c0_71 = arith.constant 0 : index
    %c16_72 = arith.constant 16 : index
    %1050 = vector.load %arg9[%c0_71, %c16_72] : memref<4x106xf32, #tpu.memory_space<vmem>>, vector<4x64xf32>
    %1051 = vector.extract_strided_slice %25 {offsets = [9, 0], sizes = [1, 64], strides = [1, 1]} : vector<27x64xf32> to vector<1x64xf32>
    %1052 = vector.broadcast %1051 : vector<1x64xf32> to vector<4x64xf32>
    %1053 = arith.mulf %1050, %1052 : vector<4x64xf32>
    %1054 = vector.extract_strided_slice %792 {offsets = [0, 36], sizes = [8, 1], strides = [1, 1]} : vector<8x108xf32> to vector<8x1xf32>
    %1055 = vector.extract_strided_slice %1053 {offsets = [0, 0], sizes = [1, 64], strides = [1, 1]} : vector<4x64xf32> to vector<1x64xf32>
    %1056 = vector.broadcast %1054 : vector<8x1xf32> to vector<8x64xf32>
    %1057 = vector.broadcast %1055 : vector<1x64xf32> to vector<8x64xf32>
    %1058 = arith.mulf %1056, %1057 : vector<8x64xf32>
    %1059 = arith.addf %1049, %1058 : vector<8x64xf32>
    %1060 = vector.extract_strided_slice %792 {offsets = [0, 37], sizes = [8, 1], strides = [1, 1]} : vector<8x108xf32> to vector<8x1xf32>
    %1061 = vector.extract_strided_slice %1053 {offsets = [1, 0], sizes = [1, 64], strides = [1, 1]} : vector<4x64xf32> to vector<1x64xf32>
    %1062 = vector.broadcast %1060 : vector<8x1xf32> to vector<8x64xf32>
    %1063 = vector.broadcast %1061 : vector<1x64xf32> to vector<8x64xf32>
    %1064 = arith.mulf %1062, %1063 : vector<8x64xf32>
    %1065 = arith.addf %1059, %1064 : vector<8x64xf32>
    %1066 = vector.extract_strided_slice %792 {offsets = [0, 38], sizes = [8, 1], strides = [1, 1]} : vector<8x108xf32> to vector<8x1xf32>
    %1067 = vector.extract_strided_slice %1053 {offsets = [2, 0], sizes = [1, 64], strides = [1, 1]} : vector<4x64xf32> to vector<1x64xf32>
    %1068 = vector.broadcast %1066 : vector<8x1xf32> to vector<8x64xf32>
    %1069 = vector.broadcast %1067 : vector<1x64xf32> to vector<8x64xf32>
    %1070 = arith.mulf %1068, %1069 : vector<8x64xf32>
    %1071 = arith.addf %1065, %1070 : vector<8x64xf32>
    %1072 = vector.extract_strided_slice %792 {offsets = [0, 39], sizes = [8, 1], strides = [1, 1]} : vector<8x108xf32> to vector<8x1xf32>
    %1073 = vector.extract_strided_slice %1053 {offsets = [3, 0], sizes = [1, 64], strides = [1, 1]} : vector<4x64xf32> to vector<1x64xf32>
    %1074 = vector.broadcast %1072 : vector<8x1xf32> to vector<8x64xf32>
    %1075 = vector.broadcast %1073 : vector<1x64xf32> to vector<8x64xf32>
    %1076 = arith.mulf %1074, %1075 : vector<8x64xf32>
    %1077 = arith.addf %1071, %1076 : vector<8x64xf32>
    %c0_73 = arith.constant 0 : index
    %c17_74 = arith.constant 17 : index
    %1078 = vector.load %arg9[%c0_73, %c17_74] : memref<4x106xf32, #tpu.memory_space<vmem>>, vector<4x64xf32>
    %1079 = vector.extract_strided_slice %25 {offsets = [10, 0], sizes = [1, 64], strides = [1, 1]} : vector<27x64xf32> to vector<1x64xf32>
    %1080 = vector.broadcast %1079 : vector<1x64xf32> to vector<4x64xf32>
    %1081 = arith.mulf %1078, %1080 : vector<4x64xf32>
    %1082 = vector.extract_strided_slice %792 {offsets = [0, 40], sizes = [8, 1], strides = [1, 1]} : vector<8x108xf32> to vector<8x1xf32>
    %1083 = vector.extract_strided_slice %1081 {offsets = [0, 0], sizes = [1, 64], strides = [1, 1]} : vector<4x64xf32> to vector<1x64xf32>
    %1084 = vector.broadcast %1082 : vector<8x1xf32> to vector<8x64xf32>
    %1085 = vector.broadcast %1083 : vector<1x64xf32> to vector<8x64xf32>
    %1086 = arith.mulf %1084, %1085 : vector<8x64xf32>
    %1087 = arith.addf %1077, %1086 : vector<8x64xf32>
    %1088 = vector.extract_strided_slice %792 {offsets = [0, 41], sizes = [8, 1], strides = [1, 1]} : vector<8x108xf32> to vector<8x1xf32>
    %1089 = vector.extract_strided_slice %1081 {offsets = [1, 0], sizes = [1, 64], strides = [1, 1]} : vector<4x64xf32> to vector<1x64xf32>
    %1090 = vector.broadcast %1088 : vector<8x1xf32> to vector<8x64xf32>
    %1091 = vector.broadcast %1089 : vector<1x64xf32> to vector<8x64xf32>
    %1092 = arith.mulf %1090, %1091 : vector<8x64xf32>
    %1093 = arith.addf %1087, %1092 : vector<8x64xf32>
    %1094 = vector.extract_strided_slice %792 {offsets = [0, 42], sizes = [8, 1], strides = [1, 1]} : vector<8x108xf32> to vector<8x1xf32>
    %1095 = vector.extract_strided_slice %1081 {offsets = [2, 0], sizes = [1, 64], strides = [1, 1]} : vector<4x64xf32> to vector<1x64xf32>
    %1096 = vector.broadcast %1094 : vector<8x1xf32> to vector<8x64xf32>
    %1097 = vector.broadcast %1095 : vector<1x64xf32> to vector<8x64xf32>
    %1098 = arith.mulf %1096, %1097 : vector<8x64xf32>
    %1099 = arith.addf %1093, %1098 : vector<8x64xf32>
    %1100 = vector.extract_strided_slice %792 {offsets = [0, 43], sizes = [8, 1], strides = [1, 1]} : vector<8x108xf32> to vector<8x1xf32>
    %1101 = vector.extract_strided_slice %1081 {offsets = [3, 0], sizes = [1, 64], strides = [1, 1]} : vector<4x64xf32> to vector<1x64xf32>
    %1102 = vector.broadcast %1100 : vector<8x1xf32> to vector<8x64xf32>
    %1103 = vector.broadcast %1101 : vector<1x64xf32> to vector<8x64xf32>
    %1104 = arith.mulf %1102, %1103 : vector<8x64xf32>
    %1105 = arith.addf %1099, %1104 : vector<8x64xf32>
    %c0_75 = arith.constant 0 : index
    %c18_76 = arith.constant 18 : index
    %1106 = vector.load %arg9[%c0_75, %c18_76] : memref<4x106xf32, #tpu.memory_space<vmem>>, vector<4x64xf32>
    %1107 = vector.extract_strided_slice %25 {offsets = [11, 0], sizes = [1, 64], strides = [1, 1]} : vector<27x64xf32> to vector<1x64xf32>
    %1108 = vector.broadcast %1107 : vector<1x64xf32> to vector<4x64xf32>
    %1109 = arith.mulf %1106, %1108 : vector<4x64xf32>
    %1110 = vector.extract_strided_slice %792 {offsets = [0, 44], sizes = [8, 1], strides = [1, 1]} : vector<8x108xf32> to vector<8x1xf32>
    %1111 = vector.extract_strided_slice %1109 {offsets = [0, 0], sizes = [1, 64], strides = [1, 1]} : vector<4x64xf32> to vector<1x64xf32>
    %1112 = vector.broadcast %1110 : vector<8x1xf32> to vector<8x64xf32>
    %1113 = vector.broadcast %1111 : vector<1x64xf32> to vector<8x64xf32>
    %1114 = arith.mulf %1112, %1113 : vector<8x64xf32>
    %1115 = arith.addf %1105, %1114 : vector<8x64xf32>
    %1116 = vector.extract_strided_slice %792 {offsets = [0, 45], sizes = [8, 1], strides = [1, 1]} : vector<8x108xf32> to vector<8x1xf32>
    %1117 = vector.extract_strided_slice %1109 {offsets = [1, 0], sizes = [1, 64], strides = [1, 1]} : vector<4x64xf32> to vector<1x64xf32>
    %1118 = vector.broadcast %1116 : vector<8x1xf32> to vector<8x64xf32>
    %1119 = vector.broadcast %1117 : vector<1x64xf32> to vector<8x64xf32>
    %1120 = arith.mulf %1118, %1119 : vector<8x64xf32>
    %1121 = arith.addf %1115, %1120 : vector<8x64xf32>
    %1122 = vector.extract_strided_slice %792 {offsets = [0, 46], sizes = [8, 1], strides = [1, 1]} : vector<8x108xf32> to vector<8x1xf32>
    %1123 = vector.extract_strided_slice %1109 {offsets = [2, 0], sizes = [1, 64], strides = [1, 1]} : vector<4x64xf32> to vector<1x64xf32>
    %1124 = vector.broadcast %1122 : vector<8x1xf32> to vector<8x64xf32>
    %1125 = vector.broadcast %1123 : vector<1x64xf32> to vector<8x64xf32>
    %1126 = arith.mulf %1124, %1125 : vector<8x64xf32>
    %1127 = arith.addf %1121, %1126 : vector<8x64xf32>
    %1128 = vector.extract_strided_slice %792 {offsets = [0, 47], sizes = [8, 1], strides = [1, 1]} : vector<8x108xf32> to vector<8x1xf32>
    %1129 = vector.extract_strided_slice %1109 {offsets = [3, 0], sizes = [1, 64], strides = [1, 1]} : vector<4x64xf32> to vector<1x64xf32>
    %1130 = vector.broadcast %1128 : vector<8x1xf32> to vector<8x64xf32>
    %1131 = vector.broadcast %1129 : vector<1x64xf32> to vector<8x64xf32>
    %1132 = arith.mulf %1130, %1131 : vector<8x64xf32>
    %1133 = arith.addf %1127, %1132 : vector<8x64xf32>
    %c0_77 = arith.constant 0 : index
    %c20_78 = arith.constant 20 : index
    %1134 = vector.load %arg9[%c0_77, %c20_78] : memref<4x106xf32, #tpu.memory_space<vmem>>, vector<4x64xf32>
    %1135 = vector.extract_strided_slice %25 {offsets = [12, 0], sizes = [1, 64], strides = [1, 1]} : vector<27x64xf32> to vector<1x64xf32>
    %1136 = vector.broadcast %1135 : vector<1x64xf32> to vector<4x64xf32>
    %1137 = arith.mulf %1134, %1136 : vector<4x64xf32>
    %1138 = vector.extract_strided_slice %792 {offsets = [0, 48], sizes = [8, 1], strides = [1, 1]} : vector<8x108xf32> to vector<8x1xf32>
    %1139 = vector.extract_strided_slice %1137 {offsets = [0, 0], sizes = [1, 64], strides = [1, 1]} : vector<4x64xf32> to vector<1x64xf32>
    %1140 = vector.broadcast %1138 : vector<8x1xf32> to vector<8x64xf32>
    %1141 = vector.broadcast %1139 : vector<1x64xf32> to vector<8x64xf32>
    %1142 = arith.mulf %1140, %1141 : vector<8x64xf32>
    %1143 = arith.addf %1133, %1142 : vector<8x64xf32>
    %1144 = vector.extract_strided_slice %792 {offsets = [0, 49], sizes = [8, 1], strides = [1, 1]} : vector<8x108xf32> to vector<8x1xf32>
    %1145 = vector.extract_strided_slice %1137 {offsets = [1, 0], sizes = [1, 64], strides = [1, 1]} : vector<4x64xf32> to vector<1x64xf32>
    %1146 = vector.broadcast %1144 : vector<8x1xf32> to vector<8x64xf32>
    %1147 = vector.broadcast %1145 : vector<1x64xf32> to vector<8x64xf32>
    %1148 = arith.mulf %1146, %1147 : vector<8x64xf32>
    %1149 = arith.addf %1143, %1148 : vector<8x64xf32>
    %1150 = vector.extract_strided_slice %792 {offsets = [0, 50], sizes = [8, 1], strides = [1, 1]} : vector<8x108xf32> to vector<8x1xf32>
    %1151 = vector.extract_strided_slice %1137 {offsets = [2, 0], sizes = [1, 64], strides = [1, 1]} : vector<4x64xf32> to vector<1x64xf32>
    %1152 = vector.broadcast %1150 : vector<8x1xf32> to vector<8x64xf32>
    %1153 = vector.broadcast %1151 : vector<1x64xf32> to vector<8x64xf32>
    %1154 = arith.mulf %1152, %1153 : vector<8x64xf32>
    %1155 = arith.addf %1149, %1154 : vector<8x64xf32>
    %1156 = vector.extract_strided_slice %792 {offsets = [0, 51], sizes = [8, 1], strides = [1, 1]} : vector<8x108xf32> to vector<8x1xf32>
    %1157 = vector.extract_strided_slice %1137 {offsets = [3, 0], sizes = [1, 64], strides = [1, 1]} : vector<4x64xf32> to vector<1x64xf32>
    %1158 = vector.broadcast %1156 : vector<8x1xf32> to vector<8x64xf32>
    %1159 = vector.broadcast %1157 : vector<1x64xf32> to vector<8x64xf32>
    %1160 = arith.mulf %1158, %1159 : vector<8x64xf32>
    %1161 = arith.addf %1155, %1160 : vector<8x64xf32>
    %c0_79 = arith.constant 0 : index
    %c21_80 = arith.constant 21 : index
    %1162 = vector.load %arg9[%c0_79, %c21_80] : memref<4x106xf32, #tpu.memory_space<vmem>>, vector<4x64xf32>
    %1163 = vector.extract_strided_slice %25 {offsets = [13, 0], sizes = [1, 64], strides = [1, 1]} : vector<27x64xf32> to vector<1x64xf32>
    %1164 = vector.broadcast %1163 : vector<1x64xf32> to vector<4x64xf32>
    %1165 = arith.mulf %1162, %1164 : vector<4x64xf32>
    %1166 = vector.extract_strided_slice %792 {offsets = [0, 52], sizes = [8, 1], strides = [1, 1]} : vector<8x108xf32> to vector<8x1xf32>
    %1167 = vector.extract_strided_slice %1165 {offsets = [0, 0], sizes = [1, 64], strides = [1, 1]} : vector<4x64xf32> to vector<1x64xf32>
    %1168 = vector.broadcast %1166 : vector<8x1xf32> to vector<8x64xf32>
    %1169 = vector.broadcast %1167 : vector<1x64xf32> to vector<8x64xf32>
    %1170 = arith.mulf %1168, %1169 : vector<8x64xf32>
    %1171 = arith.addf %1161, %1170 : vector<8x64xf32>
    %1172 = vector.extract_strided_slice %792 {offsets = [0, 53], sizes = [8, 1], strides = [1, 1]} : vector<8x108xf32> to vector<8x1xf32>
    %1173 = vector.extract_strided_slice %1165 {offsets = [1, 0], sizes = [1, 64], strides = [1, 1]} : vector<4x64xf32> to vector<1x64xf32>
    %1174 = vector.broadcast %1172 : vector<8x1xf32> to vector<8x64xf32>
    %1175 = vector.broadcast %1173 : vector<1x64xf32> to vector<8x64xf32>
    %1176 = arith.mulf %1174, %1175 : vector<8x64xf32>
    %1177 = arith.addf %1171, %1176 : vector<8x64xf32>
    %1178 = vector.extract_strided_slice %792 {offsets = [0, 54], sizes = [8, 1], strides = [1, 1]} : vector<8x108xf32> to vector<8x1xf32>
    %1179 = vector.extract_strided_slice %1165 {offsets = [2, 0], sizes = [1, 64], strides = [1, 1]} : vector<4x64xf32> to vector<1x64xf32>
    %1180 = vector.broadcast %1178 : vector<8x1xf32> to vector<8x64xf32>
    %1181 = vector.broadcast %1179 : vector<1x64xf32> to vector<8x64xf32>
    %1182 = arith.mulf %1180, %1181 : vector<8x64xf32>
    %1183 = arith.addf %1177, %1182 : vector<8x64xf32>
    %1184 = vector.extract_strided_slice %792 {offsets = [0, 55], sizes = [8, 1], strides = [1, 1]} : vector<8x108xf32> to vector<8x1xf32>
    %1185 = vector.extract_strided_slice %1165 {offsets = [3, 0], sizes = [1, 64], strides = [1, 1]} : vector<4x64xf32> to vector<1x64xf32>
    %1186 = vector.broadcast %1184 : vector<8x1xf32> to vector<8x64xf32>
    %1187 = vector.broadcast %1185 : vector<1x64xf32> to vector<8x64xf32>
    %1188 = arith.mulf %1186, %1187 : vector<8x64xf32>
    %1189 = arith.addf %1183, %1188 : vector<8x64xf32>
    %c0_81 = arith.constant 0 : index
    %c22_82 = arith.constant 22 : index
    %1190 = vector.load %arg9[%c0_81, %c22_82] : memref<4x106xf32, #tpu.memory_space<vmem>>, vector<4x64xf32>
    %1191 = vector.extract_strided_slice %25 {offsets = [14, 0], sizes = [1, 64], strides = [1, 1]} : vector<27x64xf32> to vector<1x64xf32>
    %1192 = vector.broadcast %1191 : vector<1x64xf32> to vector<4x64xf32>
    %1193 = arith.mulf %1190, %1192 : vector<4x64xf32>
    %1194 = vector.extract_strided_slice %792 {offsets = [0, 56], sizes = [8, 1], strides = [1, 1]} : vector<8x108xf32> to vector<8x1xf32>
    %1195 = vector.extract_strided_slice %1193 {offsets = [0, 0], sizes = [1, 64], strides = [1, 1]} : vector<4x64xf32> to vector<1x64xf32>
    %1196 = vector.broadcast %1194 : vector<8x1xf32> to vector<8x64xf32>
    %1197 = vector.broadcast %1195 : vector<1x64xf32> to vector<8x64xf32>
    %1198 = arith.mulf %1196, %1197 : vector<8x64xf32>
    %1199 = arith.addf %1189, %1198 : vector<8x64xf32>
    %1200 = vector.extract_strided_slice %792 {offsets = [0, 57], sizes = [8, 1], strides = [1, 1]} : vector<8x108xf32> to vector<8x1xf32>
    %1201 = vector.extract_strided_slice %1193 {offsets = [1, 0], sizes = [1, 64], strides = [1, 1]} : vector<4x64xf32> to vector<1x64xf32>
    %1202 = vector.broadcast %1200 : vector<8x1xf32> to vector<8x64xf32>
    %1203 = vector.broadcast %1201 : vector<1x64xf32> to vector<8x64xf32>
    %1204 = arith.mulf %1202, %1203 : vector<8x64xf32>
    %1205 = arith.addf %1199, %1204 : vector<8x64xf32>
    %1206 = vector.extract_strided_slice %792 {offsets = [0, 58], sizes = [8, 1], strides = [1, 1]} : vector<8x108xf32> to vector<8x1xf32>
    %1207 = vector.extract_strided_slice %1193 {offsets = [2, 0], sizes = [1, 64], strides = [1, 1]} : vector<4x64xf32> to vector<1x64xf32>
    %1208 = vector.broadcast %1206 : vector<8x1xf32> to vector<8x64xf32>
    %1209 = vector.broadcast %1207 : vector<1x64xf32> to vector<8x64xf32>
    %1210 = arith.mulf %1208, %1209 : vector<8x64xf32>
    %1211 = arith.addf %1205, %1210 : vector<8x64xf32>
    %1212 = vector.extract_strided_slice %792 {offsets = [0, 59], sizes = [8, 1], strides = [1, 1]} : vector<8x108xf32> to vector<8x1xf32>
    %1213 = vector.extract_strided_slice %1193 {offsets = [3, 0], sizes = [1, 64], strides = [1, 1]} : vector<4x64xf32> to vector<1x64xf32>
    %1214 = vector.broadcast %1212 : vector<8x1xf32> to vector<8x64xf32>
    %1215 = vector.broadcast %1213 : vector<1x64xf32> to vector<8x64xf32>
    %1216 = arith.mulf %1214, %1215 : vector<8x64xf32>
    %1217 = arith.addf %1211, %1216 : vector<8x64xf32>
    %c0_83 = arith.constant 0 : index
    %c24_84 = arith.constant 24 : index
    %1218 = vector.load %arg9[%c0_83, %c24_84] : memref<4x106xf32, #tpu.memory_space<vmem>>, vector<4x64xf32>
    %1219 = vector.extract_strided_slice %25 {offsets = [15, 0], sizes = [1, 64], strides = [1, 1]} : vector<27x64xf32> to vector<1x64xf32>
    %1220 = vector.broadcast %1219 : vector<1x64xf32> to vector<4x64xf32>
    %1221 = arith.mulf %1218, %1220 : vector<4x64xf32>
    %1222 = vector.extract_strided_slice %792 {offsets = [0, 60], sizes = [8, 1], strides = [1, 1]} : vector<8x108xf32> to vector<8x1xf32>
    %1223 = vector.extract_strided_slice %1221 {offsets = [0, 0], sizes = [1, 64], strides = [1, 1]} : vector<4x64xf32> to vector<1x64xf32>
    %1224 = vector.broadcast %1222 : vector<8x1xf32> to vector<8x64xf32>
    %1225 = vector.broadcast %1223 : vector<1x64xf32> to vector<8x64xf32>
    %1226 = arith.mulf %1224, %1225 : vector<8x64xf32>
    %1227 = arith.addf %1217, %1226 : vector<8x64xf32>
    %1228 = vector.extract_strided_slice %792 {offsets = [0, 61], sizes = [8, 1], strides = [1, 1]} : vector<8x108xf32> to vector<8x1xf32>
    %1229 = vector.extract_strided_slice %1221 {offsets = [1, 0], sizes = [1, 64], strides = [1, 1]} : vector<4x64xf32> to vector<1x64xf32>
    %1230 = vector.broadcast %1228 : vector<8x1xf32> to vector<8x64xf32>
    %1231 = vector.broadcast %1229 : vector<1x64xf32> to vector<8x64xf32>
    %1232 = arith.mulf %1230, %1231 : vector<8x64xf32>
    %1233 = arith.addf %1227, %1232 : vector<8x64xf32>
    %1234 = vector.extract_strided_slice %792 {offsets = [0, 62], sizes = [8, 1], strides = [1, 1]} : vector<8x108xf32> to vector<8x1xf32>
    %1235 = vector.extract_strided_slice %1221 {offsets = [2, 0], sizes = [1, 64], strides = [1, 1]} : vector<4x64xf32> to vector<1x64xf32>
    %1236 = vector.broadcast %1234 : vector<8x1xf32> to vector<8x64xf32>
    %1237 = vector.broadcast %1235 : vector<1x64xf32> to vector<8x64xf32>
    %1238 = arith.mulf %1236, %1237 : vector<8x64xf32>
    %1239 = arith.addf %1233, %1238 : vector<8x64xf32>
    %1240 = vector.extract_strided_slice %792 {offsets = [0, 63], sizes = [8, 1], strides = [1, 1]} : vector<8x108xf32> to vector<8x1xf32>
    %1241 = vector.extract_strided_slice %1221 {offsets = [3, 0], sizes = [1, 64], strides = [1, 1]} : vector<4x64xf32> to vector<1x64xf32>
    %1242 = vector.broadcast %1240 : vector<8x1xf32> to vector<8x64xf32>
    %1243 = vector.broadcast %1241 : vector<1x64xf32> to vector<8x64xf32>
    %1244 = arith.mulf %1242, %1243 : vector<8x64xf32>
    %1245 = arith.addf %1239, %1244 : vector<8x64xf32>
    %c0_85 = arith.constant 0 : index
    %c25_86 = arith.constant 25 : index
    %1246 = vector.load %arg9[%c0_85, %c25_86] : memref<4x106xf32, #tpu.memory_space<vmem>>, vector<4x64xf32>
    %1247 = vector.extract_strided_slice %25 {offsets = [16, 0], sizes = [1, 64], strides = [1, 1]} : vector<27x64xf32> to vector<1x64xf32>
    %1248 = vector.broadcast %1247 : vector<1x64xf32> to vector<4x64xf32>
    %1249 = arith.mulf %1246, %1248 : vector<4x64xf32>
    %1250 = vector.extract_strided_slice %792 {offsets = [0, 64], sizes = [8, 1], strides = [1, 1]} : vector<8x108xf32> to vector<8x1xf32>
    %1251 = vector.extract_strided_slice %1249 {offsets = [0, 0], sizes = [1, 64], strides = [1, 1]} : vector<4x64xf32> to vector<1x64xf32>
    %1252 = vector.broadcast %1250 : vector<8x1xf32> to vector<8x64xf32>
    %1253 = vector.broadcast %1251 : vector<1x64xf32> to vector<8x64xf32>
    %1254 = arith.mulf %1252, %1253 : vector<8x64xf32>
    %1255 = arith.addf %1245, %1254 : vector<8x64xf32>
    %1256 = vector.extract_strided_slice %792 {offsets = [0, 65], sizes = [8, 1], strides = [1, 1]} : vector<8x108xf32> to vector<8x1xf32>
    %1257 = vector.extract_strided_slice %1249 {offsets = [1, 0], sizes = [1, 64], strides = [1, 1]} : vector<4x64xf32> to vector<1x64xf32>
    %1258 = vector.broadcast %1256 : vector<8x1xf32> to vector<8x64xf32>
    %1259 = vector.broadcast %1257 : vector<1x64xf32> to vector<8x64xf32>
    %1260 = arith.mulf %1258, %1259 : vector<8x64xf32>
    %1261 = arith.addf %1255, %1260 : vector<8x64xf32>
    %1262 = vector.extract_strided_slice %792 {offsets = [0, 66], sizes = [8, 1], strides = [1, 1]} : vector<8x108xf32> to vector<8x1xf32>
    %1263 = vector.extract_strided_slice %1249 {offsets = [2, 0], sizes = [1, 64], strides = [1, 1]} : vector<4x64xf32> to vector<1x64xf32>
    %1264 = vector.broadcast %1262 : vector<8x1xf32> to vector<8x64xf32>
    %1265 = vector.broadcast %1263 : vector<1x64xf32> to vector<8x64xf32>
    %1266 = arith.mulf %1264, %1265 : vector<8x64xf32>
    %1267 = arith.addf %1261, %1266 : vector<8x64xf32>
    %1268 = vector.extract_strided_slice %792 {offsets = [0, 67], sizes = [8, 1], strides = [1, 1]} : vector<8x108xf32> to vector<8x1xf32>
    %1269 = vector.extract_strided_slice %1249 {offsets = [3, 0], sizes = [1, 64], strides = [1, 1]} : vector<4x64xf32> to vector<1x64xf32>
    %1270 = vector.broadcast %1268 : vector<8x1xf32> to vector<8x64xf32>
    %1271 = vector.broadcast %1269 : vector<1x64xf32> to vector<8x64xf32>
    %1272 = arith.mulf %1270, %1271 : vector<8x64xf32>
    %1273 = arith.addf %1267, %1272 : vector<8x64xf32>
    %c0_87 = arith.constant 0 : index
    %c26_88 = arith.constant 26 : index
    %1274 = vector.load %arg9[%c0_87, %c26_88] : memref<4x106xf32, #tpu.memory_space<vmem>>, vector<4x64xf32>
    %1275 = vector.extract_strided_slice %25 {offsets = [17, 0], sizes = [1, 64], strides = [1, 1]} : vector<27x64xf32> to vector<1x64xf32>
    %1276 = vector.broadcast %1275 : vector<1x64xf32> to vector<4x64xf32>
    %1277 = arith.mulf %1274, %1276 : vector<4x64xf32>
    %1278 = vector.extract_strided_slice %792 {offsets = [0, 68], sizes = [8, 1], strides = [1, 1]} : vector<8x108xf32> to vector<8x1xf32>
    %1279 = vector.extract_strided_slice %1277 {offsets = [0, 0], sizes = [1, 64], strides = [1, 1]} : vector<4x64xf32> to vector<1x64xf32>
    %1280 = vector.broadcast %1278 : vector<8x1xf32> to vector<8x64xf32>
    %1281 = vector.broadcast %1279 : vector<1x64xf32> to vector<8x64xf32>
    %1282 = arith.mulf %1280, %1281 : vector<8x64xf32>
    %1283 = arith.addf %1273, %1282 : vector<8x64xf32>
    %1284 = vector.extract_strided_slice %792 {offsets = [0, 69], sizes = [8, 1], strides = [1, 1]} : vector<8x108xf32> to vector<8x1xf32>
    %1285 = vector.extract_strided_slice %1277 {offsets = [1, 0], sizes = [1, 64], strides = [1, 1]} : vector<4x64xf32> to vector<1x64xf32>
    %1286 = vector.broadcast %1284 : vector<8x1xf32> to vector<8x64xf32>
    %1287 = vector.broadcast %1285 : vector<1x64xf32> to vector<8x64xf32>
    %1288 = arith.mulf %1286, %1287 : vector<8x64xf32>
    %1289 = arith.addf %1283, %1288 : vector<8x64xf32>
    %1290 = vector.extract_strided_slice %792 {offsets = [0, 70], sizes = [8, 1], strides = [1, 1]} : vector<8x108xf32> to vector<8x1xf32>
    %1291 = vector.extract_strided_slice %1277 {offsets = [2, 0], sizes = [1, 64], strides = [1, 1]} : vector<4x64xf32> to vector<1x64xf32>
    %1292 = vector.broadcast %1290 : vector<8x1xf32> to vector<8x64xf32>
    %1293 = vector.broadcast %1291 : vector<1x64xf32> to vector<8x64xf32>
    %1294 = arith.mulf %1292, %1293 : vector<8x64xf32>
    %1295 = arith.addf %1289, %1294 : vector<8x64xf32>
    %1296 = vector.extract_strided_slice %792 {offsets = [0, 71], sizes = [8, 1], strides = [1, 1]} : vector<8x108xf32> to vector<8x1xf32>
    %1297 = vector.extract_strided_slice %1277 {offsets = [3, 0], sizes = [1, 64], strides = [1, 1]} : vector<4x64xf32> to vector<1x64xf32>
    %1298 = vector.broadcast %1296 : vector<8x1xf32> to vector<8x64xf32>
    %1299 = vector.broadcast %1297 : vector<1x64xf32> to vector<8x64xf32>
    %1300 = arith.mulf %1298, %1299 : vector<8x64xf32>
    %1301 = arith.addf %1295, %1300 : vector<8x64xf32>
    %c0_89 = arith.constant 0 : index
    %c32_90 = arith.constant 32 : index
    %1302 = vector.load %arg9[%c0_89, %c32_90] : memref<4x106xf32, #tpu.memory_space<vmem>>, vector<4x64xf32>
    %1303 = vector.extract_strided_slice %25 {offsets = [18, 0], sizes = [1, 64], strides = [1, 1]} : vector<27x64xf32> to vector<1x64xf32>
    %1304 = vector.broadcast %1303 : vector<1x64xf32> to vector<4x64xf32>
    %1305 = arith.mulf %1302, %1304 : vector<4x64xf32>
    %1306 = vector.extract_strided_slice %792 {offsets = [0, 72], sizes = [8, 1], strides = [1, 1]} : vector<8x108xf32> to vector<8x1xf32>
    %1307 = vector.extract_strided_slice %1305 {offsets = [0, 0], sizes = [1, 64], strides = [1, 1]} : vector<4x64xf32> to vector<1x64xf32>
    %1308 = vector.broadcast %1306 : vector<8x1xf32> to vector<8x64xf32>
    %1309 = vector.broadcast %1307 : vector<1x64xf32> to vector<8x64xf32>
    %1310 = arith.mulf %1308, %1309 : vector<8x64xf32>
    %1311 = arith.addf %1301, %1310 : vector<8x64xf32>
    %1312 = vector.extract_strided_slice %792 {offsets = [0, 73], sizes = [8, 1], strides = [1, 1]} : vector<8x108xf32> to vector<8x1xf32>
    %1313 = vector.extract_strided_slice %1305 {offsets = [1, 0], sizes = [1, 64], strides = [1, 1]} : vector<4x64xf32> to vector<1x64xf32>
    %1314 = vector.broadcast %1312 : vector<8x1xf32> to vector<8x64xf32>
    %1315 = vector.broadcast %1313 : vector<1x64xf32> to vector<8x64xf32>
    %1316 = arith.mulf %1314, %1315 : vector<8x64xf32>
    %1317 = arith.addf %1311, %1316 : vector<8x64xf32>
    %1318 = vector.extract_strided_slice %792 {offsets = [0, 74], sizes = [8, 1], strides = [1, 1]} : vector<8x108xf32> to vector<8x1xf32>
    %1319 = vector.extract_strided_slice %1305 {offsets = [2, 0], sizes = [1, 64], strides = [1, 1]} : vector<4x64xf32> to vector<1x64xf32>
    %1320 = vector.broadcast %1318 : vector<8x1xf32> to vector<8x64xf32>
    %1321 = vector.broadcast %1319 : vector<1x64xf32> to vector<8x64xf32>
    %1322 = arith.mulf %1320, %1321 : vector<8x64xf32>
    %1323 = arith.addf %1317, %1322 : vector<8x64xf32>
    %1324 = vector.extract_strided_slice %792 {offsets = [0, 75], sizes = [8, 1], strides = [1, 1]} : vector<8x108xf32> to vector<8x1xf32>
    %1325 = vector.extract_strided_slice %1305 {offsets = [3, 0], sizes = [1, 64], strides = [1, 1]} : vector<4x64xf32> to vector<1x64xf32>
    %1326 = vector.broadcast %1324 : vector<8x1xf32> to vector<8x64xf32>
    %1327 = vector.broadcast %1325 : vector<1x64xf32> to vector<8x64xf32>
    %1328 = arith.mulf %1326, %1327 : vector<8x64xf32>
    %1329 = arith.addf %1323, %1328 : vector<8x64xf32>
    %c0_91 = arith.constant 0 : index
    %c33_92 = arith.constant 33 : index
    %1330 = vector.load %arg9[%c0_91, %c33_92] : memref<4x106xf32, #tpu.memory_space<vmem>>, vector<4x64xf32>
    %1331 = vector.extract_strided_slice %25 {offsets = [19, 0], sizes = [1, 64], strides = [1, 1]} : vector<27x64xf32> to vector<1x64xf32>
    %1332 = vector.broadcast %1331 : vector<1x64xf32> to vector<4x64xf32>
    %1333 = arith.mulf %1330, %1332 : vector<4x64xf32>
    %1334 = vector.extract_strided_slice %792 {offsets = [0, 76], sizes = [8, 1], strides = [1, 1]} : vector<8x108xf32> to vector<8x1xf32>
    %1335 = vector.extract_strided_slice %1333 {offsets = [0, 0], sizes = [1, 64], strides = [1, 1]} : vector<4x64xf32> to vector<1x64xf32>
    %1336 = vector.broadcast %1334 : vector<8x1xf32> to vector<8x64xf32>
    %1337 = vector.broadcast %1335 : vector<1x64xf32> to vector<8x64xf32>
    %1338 = arith.mulf %1336, %1337 : vector<8x64xf32>
    %1339 = arith.addf %1329, %1338 : vector<8x64xf32>
    %1340 = vector.extract_strided_slice %792 {offsets = [0, 77], sizes = [8, 1], strides = [1, 1]} : vector<8x108xf32> to vector<8x1xf32>
    %1341 = vector.extract_strided_slice %1333 {offsets = [1, 0], sizes = [1, 64], strides = [1, 1]} : vector<4x64xf32> to vector<1x64xf32>
    %1342 = vector.broadcast %1340 : vector<8x1xf32> to vector<8x64xf32>
    %1343 = vector.broadcast %1341 : vector<1x64xf32> to vector<8x64xf32>
    %1344 = arith.mulf %1342, %1343 : vector<8x64xf32>
    %1345 = arith.addf %1339, %1344 : vector<8x64xf32>
    %1346 = vector.extract_strided_slice %792 {offsets = [0, 78], sizes = [8, 1], strides = [1, 1]} : vector<8x108xf32> to vector<8x1xf32>
    %1347 = vector.extract_strided_slice %1333 {offsets = [2, 0], sizes = [1, 64], strides = [1, 1]} : vector<4x64xf32> to vector<1x64xf32>
    %1348 = vector.broadcast %1346 : vector<8x1xf32> to vector<8x64xf32>
    %1349 = vector.broadcast %1347 : vector<1x64xf32> to vector<8x64xf32>
    %1350 = arith.mulf %1348, %1349 : vector<8x64xf32>
    %1351 = arith.addf %1345, %1350 : vector<8x64xf32>
    %1352 = vector.extract_strided_slice %792 {offsets = [0, 79], sizes = [8, 1], strides = [1, 1]} : vector<8x108xf32> to vector<8x1xf32>
    %1353 = vector.extract_strided_slice %1333 {offsets = [3, 0], sizes = [1, 64], strides = [1, 1]} : vector<4x64xf32> to vector<1x64xf32>
    %1354 = vector.broadcast %1352 : vector<8x1xf32> to vector<8x64xf32>
    %1355 = vector.broadcast %1353 : vector<1x64xf32> to vector<8x64xf32>
    %1356 = arith.mulf %1354, %1355 : vector<8x64xf32>
    %1357 = arith.addf %1351, %1356 : vector<8x64xf32>
    %c0_93 = arith.constant 0 : index
    %c34_94 = arith.constant 34 : index
    %1358 = vector.load %arg9[%c0_93, %c34_94] : memref<4x106xf32, #tpu.memory_space<vmem>>, vector<4x64xf32>
    %1359 = vector.extract_strided_slice %25 {offsets = [20, 0], sizes = [1, 64], strides = [1, 1]} : vector<27x64xf32> to vector<1x64xf32>
    %1360 = vector.broadcast %1359 : vector<1x64xf32> to vector<4x64xf32>
    %1361 = arith.mulf %1358, %1360 : vector<4x64xf32>
    %1362 = vector.extract_strided_slice %792 {offsets = [0, 80], sizes = [8, 1], strides = [1, 1]} : vector<8x108xf32> to vector<8x1xf32>
    %1363 = vector.extract_strided_slice %1361 {offsets = [0, 0], sizes = [1, 64], strides = [1, 1]} : vector<4x64xf32> to vector<1x64xf32>
    %1364 = vector.broadcast %1362 : vector<8x1xf32> to vector<8x64xf32>
    %1365 = vector.broadcast %1363 : vector<1x64xf32> to vector<8x64xf32>
    %1366 = arith.mulf %1364, %1365 : vector<8x64xf32>
    %1367 = arith.addf %1357, %1366 : vector<8x64xf32>
    %1368 = vector.extract_strided_slice %792 {offsets = [0, 81], sizes = [8, 1], strides = [1, 1]} : vector<8x108xf32> to vector<8x1xf32>
    %1369 = vector.extract_strided_slice %1361 {offsets = [1, 0], sizes = [1, 64], strides = [1, 1]} : vector<4x64xf32> to vector<1x64xf32>
    %1370 = vector.broadcast %1368 : vector<8x1xf32> to vector<8x64xf32>
    %1371 = vector.broadcast %1369 : vector<1x64xf32> to vector<8x64xf32>
    %1372 = arith.mulf %1370, %1371 : vector<8x64xf32>
    %1373 = arith.addf %1367, %1372 : vector<8x64xf32>
    %1374 = vector.extract_strided_slice %792 {offsets = [0, 82], sizes = [8, 1], strides = [1, 1]} : vector<8x108xf32> to vector<8x1xf32>
    %1375 = vector.extract_strided_slice %1361 {offsets = [2, 0], sizes = [1, 64], strides = [1, 1]} : vector<4x64xf32> to vector<1x64xf32>
    %1376 = vector.broadcast %1374 : vector<8x1xf32> to vector<8x64xf32>
    %1377 = vector.broadcast %1375 : vector<1x64xf32> to vector<8x64xf32>
    %1378 = arith.mulf %1376, %1377 : vector<8x64xf32>
    %1379 = arith.addf %1373, %1378 : vector<8x64xf32>
    %1380 = vector.extract_strided_slice %792 {offsets = [0, 83], sizes = [8, 1], strides = [1, 1]} : vector<8x108xf32> to vector<8x1xf32>
    %1381 = vector.extract_strided_slice %1361 {offsets = [3, 0], sizes = [1, 64], strides = [1, 1]} : vector<4x64xf32> to vector<1x64xf32>
    %1382 = vector.broadcast %1380 : vector<8x1xf32> to vector<8x64xf32>
    %1383 = vector.broadcast %1381 : vector<1x64xf32> to vector<8x64xf32>
    %1384 = arith.mulf %1382, %1383 : vector<8x64xf32>
    %1385 = arith.addf %1379, %1384 : vector<8x64xf32>
    %c0_95 = arith.constant 0 : index
    %c36_96 = arith.constant 36 : index
    %1386 = vector.load %arg9[%c0_95, %c36_96] : memref<4x106xf32, #tpu.memory_space<vmem>>, vector<4x64xf32>
    %1387 = vector.extract_strided_slice %25 {offsets = [21, 0], sizes = [1, 64], strides = [1, 1]} : vector<27x64xf32> to vector<1x64xf32>
    %1388 = vector.broadcast %1387 : vector<1x64xf32> to vector<4x64xf32>
    %1389 = arith.mulf %1386, %1388 : vector<4x64xf32>
    %1390 = vector.extract_strided_slice %792 {offsets = [0, 84], sizes = [8, 1], strides = [1, 1]} : vector<8x108xf32> to vector<8x1xf32>
    %1391 = vector.extract_strided_slice %1389 {offsets = [0, 0], sizes = [1, 64], strides = [1, 1]} : vector<4x64xf32> to vector<1x64xf32>
    %1392 = vector.broadcast %1390 : vector<8x1xf32> to vector<8x64xf32>
    %1393 = vector.broadcast %1391 : vector<1x64xf32> to vector<8x64xf32>
    %1394 = arith.mulf %1392, %1393 : vector<8x64xf32>
    %1395 = arith.addf %1385, %1394 : vector<8x64xf32>
    %1396 = vector.extract_strided_slice %792 {offsets = [0, 85], sizes = [8, 1], strides = [1, 1]} : vector<8x108xf32> to vector<8x1xf32>
    %1397 = vector.extract_strided_slice %1389 {offsets = [1, 0], sizes = [1, 64], strides = [1, 1]} : vector<4x64xf32> to vector<1x64xf32>
    %1398 = vector.broadcast %1396 : vector<8x1xf32> to vector<8x64xf32>
    %1399 = vector.broadcast %1397 : vector<1x64xf32> to vector<8x64xf32>
    %1400 = arith.mulf %1398, %1399 : vector<8x64xf32>
    %1401 = arith.addf %1395, %1400 : vector<8x64xf32>
    %1402 = vector.extract_strided_slice %792 {offsets = [0, 86], sizes = [8, 1], strides = [1, 1]} : vector<8x108xf32> to vector<8x1xf32>
    %1403 = vector.extract_strided_slice %1389 {offsets = [2, 0], sizes = [1, 64], strides = [1, 1]} : vector<4x64xf32> to vector<1x64xf32>
    %1404 = vector.broadcast %1402 : vector<8x1xf32> to vector<8x64xf32>
    %1405 = vector.broadcast %1403 : vector<1x64xf32> to vector<8x64xf32>
    %1406 = arith.mulf %1404, %1405 : vector<8x64xf32>
    %1407 = arith.addf %1401, %1406 : vector<8x64xf32>
    %1408 = vector.extract_strided_slice %792 {offsets = [0, 87], sizes = [8, 1], strides = [1, 1]} : vector<8x108xf32> to vector<8x1xf32>
    %1409 = vector.extract_strided_slice %1389 {offsets = [3, 0], sizes = [1, 64], strides = [1, 1]} : vector<4x64xf32> to vector<1x64xf32>
    %1410 = vector.broadcast %1408 : vector<8x1xf32> to vector<8x64xf32>
    %1411 = vector.broadcast %1409 : vector<1x64xf32> to vector<8x64xf32>
    %1412 = arith.mulf %1410, %1411 : vector<8x64xf32>
    %1413 = arith.addf %1407, %1412 : vector<8x64xf32>
    %c0_97 = arith.constant 0 : index
    %c37_98 = arith.constant 37 : index
    %1414 = vector.load %arg9[%c0_97, %c37_98] : memref<4x106xf32, #tpu.memory_space<vmem>>, vector<4x64xf32>
    %1415 = vector.extract_strided_slice %25 {offsets = [22, 0], sizes = [1, 64], strides = [1, 1]} : vector<27x64xf32> to vector<1x64xf32>
    %1416 = vector.broadcast %1415 : vector<1x64xf32> to vector<4x64xf32>
    %1417 = arith.mulf %1414, %1416 : vector<4x64xf32>
    %1418 = vector.extract_strided_slice %792 {offsets = [0, 88], sizes = [8, 1], strides = [1, 1]} : vector<8x108xf32> to vector<8x1xf32>
    %1419 = vector.extract_strided_slice %1417 {offsets = [0, 0], sizes = [1, 64], strides = [1, 1]} : vector<4x64xf32> to vector<1x64xf32>
    %1420 = vector.broadcast %1418 : vector<8x1xf32> to vector<8x64xf32>
    %1421 = vector.broadcast %1419 : vector<1x64xf32> to vector<8x64xf32>
    %1422 = arith.mulf %1420, %1421 : vector<8x64xf32>
    %1423 = arith.addf %1413, %1422 : vector<8x64xf32>
    %1424 = vector.extract_strided_slice %792 {offsets = [0, 89], sizes = [8, 1], strides = [1, 1]} : vector<8x108xf32> to vector<8x1xf32>
    %1425 = vector.extract_strided_slice %1417 {offsets = [1, 0], sizes = [1, 64], strides = [1, 1]} : vector<4x64xf32> to vector<1x64xf32>
    %1426 = vector.broadcast %1424 : vector<8x1xf32> to vector<8x64xf32>
    %1427 = vector.broadcast %1425 : vector<1x64xf32> to vector<8x64xf32>
    %1428 = arith.mulf %1426, %1427 : vector<8x64xf32>
    %1429 = arith.addf %1423, %1428 : vector<8x64xf32>
    %1430 = vector.extract_strided_slice %792 {offsets = [0, 90], sizes = [8, 1], strides = [1, 1]} : vector<8x108xf32> to vector<8x1xf32>
    %1431 = vector.extract_strided_slice %1417 {offsets = [2, 0], sizes = [1, 64], strides = [1, 1]} : vector<4x64xf32> to vector<1x64xf32>
    %1432 = vector.broadcast %1430 : vector<8x1xf32> to vector<8x64xf32>
    %1433 = vector.broadcast %1431 : vector<1x64xf32> to vector<8x64xf32>
    %1434 = arith.mulf %1432, %1433 : vector<8x64xf32>
    %1435 = arith.addf %1429, %1434 : vector<8x64xf32>
    %1436 = vector.extract_strided_slice %792 {offsets = [0, 91], sizes = [8, 1], strides = [1, 1]} : vector<8x108xf32> to vector<8x1xf32>
    %1437 = vector.extract_strided_slice %1417 {offsets = [3, 0], sizes = [1, 64], strides = [1, 1]} : vector<4x64xf32> to vector<1x64xf32>
    %1438 = vector.broadcast %1436 : vector<8x1xf32> to vector<8x64xf32>
    %1439 = vector.broadcast %1437 : vector<1x64xf32> to vector<8x64xf32>
    %1440 = arith.mulf %1438, %1439 : vector<8x64xf32>
    %1441 = arith.addf %1435, %1440 : vector<8x64xf32>
    %c0_99 = arith.constant 0 : index
    %c38_100 = arith.constant 38 : index
    %1442 = vector.load %arg9[%c0_99, %c38_100] : memref<4x106xf32, #tpu.memory_space<vmem>>, vector<4x64xf32>
    %1443 = vector.extract_strided_slice %25 {offsets = [23, 0], sizes = [1, 64], strides = [1, 1]} : vector<27x64xf32> to vector<1x64xf32>
    %1444 = vector.broadcast %1443 : vector<1x64xf32> to vector<4x64xf32>
    %1445 = arith.mulf %1442, %1444 : vector<4x64xf32>
    %1446 = vector.extract_strided_slice %792 {offsets = [0, 92], sizes = [8, 1], strides = [1, 1]} : vector<8x108xf32> to vector<8x1xf32>
    %1447 = vector.extract_strided_slice %1445 {offsets = [0, 0], sizes = [1, 64], strides = [1, 1]} : vector<4x64xf32> to vector<1x64xf32>
    %1448 = vector.broadcast %1446 : vector<8x1xf32> to vector<8x64xf32>
    %1449 = vector.broadcast %1447 : vector<1x64xf32> to vector<8x64xf32>
    %1450 = arith.mulf %1448, %1449 : vector<8x64xf32>
    %1451 = arith.addf %1441, %1450 : vector<8x64xf32>
    %1452 = vector.extract_strided_slice %792 {offsets = [0, 93], sizes = [8, 1], strides = [1, 1]} : vector<8x108xf32> to vector<8x1xf32>
    %1453 = vector.extract_strided_slice %1445 {offsets = [1, 0], sizes = [1, 64], strides = [1, 1]} : vector<4x64xf32> to vector<1x64xf32>
    %1454 = vector.broadcast %1452 : vector<8x1xf32> to vector<8x64xf32>
    %1455 = vector.broadcast %1453 : vector<1x64xf32> to vector<8x64xf32>
    %1456 = arith.mulf %1454, %1455 : vector<8x64xf32>
    %1457 = arith.addf %1451, %1456 : vector<8x64xf32>
    %1458 = vector.extract_strided_slice %792 {offsets = [0, 94], sizes = [8, 1], strides = [1, 1]} : vector<8x108xf32> to vector<8x1xf32>
    %1459 = vector.extract_strided_slice %1445 {offsets = [2, 0], sizes = [1, 64], strides = [1, 1]} : vector<4x64xf32> to vector<1x64xf32>
    %1460 = vector.broadcast %1458 : vector<8x1xf32> to vector<8x64xf32>
    %1461 = vector.broadcast %1459 : vector<1x64xf32> to vector<8x64xf32>
    %1462 = arith.mulf %1460, %1461 : vector<8x64xf32>
    %1463 = arith.addf %1457, %1462 : vector<8x64xf32>
    %1464 = vector.extract_strided_slice %792 {offsets = [0, 95], sizes = [8, 1], strides = [1, 1]} : vector<8x108xf32> to vector<8x1xf32>
    %1465 = vector.extract_strided_slice %1445 {offsets = [3, 0], sizes = [1, 64], strides = [1, 1]} : vector<4x64xf32> to vector<1x64xf32>
    %1466 = vector.broadcast %1464 : vector<8x1xf32> to vector<8x64xf32>
    %1467 = vector.broadcast %1465 : vector<1x64xf32> to vector<8x64xf32>
    %1468 = arith.mulf %1466, %1467 : vector<8x64xf32>
    %1469 = arith.addf %1463, %1468 : vector<8x64xf32>
    %c0_101 = arith.constant 0 : index
    %c40_102 = arith.constant 40 : index
    %1470 = vector.load %arg9[%c0_101, %c40_102] : memref<4x106xf32, #tpu.memory_space<vmem>>, vector<4x64xf32>
    %1471 = vector.extract_strided_slice %25 {offsets = [24, 0], sizes = [1, 64], strides = [1, 1]} : vector<27x64xf32> to vector<1x64xf32>
    %1472 = vector.broadcast %1471 : vector<1x64xf32> to vector<4x64xf32>
    %1473 = arith.mulf %1470, %1472 : vector<4x64xf32>
    %1474 = vector.extract_strided_slice %792 {offsets = [0, 96], sizes = [8, 1], strides = [1, 1]} : vector<8x108xf32> to vector<8x1xf32>
    %1475 = vector.extract_strided_slice %1473 {offsets = [0, 0], sizes = [1, 64], strides = [1, 1]} : vector<4x64xf32> to vector<1x64xf32>
    %1476 = vector.broadcast %1474 : vector<8x1xf32> to vector<8x64xf32>
    %1477 = vector.broadcast %1475 : vector<1x64xf32> to vector<8x64xf32>
    %1478 = arith.mulf %1476, %1477 : vector<8x64xf32>
    %1479 = arith.addf %1469, %1478 : vector<8x64xf32>
    %1480 = vector.extract_strided_slice %792 {offsets = [0, 97], sizes = [8, 1], strides = [1, 1]} : vector<8x108xf32> to vector<8x1xf32>
    %1481 = vector.extract_strided_slice %1473 {offsets = [1, 0], sizes = [1, 64], strides = [1, 1]} : vector<4x64xf32> to vector<1x64xf32>
    %1482 = vector.broadcast %1480 : vector<8x1xf32> to vector<8x64xf32>
    %1483 = vector.broadcast %1481 : vector<1x64xf32> to vector<8x64xf32>
    %1484 = arith.mulf %1482, %1483 : vector<8x64xf32>
    %1485 = arith.addf %1479, %1484 : vector<8x64xf32>
    %1486 = vector.extract_strided_slice %792 {offsets = [0, 98], sizes = [8, 1], strides = [1, 1]} : vector<8x108xf32> to vector<8x1xf32>
    %1487 = vector.extract_strided_slice %1473 {offsets = [2, 0], sizes = [1, 64], strides = [1, 1]} : vector<4x64xf32> to vector<1x64xf32>
    %1488 = vector.broadcast %1486 : vector<8x1xf32> to vector<8x64xf32>
    %1489 = vector.broadcast %1487 : vector<1x64xf32> to vector<8x64xf32>
    %1490 = arith.mulf %1488, %1489 : vector<8x64xf32>
    %1491 = arith.addf %1485, %1490 : vector<8x64xf32>
    %1492 = vector.extract_strided_slice %792 {offsets = [0, 99], sizes = [8, 1], strides = [1, 1]} : vector<8x108xf32> to vector<8x1xf32>
    %1493 = vector.extract_strided_slice %1473 {offsets = [3, 0], sizes = [1, 64], strides = [1, 1]} : vector<4x64xf32> to vector<1x64xf32>
    %1494 = vector.broadcast %1492 : vector<8x1xf32> to vector<8x64xf32>
    %1495 = vector.broadcast %1493 : vector<1x64xf32> to vector<8x64xf32>
    %1496 = arith.mulf %1494, %1495 : vector<8x64xf32>
    %1497 = arith.addf %1491, %1496 : vector<8x64xf32>
    %c0_103 = arith.constant 0 : index
    %c41_104 = arith.constant 41 : index
    %1498 = vector.load %arg9[%c0_103, %c41_104] : memref<4x106xf32, #tpu.memory_space<vmem>>, vector<4x64xf32>
    %1499 = vector.extract_strided_slice %25 {offsets = [25, 0], sizes = [1, 64], strides = [1, 1]} : vector<27x64xf32> to vector<1x64xf32>
    %1500 = vector.broadcast %1499 : vector<1x64xf32> to vector<4x64xf32>
    %1501 = arith.mulf %1498, %1500 : vector<4x64xf32>
    %1502 = vector.extract_strided_slice %792 {offsets = [0, 100], sizes = [8, 1], strides = [1, 1]} : vector<8x108xf32> to vector<8x1xf32>
    %1503 = vector.extract_strided_slice %1501 {offsets = [0, 0], sizes = [1, 64], strides = [1, 1]} : vector<4x64xf32> to vector<1x64xf32>
    %1504 = vector.broadcast %1502 : vector<8x1xf32> to vector<8x64xf32>
    %1505 = vector.broadcast %1503 : vector<1x64xf32> to vector<8x64xf32>
    %1506 = arith.mulf %1504, %1505 : vector<8x64xf32>
    %1507 = arith.addf %1497, %1506 : vector<8x64xf32>
    %1508 = vector.extract_strided_slice %792 {offsets = [0, 101], sizes = [8, 1], strides = [1, 1]} : vector<8x108xf32> to vector<8x1xf32>
    %1509 = vector.extract_strided_slice %1501 {offsets = [1, 0], sizes = [1, 64], strides = [1, 1]} : vector<4x64xf32> to vector<1x64xf32>
    %1510 = vector.broadcast %1508 : vector<8x1xf32> to vector<8x64xf32>
    %1511 = vector.broadcast %1509 : vector<1x64xf32> to vector<8x64xf32>
    %1512 = arith.mulf %1510, %1511 : vector<8x64xf32>
    %1513 = arith.addf %1507, %1512 : vector<8x64xf32>
    %1514 = vector.extract_strided_slice %792 {offsets = [0, 102], sizes = [8, 1], strides = [1, 1]} : vector<8x108xf32> to vector<8x1xf32>
    %1515 = vector.extract_strided_slice %1501 {offsets = [2, 0], sizes = [1, 64], strides = [1, 1]} : vector<4x64xf32> to vector<1x64xf32>
    %1516 = vector.broadcast %1514 : vector<8x1xf32> to vector<8x64xf32>
    %1517 = vector.broadcast %1515 : vector<1x64xf32> to vector<8x64xf32>
    %1518 = arith.mulf %1516, %1517 : vector<8x64xf32>
    %1519 = arith.addf %1513, %1518 : vector<8x64xf32>
    %1520 = vector.extract_strided_slice %792 {offsets = [0, 103], sizes = [8, 1], strides = [1, 1]} : vector<8x108xf32> to vector<8x1xf32>
    %1521 = vector.extract_strided_slice %1501 {offsets = [3, 0], sizes = [1, 64], strides = [1, 1]} : vector<4x64xf32> to vector<1x64xf32>
    %1522 = vector.broadcast %1520 : vector<8x1xf32> to vector<8x64xf32>
    %1523 = vector.broadcast %1521 : vector<1x64xf32> to vector<8x64xf32>
    %1524 = arith.mulf %1522, %1523 : vector<8x64xf32>
    %1525 = arith.addf %1519, %1524 : vector<8x64xf32>
    %c0_105 = arith.constant 0 : index
    %c42_106 = arith.constant 42 : index
    %1526 = vector.load %arg9[%c0_105, %c42_106] : memref<4x106xf32, #tpu.memory_space<vmem>>, vector<4x64xf32>
    %1527 = vector.extract_strided_slice %25 {offsets = [26, 0], sizes = [1, 64], strides = [1, 1]} : vector<27x64xf32> to vector<1x64xf32>
    %1528 = vector.broadcast %1527 : vector<1x64xf32> to vector<4x64xf32>
    %1529 = arith.mulf %1526, %1528 : vector<4x64xf32>
    %1530 = vector.extract_strided_slice %792 {offsets = [0, 104], sizes = [8, 1], strides = [1, 1]} : vector<8x108xf32> to vector<8x1xf32>
    %1531 = vector.extract_strided_slice %1529 {offsets = [0, 0], sizes = [1, 64], strides = [1, 1]} : vector<4x64xf32> to vector<1x64xf32>
    %1532 = vector.broadcast %1530 : vector<8x1xf32> to vector<8x64xf32>
    %1533 = vector.broadcast %1531 : vector<1x64xf32> to vector<8x64xf32>
    %1534 = arith.mulf %1532, %1533 : vector<8x64xf32>
    %1535 = arith.addf %1525, %1534 : vector<8x64xf32>
    %1536 = vector.extract_strided_slice %792 {offsets = [0, 105], sizes = [8, 1], strides = [1, 1]} : vector<8x108xf32> to vector<8x1xf32>
    %1537 = vector.extract_strided_slice %1529 {offsets = [1, 0], sizes = [1, 64], strides = [1, 1]} : vector<4x64xf32> to vector<1x64xf32>
    %1538 = vector.broadcast %1536 : vector<8x1xf32> to vector<8x64xf32>
    %1539 = vector.broadcast %1537 : vector<1x64xf32> to vector<8x64xf32>
    %1540 = arith.mulf %1538, %1539 : vector<8x64xf32>
    %1541 = arith.addf %1535, %1540 : vector<8x64xf32>
    %1542 = vector.extract_strided_slice %792 {offsets = [0, 106], sizes = [8, 1], strides = [1, 1]} : vector<8x108xf32> to vector<8x1xf32>
    %1543 = vector.extract_strided_slice %1529 {offsets = [2, 0], sizes = [1, 64], strides = [1, 1]} : vector<4x64xf32> to vector<1x64xf32>
    %1544 = vector.broadcast %1542 : vector<8x1xf32> to vector<8x64xf32>
    %1545 = vector.broadcast %1543 : vector<1x64xf32> to vector<8x64xf32>
    %1546 = arith.mulf %1544, %1545 : vector<8x64xf32>
    %1547 = arith.addf %1541, %1546 : vector<8x64xf32>
    %1548 = vector.extract_strided_slice %792 {offsets = [0, 107], sizes = [8, 1], strides = [1, 1]} : vector<8x108xf32> to vector<8x1xf32>
    %1549 = vector.extract_strided_slice %1529 {offsets = [3, 0], sizes = [1, 64], strides = [1, 1]} : vector<4x64xf32> to vector<1x64xf32>
    %1550 = vector.broadcast %1548 : vector<8x1xf32> to vector<8x64xf32>
    %1551 = vector.broadcast %1549 : vector<1x64xf32> to vector<8x64xf32>
    %1552 = arith.mulf %1550, %1551 : vector<8x64xf32>
    %1553 = arith.addf %1547, %1552 : vector<8x64xf32>
    %1554 = vector.broadcast %793 : vector<8x1xf32> to vector<8x64xf32>
    %1555 = arith.addf %1553, %1554 : vector<8x64xf32>
    %cst_107 = arith.constant 0.000000e+00 : f32
    %1556 = vector.broadcast %cst_107 : f32 to vector<8x64xf32>
    %1557 = arith.maximumf %1555, %1556 : vector<8x64xf32>
    %c0_108 = arith.constant 0 : index
    %c0_109 = arith.constant 0 : index
    %c0_110 = arith.constant 0 : index
    %1558 = vector.load %arg7[%c0_108, %c0_109, %c0_110] : memref<1x8x64xf32, #tpu.memory_space<vmem>>, vector<1x8x64xf32>
    %1559 = vector.shape_cast %1558 : vector<1x8x64xf32> to vector<8x64xf32>
    %1560 = vector.shape_cast %1557 : vector<8x64xf32> to vector<1x8x64xf32>
    tpu.vector_store %arg7[%c0_108, %c0_109, %c0_110], %1560 {strides = array<i32>} : memref<1x8x64xf32, #tpu.memory_space<vmem>>, vector<1x8x64xf32>,
    return
  }
  func.func @transform_0(%arg0: i32) -> (i32, i32, i32, i32) {
    %c0_i32 = arith.constant 0 : i32
    %c0_i32_0 = arith.constant 0 : i32
    %c0_i32_1 = arith.constant 0 : i32
    %c0_i32_2 = arith.constant 0 : i32
    return %arg0, %c0_i32, %c0_i32_0, %c0_i32_1 : i32, i32, i32, i32
  }
  func.func @transform_1(%arg0: i32) -> (i32, i32) {
    %c0_i32 = arith.constant 0 : i32
    %c0_i32_0 = arith.constant 0 : i32
    %c0_i32_1 = arith.constant 0 : i32
    return %c0_i32, %c0_i32_0 : i32, i32
  }
  func.func @transform_2(%arg0: i32) -> (i32, i32) {
    %c0_i32 = arith.constant 0 : i32
    %c0_i32_0 = arith.constant 0 : i32
    %c0_i32_1 = arith.constant 0 : i32
    return %c0_i32, %c0_i32_0 : i32, i32
  }
  func.func @transform_3(%arg0: i32) -> (i32, i32) {
    %c0_i32 = arith.constant 0 : i32
    %c0_i32_0 = arith.constant 0 : i32
    %c0_i32_1 = arith.constant 0 : i32
    return %c0_i32, %c0_i32_0 : i32, i32
  }
  func.func @transform_4(%arg0: i32) -> (i32, i32) {
    %c0_i32 = arith.constant 0 : i32
    %c0_i32_0 = arith.constant 0 : i32
    %c0_i32_1 = arith.constant 0 : i32
    return %c0_i32, %c0_i32_0 : i32, i32
  }
  func.func @transform_5(%arg0: i32) -> (i32, i32) {
    %c0_i32 = arith.constant 0 : i32
    %c0_i32_0 = arith.constant 0 : i32
    %c0_i32_1 = arith.constant 0 : i32
    return %c0_i32, %c0_i32_0 : i32, i32
  }
  func.func @transform_6(%arg0: i32) -> (i32, i32, i32) {
    %c0_i32 = arith.constant 0 : i32
    %c0_i32_0 = arith.constant 0 : i32
    %c0_i32_1 = arith.constant 0 : i32
    return %arg0, %c0_i32, %c0_i32_0 : i32, i32, i32
  }
}

</mosaic_0001>

<bundles_post_ra>
// kernel: downsampling_forward.1
= control target key start
LH: loop header
LB: loop body
LE: loop exit
PB: predicated region body
PF: predicated region fallthrough
CT: control target
= control target key end

     0   :  { %s4226_s21 = smov 0   ;;  %s5871_s0 = inlined_call_operand.vmem [shape: f32[2,8,4,64], index: 0, kind: input, shape index: {}]   ;;  %s5872_s1 = inlined_call_operand.vmem [shape: f32[27,64], index: 1, kind: input, shape index: {}]   ;;  %s5873_s2 = inlined_call_operand.vmem [shape: f32[4,108], index: 2, kind: input, shape index: {}]   ;;  %s5874_s3 = inlined_call_operand.vmem [shape: f32[4,1], index: 3, kind: input, shape index: {}]   ;;  %s5875_s4 = inlined_call_operand.vmem [shape: f32[8,108], index: 4, kind: input, shape index: {}]   ;;  %s5876_s5 = inlined_call_operand.vmem [shape: f32[8,1], index: 5, kind: input, shape index: {}]   ;;  %s5877_s6 = inlined_call_operand.vmem [shape: f32[2,8,64], index: 6, kind: output, shape index: {}]  }
   0x1 LB: > { %s3618_s22 = sadd.s32 4294967295, %s4028_s21   ;;  %p3622_p0 = scmp.ge.s32.totalorder %s4028_s21, 1  ;;  %s4028_s21 = sphi %s4226_s21, %s16_s21  }
   0x2   : > { %p212_p1 = scmp.lt.s32.totalorder %s4028_s21, 3 }
   0x4   : > { %p213_p2 = pnand %p3622_p0, %p212_p1 }
   0x6   : > { %216 = sbr.rel (%p213_p2) target bundleno = 6524 (0x197c), region = 44 }
   0xb   : > { %v4237_v0 = vld [vmem:[%s5873_s2] sm:$0xf]  ;;  %v5916_v1 = vmov 1   ;;  %v5912_v2 = vmov 0   ;;  %v280_v3 = vlaneseq  ;;  %p241_p3 = scmp.lt.s32.totalorder %s3618_s22, 1  ;;  %v5911_v7 = vmov 2  }
   0xc   : > { %3799 = vset.pattern.permute.xlu1 %v5916_v1  ;;  %3798 = vset.pattern.permute.xlu0 %v5912_v2  ;;  %v4250_v5 = vld [vmem:[%s5872_s1] sm:$0xff]  ;;  %v5904_v8 = vmov 8   ;;  %s4034_s7 = smov 1   ;;  %v5910_v22 = vmov 3   ;;  %vm271_vm0 = vcmask 863232   ;;  %v4036_v26 = vmov 0.0  }
   0xd   : > { %297 = vperm.xlu1 %3799, %v4237_v0   ;;  %287 = vperm.xlu0 %3798, %v4237_v0   ;;  %v4243_v4 = vshrl.u32 %v280_v3, 7  ;;  %s6320_s22 = smov (!%p241_p3, %s3618_s22), 1  ;;  %272 = vst.msk [vmem:[#allocation2] sm:$0xf] %vm271_vm0, %v4036_v26  ;;  %2025 = vst.msk [vmem:[#allocation3] sm:$0xf] %vm271_vm0, %v4036_v26 }
   0xe   : > { %s3628_s27 = sshll.u32 %s6320_s22, 5  ;;  %v5893_v27 = vmov 4   ;;  %s4038_s8 = smov 21   ;;  %v5909_v28 = vmov 5   ;;  %v5900_v29 = vmov 12   ;;  %v5906_v30 = vmov 6  }
   0xf   : > { %v4253_v6 = vsub.s32 1, %v4243_v4  ;;  %s245_s30 = scalar_lea.vmem %s5871_s0, %s3628_s27  ;;  %v4277_v31 = vsub.s32 2, %v4243_v4  ;;  %v5896_v32 = vmov 16   ;;  %v5905_v33 = vmov 7   ;;  %s4045_s9 = smov 2  }
  0x10   : > { %v250_v10 = vld [vmem:[%s245_s30] sm:$0xf]  ;;  %v251_v11 = vld [vmem:[%s245_s30 + $0x4] sm:$0xf]  ;;  %v252_v12 = vld [vmem:[%s245_s30 + $0x8] sm:$0xf] }
  0x11   : > { %3800 = vset.pattern.permute.xlu1 %v5911_v7  ;;  %3806 = vset.pattern.permute.xlu0 %v5904_v8  ;;  %v329_v9 = vrot.slane %v4250_v5, %v4253_v6  ;;  %v253_v13 = vld [vmem:[%s245_s30 + $0xc] sm:$0xf]  ;;  %v254_v14 = vld [vmem:[%s245_s30 + $0x10] sm:$0xf]  ;;  %v255_v15 = vld [vmem:[%s245_s30 + $0x14] sm:$0xf]  ;;  %v258_v16 = vmax.f32 %v250_v10, %v251_v11  ;;  %v394_v34 = vrot.slane %v4250_v5, %v4277_v31 }
  0x12   : > { %307 = vperm.xlu1 %3800, %v4237_v0   ;;  %v256_v17 = vld [vmem:[%s245_s30 + $0x18] sm:$0xf]  ;;  %v257_v18 = vld [vmem:[%s245_s30 + $0x1c] sm:$0xf]  ;;  %v259_v19 = vmax.f32 %v252_v12, %v253_v13  ;;  %v260_v20 = vmax.f32 %v254_v14, %v255_v15  ;;  %v5891_v35 = vmov 20   ;;  %v5903_v36 = vmov 9  }
  0x13   : > { %331 = vrot.lane.b32.xlu0 %v329_v9, %s4034_s7  ;;  %v261_v21 = vmax.f32 %v256_v17, %v257_v18  ;;  %v5887_v37 = vmov 24   ;;  %v5902_v38 = vmov 10   ;;  %v5882_v39 = vmov 28   ;;  %s4051_s10 = smov 4   ;;  %s4055_s11 = smov 5  }
  0x14   : > { %v262_v23 = vmax.f32 %v258_v16, %v259_v19  ;;  %v4296_v40 = vsub.s32 3, %v4243_v4  ;;  %v5901_v41 = vmov 11   ;;  %v5899_v43 = vmov 13   ;;  %s4059_s12 = smov 6   ;;  %s4063_s13 = smov 8  }
  0x15   : > { %v263_v24 = vmax.f32 %v260_v20, %v261_v21  ;;  %v5898_v44 = vmov 14   ;;  %v4307_v45 = vsub.s32 4, %v4243_v4  ;;  %v5897_v46 = vmov 15   ;;  %s4067_s14 = smov 9   ;;  %s4071_s15 = smov 127  }
  0x16   : > { %3801 = vset.pattern.permute.xlu1 %v5910_v22  ;;  %v459_v42 = vrot.slane %v4250_v5, %v4296_v40  ;;  %v5895_v48 = vmov 17   ;;  %v5894_v49 = vmov 18   ;;  %v4318_v50 = vsub.s32 5, %v4243_v4  ;;  %s4072_s16 = smov 126   ;;  %s4073_s17 = smov 124  }
  0x17   : > { %317 = vperm.xlu1 %3801, %v4237_v0   ;;  %v264_v25 = vmax.f32 %v262_v23, %v263_v24  ;;  %v524_v47 = vrot.slane %v4250_v5, %v4307_v45  ;;  %v5892_v51 = vmov 19   ;;  %v5890_v53 = vmov 21   ;;  %s4074_s18 = smov 123   ;;  %s4075_s19 = smov 122  }
  0x18   : > { %v589_v52 = vrot.slane %v4250_v5, %v4318_v50  ;;  %v5889_v54 = vmov 22   ;;  %v4329_v55 = vsub.s32 6, %v4243_v4  ;;  %v5888_v56 = vmov 23   ;;  %s4076_s20 = smov 120   ;;  %s4077_s23 = smov 119  }
  0x19   : > { %274 = vrot.lane.b32.xlu0 %v264_v25, %s4038_s8  ;;  %v5886_v58 = vmov 25   ;;  %v5884_v59 = vmov 26   ;;  %v4340_v60 = vsub.s32 7, %v4243_v4  ;;  %v5883_v61 = vmov 27   ;;  %s4079_s26 = smov 10   ;;  %s4081_s27 = smov 118  }
  0x1a   : > { %v654_v57 = vrot.slane %v4250_v5, %v4329_v55  ;;  %v5881_v9 = vmov 29   ;;  %vm277_vm1 = vcmask 691368   ;;  %v5878_v14 = vmov 31   ;;  %s4085_s28 = smov 16   ;;  %s4087_s29 = smov 112  }
  0x1b   : > { %3802 = vset.pattern.permute.xlu1 %v5893_v27  ;;  %v719_v62 = vrot.slane %v4250_v5, %v4340_v60  ;;  %v5879_v5 = vmov 30   ;;  %v4367_v18 = vsub.s32 0, %v4243_v4  ;;  %v5908_v8 = vmov 35   ;;  %s4091_s30 = smov 17   ;;  %s4093_s7 = smov 111  }
  0x1c   : > { %336 = vperm.xlu1 %3802, %v4237_v0   ;;  %v5923_v1 = vmov 40   ;;  %s4110_s24 = smov 107   ;;  %s4114_s25 = smov 22   ;;  %vm3563_vm2 = vcmask 523264  }
  0x1d   : > { %401 = vperm.xlu0 %3806, %v4237_v0   ;;  %6034 = vst [vmem:[#allocation5_spill] sm:$0xff] %v4367_v18 }
  0x20   : > { %3803 = vset.pattern.permute.xlu1 %v5909_v28 }
  0x21   : > { %350 = vperm.xlu1 %3803, %v4237_v0   ;;  %3810 = vset.pattern.permute.xlu0 %v5900_v29 }
  0x22   : > { %466 = vperm.xlu0 %3810, %v4237_v0  }
  0x25   : > { %3804 = vset.pattern.permute.xlu1 %v5906_v30  ;;  %v5914_v30 = vmov 36  }
  0x26   : > { %364 = vperm.xlu1 %3804, %v4237_v0   ;;  %3814 = vset.pattern.permute.xlu0 %v5896_v32 }
  0x27   : > { %531 = vperm.xlu0 %3814, %v4237_v0  }
  0x2a   : > { %3805 = vset.pattern.permute.xlu1 %v5905_v33 }
  0x2b   : > { %378 = vperm.xlu1 %3805, %v4237_v0   ;;  %3818 = vset.pattern.permute.xlu0 %v5891_v35 }
  0x2c   : > { %596 = vperm.xlu0 %3818, %v4237_v0  }
  0x2f   : > { %396 = vrot.lane.b32.xlu1 %v394_v34, %s4045_s9  ;;  %s4097_s9 = smov 18  }
  0x30   : > { %3807 = vset.pattern.permute.xlu1 %v5903_v36  ;;  %3822 = vset.pattern.permute.xlu0 %v5887_v37  ;;  %v5907_v36 = vmov 34  }
  0x31   : > { %661 = vperm.xlu0 %3822, %v4237_v0  }
  0x33   : > { %415 = vperm.xlu1 %3807, %v4237_v0  }
  0x35   : > { %3826 = vset.pattern.permute.xlu0 %v5882_v39 }
  0x36   : > { %726 = vperm.xlu0 %3826, %v4237_v0  }
  0x37   : > { %3808 = vset.pattern.permute.xlu1 %v5902_v38 }
  0x38   : > { %429 = vperm.xlu1 %3808, %v4237_v0  }
  0x3c   : > { %3809 = vset.pattern.permute.xlu1 %v5901_v41 }
  0x3d   : > { %443 = vperm.xlu1 %3809, %v4237_v0  }
  0x41   : > { %461 = vrot.lane.b32.xlu1 %v459_v42, %s4051_s10  ;;  %s4099_s10 = smov 110  }
  0x42   : > { %3811 = vset.pattern.permute.xlu1 %v5899_v43 }
  0x45   : > { %480 = vperm.xlu1 %3811, %v4237_v0  }
  0x49   : > { %3812 = vset.pattern.permute.xlu1 %v5898_v44 }
  0x4a   : > { %494 = vperm.xlu1 %3812, %v4237_v0  }
  0x4e   : > { %3813 = vset.pattern.permute.xlu1 %v5897_v46 }
  0x4f   : > { %508 = vperm.xlu1 %3813, %v4237_v0  }
  0x53   : > { %526 = vrot.lane.b32.xlu1 %v524_v47, %s4055_s11  ;;  %s4103_s11 = smov 20  }
  0x54   : > { %3815 = vset.pattern.permute.xlu1 %v5895_v48 }
  0x57   : > { %545 = vperm.xlu1 %3815, %v4237_v0  }
  0x5b   : > { %3816 = vset.pattern.permute.xlu1 %v5894_v49 }
  0x5c   : > { %559 = vperm.xlu1 %3816, %v4237_v0  }
  0x60   : > { %3817 = vset.pattern.permute.xlu1 %v5892_v51 }
  0x61   : > { %573 = vperm.xlu1 %3817, %v4237_v0  }
  0x65   : > { %591 = vrot.lane.b32.xlu1 %v589_v52, %s4059_s12  ;;  %s4105_s12 = smov 108  }
  0x66   : > { %3819 = vset.pattern.permute.xlu1 %v5890_v53 }
  0x69   : > { %610 = vperm.xlu1 %3819, %v4237_v0  }
  0x6d   : > { %3820 = vset.pattern.permute.xlu1 %v5889_v54 }
  0x6e   : > { %624 = vperm.xlu1 %3820, %v4237_v0  }
  0x72   : > { %3821 = vset.pattern.permute.xlu1 %v5888_v56 }
  0x73   : > { %638 = vperm.xlu1 %3821, %v4237_v0  }
  0x77   : > { %656 = vrot.lane.b32.xlu1 %v654_v57, %s4063_s13  ;;  %s4126_s13 = smov 25  }
  0x78   : > { %3823 = vset.pattern.permute.xlu1 %v5886_v58 }
  0x7b   : > { %675 = vperm.xlu1 %3823, %v4237_v0  }
  0x7f   : > { %3824 = vset.pattern.permute.xlu1 %v5884_v59 }
  0x80   : > { %689 = vperm.xlu1 %3824, %v4237_v0  }
  0x84   : > { %3825 = vset.pattern.permute.xlu1 %v5883_v61 }
  0x85   : > { %703 = vperm.xlu1 %3825, %v4237_v0  }
  0x88   : > { %v4346_v63 = vpop.permute.xlu1 %297  ;;  %v4348_v3 = vpop.permute.xlu0 %287 }
  0x89   : > { %721 = vrot.lane.b32.xlu1 %v719_v62, %s4067_s14  ;;  %s4128_s14 = smov 103  }
  0x8a   : > { %3827 = vset.pattern.permute.xlu1 %v5881_v9 }
  0x8c   : > { %v4351_v10 = vpop.permute.xlu0 %331 }
  0x8d   : > { %6033 = vst [vmem:[#allocation4_spill] sm:$0xff] %v4351_v10  ;;  %v4353_v11 = vpop.permute.xlu1 %307  ;;  %740 = vperm.xlu1 %3827, %v4237_v0  }
  0x90   : > { %v275_v12 = vpop.permute.xlu0 %274 }
  0x91   : > { %278 = vst.msk [vmem:[#allocation2] sm:$0xf] %vm277_vm1, %v275_v12  ;;  %3828 = vset.pattern.permute.xlu1 %v5879_v5 }
  0x92   : > { %v4358_v13 = vpop.permute.xlu1 %317  ;;  %754 = vperm.xlu1 %3828, %v4237_v0  }
  0x96   : > { %3829 = vset.pattern.permute.xlu1 %v5878_v14 }
  0x97   : > { %v337_v15 = vpop.permute.xlu1 %336 }
  0x98   : > { %v4362_v16 = vld [vmem:[#allocation2] sm:$0xf]  ;;  %v402_v62 = vpop.permute.xlu0 %401 }
  0x99   : > { %v334_v17 = vmul.f32 %v4351_v10, %v4362_v16 }
  0x9b   : > { %v342_v19 = vrot.slane %v334_v17, %v4367_v18  ;;  %v356_v23 = vrot.slane %v334_v17, %v4253_v6  ;;  %v370_v26 = vrot.slane %v334_v17, %v4277_v31  ;;  %v384_v4 = vrot.slane %v334_v17, %v4296_v40 }
  0x9c   : > { %v351_v20 = vpop.permute.xlu1 %350 }
  0x9d   : > { %v343_v21 = vmul.f32 %v342_v19, %v337_v15  ;;  %v357_v25 = vmul.f32 %v356_v23, %v351_v20 }
  0x9f   : > { %345 = vrot.lane.b32.xlu0 %v343_v21, %s4071_s15 }
  0xa1   : > { %v365_v24 = vpop.permute.xlu1 %364 }
  0xa2   : > { %v371_v34 = vmul.f32 %v370_v26, %v365_v24 }
  0xa3   : > { %359 = vrot.lane.b32.xlu0 %v357_v25, %s4071_s15 }
  0xa6   : > { %v379_v42 = vpop.permute.xlu1 %378 }
  0xa7   : > { %373 = vrot.lane.b32.xlu0 %v371_v34, %s4071_s15  ;;  %v385_v47 = vmul.f32 %v384_v4, %v379_v42 }
  0xaa   : > { %v4376_v52 = vpop.permute.xlu1 %396 }
  0xab   : > { %6035 = vst [vmem:[#allocation6_spill] sm:$0xff] %v4376_v52  ;;  %v399_v57 = vmul.f32 %v4376_v52, %v4362_v16  ;;  %387 = vrot.lane.b32.xlu0 %v385_v47, %s4071_s15  ;;  %v467_v47 = vpop.permute.xlu0 %466 }
  0xad   : > { %v421_v12 = vrot.slane %v399_v57, %v4253_v6  ;;  %v407_v15 = vrot.slane %v399_v57, %v4367_v18  ;;  %v435_v17 = vrot.slane %v399_v57, %v4277_v31  ;;  %v449_v25 = vrot.slane %v399_v57, %v4296_v40 }
  0xae   : > { %v416_v19 = vpop.permute.xlu1 %415 }
  0xaf   : > { %v422_v20 = vmul.f32 %v421_v12, %v416_v19  ;;  %v408_v21 = vmul.f32 %v407_v15, %v402_v62 }
  0xb1   : > { %424 = vrot.lane.b32.xlu0 %v422_v20, %s4072_s16  ;;  %410 = vrot.lane.b32.xlu1 %v408_v21, %s4072_s16 }
  0xb3   : > { %v430_v23 = vpop.permute.xlu1 %429 }
  0xb4   : > { %v436_v24 = vmul.f32 %v435_v17, %v430_v23 }
  0xb6   : > { %438 = vrot.lane.b32.xlu0 %v436_v24, %s4072_s16 }
  0xb8   : > { %v444_v26 = vpop.permute.xlu1 %443 }
  0xb9   : > { %v450_v34 = vmul.f32 %v449_v25, %v444_v26 }
  0xbb   : > { %452 = vrot.lane.b32.xlu0 %v450_v34, %s4072_s16 }
  0xbc   : > { %v4389_v42 = vpop.permute.xlu1 %461 }
  0xbd   : > { %6036 = vst [vmem:[#allocation7_spill] sm:$0xff] %v4389_v42  ;;  %v464_v4 = vmul.f32 %v4389_v42, %v4362_v16 }
  0xbf   : > { %v486_v62 = vrot.slane %v464_v4, %v4253_v6  ;;  %v472_v12 = vrot.slane %v464_v4, %v4367_v18  ;;  %v500_v57 = vrot.slane %v464_v4, %v4277_v31  ;;  %v514_v23 = vrot.slane %v464_v4, %v4296_v40 }
  0xc0   : > { %v481_v15 = vpop.permute.xlu1 %480 }
  0xc1   : > { %v487_v19 = vmul.f32 %v486_v62, %v481_v15  ;;  %v473_v20 = vmul.f32 %v472_v12, %v467_v47  ;;  %v532_v47 = vpop.permute.xlu0 %531 }
  0xc3   : > { %489 = vrot.lane.b32.xlu0 %v487_v19, %s4073_s17  ;;  %475 = vrot.lane.b32.xlu1 %v473_v20, %s4073_s17 }
  0xc5   : > { %v495_v21 = vpop.permute.xlu1 %494 }
  0xc6   : > { %v501_v17 = vmul.f32 %v500_v57, %v495_v21 }
  0xc8   : > { %503 = vrot.lane.b32.xlu0 %v501_v17, %s4073_s17 }
  0xca   : > { %v509_v24 = vpop.permute.xlu1 %508 }
  0xcb   : > { %v515_v25 = vmul.f32 %v514_v23, %v509_v24 }
  0xcd   : > { %517 = vrot.lane.b32.xlu0 %v515_v25, %s4073_s17 }
  0xce   : > { %v4401_v26 = vpop.permute.xlu1 %526 }
  0xcf   : > { %6037 = vst [vmem:[#allocation8_spill] sm:$0xff] %v4401_v26  ;;  %v529_v34 = vmul.f32 %v4401_v26, %v4362_v16 }
  0xd1   : > { %v551_v62 = vrot.slane %v529_v34, %v4253_v6  ;;  %v537_v12 = vrot.slane %v529_v34, %v4367_v18  ;;  %v565_v4 = vrot.slane %v529_v34, %v4277_v31  ;;  %v579_v17 = vrot.slane %v529_v34, %v4296_v40 }
  0xd2   : > { %v546_v15 = vpop.permute.xlu1 %545 }
  0xd3   : > { %v552_v19 = vmul.f32 %v551_v62, %v546_v15  ;;  %v538_v20 = vmul.f32 %v537_v12, %v532_v47  ;;  %v597_v62 = vpop.permute.xlu0 %596 }
  0xd5   : > { %554 = vrot.lane.b32.xlu0 %v552_v19, %s4074_s18  ;;  %540 = vrot.lane.b32.xlu1 %v538_v20, %s4074_s18 }
  0xd7   : > { %v560_v57 = vpop.permute.xlu1 %559 }
  0xd8   : > { %v566_v21 = vmul.f32 %v565_v4, %v560_v57 }
  0xda   : > { %568 = vrot.lane.b32.xlu0 %v566_v21, %s4074_s18 }
  0xdc   : > { %v574_v23 = vpop.permute.xlu1 %573 }
  0xdd   : > { %v580_v24 = vmul.f32 %v579_v17, %v574_v23 }
  0xdf   : > { %582 = vrot.lane.b32.xlu0 %v580_v24, %s4074_s18 }
  0xe0   : > { %v4413_v25 = vpop.permute.xlu1 %591 }
  0xe1   : > { %6038 = vst [vmem:[#allocation9_spill] sm:$0xff] %v4413_v25  ;;  %v594_v47 = vmul.f32 %v4413_v25, %v4362_v16 }
  0xe3   : > { %v616_v12 = vrot.slane %v594_v47, %v4253_v6  ;;  %v602_v15 = vrot.slane %v594_v47, %v4367_v18  ;;  %v630_v34 = vrot.slane %v594_v47, %v4277_v31  ;;  %v644_v17 = vrot.slane %v594_v47, %v4296_v40 }
  0xe4   : > { %v611_v19 = vpop.permute.xlu1 %610 }
  0xe5   : > { %v617_v20 = vmul.f32 %v616_v12, %v611_v19  ;;  %v603_v4 = vmul.f32 %v602_v15, %v597_v62  ;;  %v662_v12 = vpop.permute.xlu0 %661 }
  0xe7   : > { %619 = vrot.lane.b32.xlu0 %v617_v20, %s4075_s19  ;;  %605 = vrot.lane.b32.xlu1 %v603_v4, %s4075_s19 }
  0xe9   : > { %v625_v57 = vpop.permute.xlu1 %624 }
  0xea   : > { %v631_v21 = vmul.f32 %v630_v34, %v625_v57 }
  0xec   : > { %633 = vrot.lane.b32.xlu0 %v631_v21, %s4075_s19 }
  0xee   : > { %v639_v23 = vpop.permute.xlu1 %638 }
  0xef   : > { %v645_v24 = vmul.f32 %v644_v17, %v639_v23 }
  0xf1   : > { %647 = vrot.lane.b32.xlu0 %v645_v24, %s4075_s19 }
  0xf2   : > { %v4425_v14 = vpop.permute.xlu1 %656 }
  0xf3   : > { %6039 = vst [vmem:[#allocation10_spill] sm:$0xff] %v4425_v14  ;;  %v659_v62 = vmul.f32 %v4425_v14, %v4362_v16 }
  0xf5   : > { %v681_v15 = vrot.slane %v659_v62, %v4253_v6  ;;  %v667_v19 = vrot.slane %v659_v62, %v4367_v18  ;;  %v695_v47 = vrot.slane %v659_v62, %v4277_v31  ;;  %v709_v17 = vrot.slane %v659_v62, %v4296_v40 }
  0xf6   : > { %v676_v20 = vpop.permute.xlu1 %675 }
  0xf7   : > { %v682_v4 = vmul.f32 %v681_v15, %v676_v20  ;;  %v668_v34 = vmul.f32 %v667_v19, %v662_v12  ;;  %v727_v15 = vpop.permute.xlu0 %726 }
  0xf9   : > { %684 = vrot.lane.b32.xlu0 %v682_v4, %s4076_s20  ;;  %670 = vrot.lane.b32.xlu1 %v668_v34, %s4076_s20 }
  0xfb   : > { %v690_v57 = vpop.permute.xlu1 %689 }
  0xfc   : > { %v696_v21 = vmul.f32 %v695_v47, %v690_v57  ;;  %v4449_v57 = vld [vmem:[%s5872_s1 + $0x8] sm:$0xff] }
  0xfd   : > { %v849_v33 = vrot.slane %v4449_v57, %v4253_v6 }
  0xfe   : > { %698 = vrot.lane.b32.xlu0 %v696_v21, %s4076_s20 }
 0x100   : > { %v704_v23 = vpop.permute.xlu1 %703 }
 0x101   : > { %v710_v24 = vmul.f32 %v709_v17, %v704_v23  ;;  %v784_v23 = vrot.slane %v4449_v57, %v4367_v18 }
 0x103   : > { %712 = vrot.lane.b32.xlu0 %v710_v24, %s4076_s20  ;;  %v5880_v24 = vmov 32  }
 0x104   : > { %v4437_v5 = vpop.permute.xlu1 %721  ;;  %3830 = vset.pattern.permute.xlu0 %v5880_v24  ;;  %v5885_v24 = vmov 33  }
 0x105   : > { %6040 = vst [vmem:[#allocation11_spill] sm:$0xff] %v4437_v5  ;;  %v724_v12 = vmul.f32 %v4437_v5, %v4362_v16 }
 0x107   : > { %v746_v19 = vrot.slane %v724_v12, %v4253_v6  ;;  %v732_v20 = vrot.slane %v724_v12, %v4367_v18  ;;  %v760_v62 = vrot.slane %v724_v12, %v4277_v31 }
 0x108   : > { %v741_v4 = vpop.permute.xlu1 %740 }
 0x109   : > { %v747_v34 = vmul.f32 %v746_v19, %v741_v4  ;;  %v733_v47 = vmul.f32 %v732_v20, %v727_v15 }
 0x10b   : > { %749 = vrot.lane.b32.xlu0 %v747_v34, %s4077_s23  ;;  %735 = vrot.lane.b32.xlu1 %v733_v47, %s4077_s23 }
 0x10d   : > { %v755_v21 = vpop.permute.xlu1 %754 }
 0x10e   : > { %v761_v17 = vmul.f32 %v760_v62, %v755_v21  ;;  %v774_v62 = vrot.slane %v724_v12, %v4296_v40 }
 0x10f   : > { %768 = vperm.xlu1 %3829, %v4237_v0  }
 0x110   : > { %763 = vrot.lane.b32.xlu0 %v761_v17, %s4077_s23 }
 0x113   : > { %786 = vrot.lane.b32.xlu1 %v784_v23, %s4079_s26  ;;  %v4472_v23 = vpop.permute.xlu0 %345  ;;  %s4116_s26 = smov 106  }
 0x114   : > { %3831 = vset.pattern.permute.xlu1 %v5885_v24 }
 0x117   : > { %v4474_v9 = vpop.permute.xlu0 %359 }
 0x11b   : > { %v4476_v39 = vpop.permute.xlu0 %373 }
 0x11f   : > { %v4478_v61 = vpop.permute.xlu0 %387 }
 0x123   : > { %v4456_v15 = vpop.permute.xlu1 %410  ;;  %v4480_v59 = vpop.permute.xlu0 %424 }
 0x128   : > { %v4482_v12 = vpop.permute.xlu0 %438 }
 0x135   : > { %v4458_v19 = vpop.permute.xlu1 %475 }
 0x147   : > { %v4460_v20 = vpop.permute.xlu1 %540 }
 0x159   : > { %v4462_v4 = vpop.permute.xlu1 %605 }
 0x16b   : > { %v4464_v34 = vpop.permute.xlu1 %670 }
 0x17d   : > { %v4466_v47 = vpop.permute.xlu1 %735 }
 0x18a   : > { %v769_v21 = vpop.permute.xlu1 %768 }
 0x18b   : > { %v775_v17 = vmul.f32 %v774_v62, %v769_v21  ;;  %v4484_v62 = vpop.permute.xlu0 %452 }
 0x18d   : > { %777 = vrot.lane.b32.xlu0 %v775_v17, %s4077_s23 }
 0x18e   : > { %v4514_v46 = vpop.permute.xlu1 %786 }
 0x18f   : > { %v4486_v21 = vpop.permute.xlu0 %489  ;;  %6041 = vst [vmem:[#allocation12_spill] sm:$0xff] %v4514_v46  ;;  %v789_v44 = vmul.f32 %v4514_v46, %v4362_v16 }
 0x191   : > { %791 = vperm.xlu0 %3830, %v4237_v0   ;;  %v797_v29 = vrot.slane %v789_v44, %v4367_v18  ;;  %v839_v7 = vrot.slane %v789_v44, %v4296_v40 }
 0x193   : > { %v4488_v17 = vpop.permute.xlu0 %503 }
 0x195   : > { %3834 = vset.pattern.permute.xlu0 %v5914_v30 }
 0x197   : > { %v4490_v24 = vpop.permute.xlu0 %517 }
 0x19b   : > { %v4492_v58 = vpop.permute.xlu0 %554 }
 0x19f   : > { %v4494_v37 = vpop.permute.xlu0 %568 }
 0x1a3   : > { %v4496_v56 = vpop.permute.xlu0 %582 }
 0x1a7   : > { %v4498_v54 = vpop.permute.xlu0 %619 }
 0x1ab   : > { %v4500_v53 = vpop.permute.xlu0 %633 }
 0x1af   : > { %v4502_v35 = vpop.permute.xlu0 %647 }
 0x1b3   : > { %v4504_v51 = vpop.permute.xlu0 %684 }
 0x1b7   : > { %v4506_v27 = vpop.permute.xlu0 %698 }
 0x1bb   : > { %v4508_v49 = vpop.permute.xlu0 %712 }
 0x1bf   : > { %v4510_v48 = vpop.permute.xlu0 %749 }
 0x1c3   : > { %v4512_v32 = vpop.permute.xlu0 %763 }
 0x1ff   : > { %v4518_v43 = vpop.permute.xlu0 %777 }
 0x20c   : > { %v792_v41 = vpop.permute.xlu0 %791 }
 0x20d   : > { %v798_v38 = vmul.f32 %v797_v29, %v792_v41 }
 0x20f   : > { %800 = vrot.lane.b32.xlu1 %v798_v38, %s4081_s27  ;;  %v811_v38 = vrot.slane %v789_v44, %v4253_v6 }
 0x213   : > { %805 = vperm.xlu1 %3831, %v4237_v0  }
 0x217   : > { %3832 = vset.pattern.permute.xlu1 %v5907_v36 }
 0x218   : > { %819 = vperm.xlu1 %3832, %v4237_v0  }
 0x21c   : > { %3833 = vset.pattern.permute.xlu1 %v5908_v8  ;;  %v825_v8 = vrot.slane %v789_v44, %v4277_v31  ;;  %v5918_v44 = vmov 39  }
 0x21d   : > { %833 = vperm.xlu1 %3833, %v4237_v0  }
 0x221   : > { %851 = vrot.lane.b32.xlu1 %v849_v33, %s4085_s28  ;;  %v5915_v33 = vmov 37   ;;  %s4120_s28 = smov 24  }
 0x222   : > { %3835 = vset.pattern.permute.xlu1 %v5915_v33  ;;  %v914_v33 = vrot.slane %v4449_v57, %v4277_v31 }
 0x281   : > { %v4530_v29 = vpop.permute.xlu1 %800 }
 0x28e   : > { %v806_v41 = vpop.permute.xlu1 %805 }
 0x28f   : > { %v812_v36 = vmul.f32 %v811_v38, %v806_v41 }
 0x291   : > { %814 = vrot.lane.b32.xlu0 %v812_v36, %s4081_s27 }
 0x293   : > { %v820_v28 = vpop.permute.xlu1 %819 }
 0x294   : > { %v826_v22 = vmul.f32 %v825_v8, %v820_v28 }
 0x296   : > { %828 = vrot.lane.b32.xlu0 %v826_v22, %s4081_s27 }
 0x298   : > { %v834_v2 = vpop.permute.xlu1 %833 }
 0x299   : > { %v840_v30 = vmul.f32 %v839_v7, %v834_v2 }
 0x29b   : > { %842 = vrot.lane.b32.xlu0 %v840_v30, %s4081_s27  ;;  %v5917_v30 = vmov 38  }
 0x29c   : > { %v4544_v41 = vpop.permute.xlu1 %851 }
 0x29d   : > { %6042 = vst [vmem:[#allocation13_spill] sm:$0xff] %v4544_v41  ;;  %v854_v8 = vmul.f32 %v4544_v41, %v4362_v16 }
 0x29f   : > { %856 = vperm.xlu0 %3834, %v4237_v0   ;;  %v862_v2 = vrot.slane %v854_v8, %v4367_v18  ;;  %v904_v5 = vrot.slane %v854_v8, %v4296_v40 }
 0x2a3   : > { %3838 = vset.pattern.permute.xlu0 %v5923_v1 }
 0x303   : > { %v4540_v38 = vpop.permute.xlu0 %814 }
 0x308   : > { %v4542_v36 = vpop.permute.xlu0 %828 }
 0x30d   : > { %v4548_v22 = vpop.permute.xlu0 %842 }
 0x31a   : > { %v857_v7 = vpop.permute.xlu0 %856 }
 0x31b   : > { %v863_v28 = vmul.f32 %v862_v2, %v857_v7  ;;  %v876_v7 = vrot.slane %v854_v8, %v4253_v6 }
 0x31d   : > { %865 = vrot.lane.b32.xlu1 %v863_v28, %s4087_s29 }
 0x321   : > { %870 = vperm.xlu1 %3835, %v4237_v0  }
 0x325   : > { %3836 = vset.pattern.permute.xlu1 %v5917_v30 }
 0x326   : > { %884 = vperm.xlu1 %3836, %v4237_v0  }
 0x32a   : > { %3837 = vset.pattern.permute.xlu1 %v5918_v44  ;;  %v890_v44 = vrot.slane %v854_v8, %v4277_v31  ;;  %v5926_v8 = vmov 42  }
 0x32b   : > { %898 = vperm.xlu1 %3837, %v4237_v0  }
 0x32f   : > { %916 = vrot.lane.b32.xlu1 %v914_v33, %s4091_s30  ;;  %v5924_v33 = vmov 41   ;;  %s4122_s30 = smov 104  }
 0x330   : > { %3839 = vset.pattern.permute.xlu1 %v5924_v33  ;;  %v979_v33 = vrot.slane %v4449_v57, %v4296_v40 }
 0x38f   : > { %v4560_v2 = vpop.permute.xlu1 %865 }
 0x39c   : > { %v871_v28 = vpop.permute.xlu1 %870 }
 0x39d   : > { %v877_v30 = vmul.f32 %v876_v7, %v871_v28 }
 0x39f   : > { %879 = vrot.lane.b32.xlu0 %v877_v30, %s4087_s29 }
 0x3a1   : > { %v885_v41 = vpop.permute.xlu1 %884 }
 0x3a2   : > { %v891_v46 = vmul.f32 %v890_v44, %v885_v41  ;;  %v5927_v44 = vmov 43  }
 0x3a4   : > { %893 = vrot.lane.b32.xlu0 %v891_v46, %s4087_s29 }
 0x3a6   : > { %v899_v14 = vpop.permute.xlu1 %898 }
 0x3a7   : > { %v905_v1 = vmul.f32 %v904_v5, %v899_v14 }
 0x3a9   : > { %907 = vrot.lane.b32.xlu0 %v905_v1, %s4087_s29 }
 0x3aa   : > { %v4574_v28 = vpop.permute.xlu1 %916 }
 0x3ab   : > { %6043 = vst [vmem:[#allocation14_spill] sm:$0xff] %v4574_v28  ;;  %v919_v46 = vmul.f32 %v4574_v28, %v4362_v16  ;;  %v5932_v28 = vmov 44  }
 0x3ad   : > { %921 = vperm.xlu0 %3838, %v4237_v0   ;;  %v927_v5 = vrot.slane %v919_v46, %v4367_v18  ;;  %v969_v42 = vrot.slane %v919_v46, %v4296_v40 }
 0x3b1   : > { %3842 = vset.pattern.permute.xlu0 %v5932_v28 }
 0x411   : > { %v4570_v7 = vpop.permute.xlu0 %879 }
 0x416   : > { %v4572_v30 = vpop.permute.xlu0 %893 }
 0x41b   : > { %v4578_v41 = vpop.permute.xlu0 %907 }
 0x428   : > { %v922_v14 = vpop.permute.xlu0 %921 }
 0x429   : > { %v928_v1 = vmul.f32 %v927_v5, %v922_v14  ;;  %v941_v14 = vrot.slane %v919_v46, %v4253_v6 }
 0x42b   : > { %930 = vrot.lane.b32.xlu1 %v928_v1, %s4093_s7 }
 0x42f   : > { %935 = vperm.xlu1 %3839, %v4237_v0  }
 0x433   : > { %3840 = vset.pattern.permute.xlu1 %v5926_v8 }
 0x434   : > { %949 = vperm.xlu1 %3840, %v4237_v0  }
 0x438   : > { %3841 = vset.pattern.permute.xlu1 %v5927_v44  ;;  %v955_v44 = vrot.slane %v919_v46, %v4277_v31  ;;  %v5935_v46 = vmov 46  }
 0x439   : > { %963 = vperm.xlu1 %3841, %v4237_v0  }
 0x43d   : > { %981 = vrot.lane.b32.xlu1 %v979_v33, %s4097_s9  ;;  %v5933_v33 = vmov 45   ;;  %s4138_s9 = smov 32  }
 0x43e   : > { %3843 = vset.pattern.permute.xlu1 %v5933_v33  ;;  %v1044_v33 = vrot.slane %v4449_v57, %v4307_v45 }
 0x49d   : > { %v4590_v5 = vpop.permute.xlu1 %930 }
 0x4aa   : > { %v936_v1 = vpop.permute.xlu1 %935 }
 0x4ab   : > { %v942_v8 = vmul.f32 %v941_v14, %v936_v1 }
 0x4ad   : > { %944 = vrot.lane.b32.xlu0 %v942_v8, %s4093_s7 }
 0x4af   : > { %v950_v25 = vpop.permute.xlu1 %949 }
 0x4b0   : > { %v956_v26 = vmul.f32 %v955_v44, %v950_v25  ;;  %v5936_v44 = vmov 47  }
 0x4b2   : > { %958 = vrot.lane.b32.xlu0 %v956_v26, %s4093_s7 }
 0x4b4   : > { %v964_v52 = vpop.permute.xlu1 %963 }
 0x4b5   : > { %v970_v28 = vmul.f32 %v969_v42, %v964_v52 }
 0x4b7   : > { %972 = vrot.lane.b32.xlu0 %v970_v28, %s4093_s7 }
 0x4b8   : > { %v4604_v1 = vpop.permute.xlu1 %981 }
 0x4b9   : > { %6046 = vst [vmem:[#allocation17_spill] sm:$0xff] %v4604_v1  ;;  %v984_v26 = vmul.f32 %v4604_v1, %v4362_v16  ;;  %v5938_v1 = vmov 48  }
 0x4bb   : > { %986 = vperm.xlu0 %3842, %v4237_v0   ;;  %v992_v52 = vrot.slane %v984_v26, %v4367_v18 }
 0x4bf   : > { %3846 = vset.pattern.permute.xlu0 %v5938_v1 }
 0x51f   : > { %v4600_v14 = vpop.permute.xlu0 %944 }
 0x520   : > { %6044 = vst [vmem:[#allocation15_spill] sm:$0xff] %v4600_v14 }
 0x524   : > { %v4602_v8 = vpop.permute.xlu0 %958 }
 0x525   : > { %6045 = vst [vmem:[#allocation16_spill] sm:$0xff] %v4602_v8  ;;  %v1034_v8 = vrot.slane %v984_v26, %v4296_v40 }
 0x529   : > { %v4608_v25 = vpop.permute.xlu0 %972 }
 0x52a   : > { %6047 = vst [vmem:[#allocation18_spill] sm:$0xff] %v4608_v25 }
 0x536   : > { %v987_v42 = vpop.permute.xlu0 %986 }
 0x537   : > { %v993_v28 = vmul.f32 %v992_v52, %v987_v42  ;;  %v1006_v42 = vrot.slane %v984_v26, %v4253_v6 }
 0x539   : > { %995 = vrot.lane.b32.xlu1 %v993_v28, %s4099_s10 }
 0x53d   : > { %1000 = vperm.xlu1 %3843, %v4237_v0  }
 0x541   : > { %3844 = vset.pattern.permute.xlu1 %v5935_v46 }
 0x542   : > { %1014 = vperm.xlu1 %3844, %v4237_v0  }
 0x546   : > { %3845 = vset.pattern.permute.xlu1 %v5936_v44  ;;  %v1020_v44 = vrot.slane %v984_v26, %v4277_v31  ;;  %v5941_v26 = vmov 50  }
 0x547   : > { %1028 = vperm.xlu1 %3845, %v4237_v0  }
 0x54b   : > { %1046 = vrot.lane.b32.xlu1 %v1044_v33, %s4103_s11  ;;  %v5939_v33 = vmov 49   ;;  %s6003_s11 = smov 96  }
 0x54c   : > { %3847 = vset.pattern.permute.xlu1 %v5939_v33  ;;  %v1109_v33 = vrot.slane %v4449_v57, %v4318_v50 }
 0x5ab   : > { %v4620_v52 = vpop.permute.xlu1 %995 }
 0x5ac   : > { %6048 = vst [vmem:[#allocation19_spill] sm:$0xff] %v4620_v52 }
 0x5b8   : > { %v1001_v28 = vpop.permute.xlu1 %1000 }
 0x5b9   : > { %v1007_v46 = vmul.f32 %v1006_v42, %v1001_v28 }
 0x5bb   : > { %1009 = vrot.lane.b32.xlu0 %v1007_v46, %s4099_s10 }
 0x5bd   : > { %v1015_v10 = vpop.permute.xlu1 %1014 }
 0x5be   : > { %v1021_v25 = vmul.f32 %v1020_v44, %v1015_v10  ;;  %v5942_v44 = vmov 51  }
 0x5c0   : > { %1023 = vrot.lane.b32.xlu0 %v1021_v25, %s4099_s10 }
 0x5c2   : > { %v1029_v14 = vpop.permute.xlu1 %1028 }
 0x5c3   : > { %v1035_v1 = vmul.f32 %v1034_v8, %v1029_v14 }
 0x5c5   : > { %1037 = vrot.lane.b32.xlu0 %v1035_v1, %s4099_s10 }
 0x5c6   : > { %v4634_v28 = vpop.permute.xlu1 %1046 }
 0x5c7   : > { %6051 = vst [vmem:[#allocation22_spill] sm:$0xff] %v4634_v28  ;;  %v1049_v10 = vmul.f32 %v4634_v28, %v4362_v16  ;;  %v5943_v28 = vmov 52  }
 0x5c9   : > { %1051 = vperm.xlu0 %3846, %v4237_v0   ;;  %v1057_v14 = vrot.slane %v1049_v10, %v4367_v18 }
 0x5cd   : > { %3850 = vset.pattern.permute.xlu0 %v5943_v28 }
 0x62d   : > { %v4630_v42 = vpop.permute.xlu0 %1009 }
 0x62e   : > { %6049 = vst [vmem:[#allocation20_spill] sm:$0xff] %v4630_v42 }
 0x632   : > { %v4632_v46 = vpop.permute.xlu0 %1023 }
 0x633   : > { %6050 = vst [vmem:[#allocation21_spill] sm:$0xff] %v4632_v46  ;;  %v1099_v46 = vrot.slane %v1049_v10, %v4296_v40 }
 0x637   : > { %v4638_v25 = vpop.permute.xlu0 %1037 }
 0x638   : > { %6052 = vst [vmem:[#allocation23_spill] sm:$0xff] %v4638_v25 }
 0x644   : > { %v1052_v8 = vpop.permute.xlu0 %1051 }
 0x645   : > { %v1058_v1 = vmul.f32 %v1057_v14, %v1052_v8  ;;  %v1071_v8 = vrot.slane %v1049_v10, %v4253_v6 }
 0x647   : > { %1060 = vrot.lane.b32.xlu1 %v1058_v1, %s4105_s12 }
 0x64b   : > { %1065 = vperm.xlu1 %3847, %v4237_v0  }
 0x64f   : > { %3848 = vset.pattern.permute.xlu1 %v5941_v26 }
 0x650   : > { %1079 = vperm.xlu1 %3848, %v4237_v0  }
 0x654   : > { %3849 = vset.pattern.permute.xlu1 %v5942_v44  ;;  %v1085_v44 = vrot.slane %v1049_v10, %v4277_v31 }
 0x655   : > { %1093 = vperm.xlu1 %3849, %v4237_v0  }
 0x659   : > { %1111 = vrot.lane.b32.xlu1 %v1109_v33, %s4038_s8  ;;  %v5944_v33 = vmov 53  }
 0x65a   : > { %3851 = vset.pattern.permute.xlu1 %v5944_v33  ;;  %v5947_v33 = vmov 55  }
 0x6b9   : > { %v4651_v14 = vpop.permute.xlu1 %1060 }
 0x6ba   : > { %6053 = vst [vmem:[#allocation24_spill] sm:$0xff] %v4651_v14 }
 0x6c6   : > { %v1066_v1 = vpop.permute.xlu1 %1065 }
 0x6c7   : > { %v1072_v26 = vmul.f32 %v1071_v8, %v1066_v1  ;;  %v4663_v8 = vld [vmem:[%s5873_s2] sm:$0xf] }
 0x6c9   : > { %1074 = vrot.lane.b32.xlu0 %v1072_v26, %s4105_s12 }
 0x6cb   : > { %v1080_v25 = vpop.permute.xlu1 %1079 }
 0x6cc   : > { %v1086_v0 = vmul.f32 %v1085_v44, %v1080_v25 }
 0x6ce   : > { %1088 = vrot.lane.b32.xlu0 %v1086_v0, %s4105_s12  ;;  %v5946_v0 = vmov 54  }
 0x6d0   : > { %v1094_v42 = vpop.permute.xlu1 %1093 }
 0x6d1   : > { %v1100_v28 = vmul.f32 %v1099_v46, %v1094_v42 }
 0x6d3   : > { %1102 = vrot.lane.b32.xlu0 %v1100_v28, %s4105_s12 }
 0x6d4   : > { %v4670_v44 = vpop.permute.xlu1 %1111 }
 0x6d5   : > { %6056 = vst [vmem:[#allocation27_spill] sm:$0xff] %v4670_v44  ;;  %v1114_v42 = vmul.f32 %v4670_v44, %v4362_v16  ;;  %v1174_v44 = vrot.slane %v4449_v57, %v4329_v55 }
 0x6d7   : > { %1116 = vperm.xlu0 %3850, %v4663_v8   ;;  %v1122_v28 = vrot.slane %v1114_v42, %v4367_v18  ;;  %v1164_v14 = vrot.slane %v1114_v42, %v4296_v40 }
 0x73b   : > { %v4666_v26 = vpop.permute.xlu0 %1074 }
 0x73c   : > { %6054 = vst [vmem:[#allocation25_spill] sm:$0xff] %v4666_v26 }
 0x740   : > { %v4668_v25 = vpop.permute.xlu0 %1088 }
 0x741   : > { %6055 = vst [vmem:[#allocation26_spill] sm:$0xff] %v4668_v25 }
 0x745   : > { %v4674_v46 = vpop.permute.xlu0 %1102 }
 0x746   : > { %6057 = vst [vmem:[#allocation28_spill] sm:$0xff] %v4674_v46  ;;  %v5948_v46 = vmov 56  }
 0x747   : > { %3854 = vset.pattern.permute.xlu0 %v5948_v46 }
 0x752   : > { %v1117_v10 = vpop.permute.xlu0 %1116 }
 0x753   : > { %v1123_v1 = vmul.f32 %v1122_v28, %v1117_v10  ;;  %v1136_v10 = vrot.slane %v1114_v42, %v4253_v6 }
 0x755   : > { %1125 = vrot.lane.b32.xlu1 %v1123_v1, %s4110_s24 }
 0x759   : > { %1130 = vperm.xlu1 %3851, %v4663_v8  }
 0x75d   : > { %3852 = vset.pattern.permute.xlu1 %v5946_v0 }
 0x75e   : > { %1144 = vperm.xlu1 %3852, %v4663_v8  }
 0x762   : > { %3853 = vset.pattern.permute.xlu1 %v5947_v33  ;;  %v1150_v33 = vrot.slane %v1114_v42, %v4277_v31  ;;  %v5951_v42 = vmov 58  }
 0x763   : > { %1158 = vperm.xlu1 %3853, %v4663_v8  }
 0x767   : > { %1176 = vrot.lane.b32.xlu1 %v1174_v44, %s4114_s25  ;;  %v5949_v44 = vmov 57   ;;  %s4132_s25 = smov 26  }
 0x768   : > { %3855 = vset.pattern.permute.xlu1 %v5949_v44  ;;  %v1239_v44 = vrot.slane %v4449_v57, %v4340_v60 }
 0x7c7   : > { %v4686_v28 = vpop.permute.xlu1 %1125 }
 0x7c8   : > { %6058 = vst [vmem:[#allocation29_spill] sm:$0xff] %v4686_v28 }
 0x7d4   : > { %v1131_v1 = vpop.permute.xlu1 %1130 }
 0x7d5   : > { %v1137_v0 = vmul.f32 %v1136_v10, %v1131_v1 }
 0x7d7   : > { %1139 = vrot.lane.b32.xlu0 %v1137_v0, %s4110_s24 }
 0x7d9   : > { %v1145_v25 = vpop.permute.xlu1 %1144 }
 0x7da   : > { %v1151_v26 = vmul.f32 %v1150_v33, %v1145_v25 }
 0x7dc   : > { %1153 = vrot.lane.b32.xlu0 %v1151_v26, %s4110_s24 }
 0x7de   : > { %v1159_v52 = vpop.permute.xlu1 %1158 }
 0x7df   : > { %v1165_v46 = vmul.f32 %v1164_v14, %v1159_v52 }
 0x7e1   : > { %1167 = vrot.lane.b32.xlu0 %v1165_v46, %s4110_s24  ;;  %v5952_v46 = vmov 59  }
 0x7e2   : > { %v4700_v1 = vpop.permute.xlu1 %1176 }
 0x7e3   : > { %6061 = vst [vmem:[#allocation32_spill] sm:$0xff] %v4700_v1  ;;  %v1179_v33 = vmul.f32 %v4700_v1, %v4362_v16  ;;  %v5953_v1 = vmov 60  }
 0x7e5   : > { %1181 = vperm.xlu0 %3854, %v4663_v8   ;;  %v1187_v52 = vrot.slane %v1179_v33, %v4367_v18  ;;  %v1229_v57 = vrot.slane %v1179_v33, %v4296_v40 }
 0x7e9   : > { %3858 = vset.pattern.permute.xlu0 %v5953_v1 }
 0x849   : > { %v4696_v10 = vpop.permute.xlu0 %1139 }
 0x84a   : > { %6059 = vst [vmem:[#allocation30_spill] sm:$0xff] %v4696_v10 }
 0x84e   : > { %v4698_v0 = vpop.permute.xlu0 %1153 }
 0x84f   : > { %6060 = vst [vmem:[#allocation31_spill] sm:$0xff] %v4698_v0 }
 0x853   : > { %v4704_v26 = vpop.permute.xlu0 %1167 }
 0x854   : > { %6062 = vst [vmem:[#allocation33_spill] sm:$0xff] %v4704_v26 }
 0x860   : > { %v1182_v14 = vpop.permute.xlu0 %1181 }
 0x861   : > { %v1188_v25 = vmul.f32 %v1187_v52, %v1182_v14  ;;  %v1201_v14 = vrot.slane %v1179_v33, %v4253_v6 }
 0x863   : > { %1190 = vrot.lane.b32.xlu1 %v1188_v25, %s4116_s26 }
 0x867   : > { %1195 = vperm.xlu1 %3855, %v4663_v8  }
 0x86b   : > { %3856 = vset.pattern.permute.xlu1 %v5951_v42 }
 0x86c   : > { %1209 = vperm.xlu1 %3856, %v4663_v8  }
 0x870   : > { %3857 = vset.pattern.permute.xlu1 %v5952_v46  ;;  %v1215_v46 = vrot.slane %v1179_v33, %v4277_v31 }
 0x871   : > { %1223 = vperm.xlu1 %3857, %v4663_v8  }
 0x875   : > { %1241 = vrot.lane.b32.xlu1 %v1239_v44, %s4120_s28  ;;  %v5954_v44 = vmov 61   ;;  %s6028_s28 = smov 102  }
 0x876   : > { %3859 = vset.pattern.permute.xlu1 %v5954_v44  ;;  %v5957_v44 = vmov 63  }
 0x8d5   : > { %v4716_v52 = vpop.permute.xlu1 %1190 }
 0x8d6   : > { %6063 = vst [vmem:[#allocation34_spill] sm:$0xff] %v4716_v52 }
 0x8e2   : > { %v1196_v25 = vpop.permute.xlu1 %1195 }
 0x8e3   : > { %v1202_v42 = vmul.f32 %v1201_v14, %v1196_v25 }
 0x8e5   : > { %1204 = vrot.lane.b32.xlu0 %v1202_v42, %s4116_s26 }
 0x8e7   : > { %v1210_v26 = vpop.permute.xlu1 %1209 }
 0x8e8   : > { %v1216_v0 = vmul.f32 %v1215_v46, %v1210_v26  ;;  %v5955_v46 = vmov 62  }
 0x8ea   : > { %1218 = vrot.lane.b32.xlu0 %v1216_v0, %s4116_s26 }
 0x8ec   : > { %v1224_v10 = vpop.permute.xlu1 %1223 }
 0x8ed   : > { %v1230_v1 = vmul.f32 %v1229_v57, %v1224_v10  ;;  %v4744_v57 = vld [vmem:[%s5872_s1 + $0x10] sm:$0xff] }
 0x8ef   : > { %1232 = vrot.lane.b32.xlu0 %v1230_v1, %s4116_s26 }
 0x8f0   : > { %v4730_v25 = vpop.permute.xlu1 %1241 }
 0x8f1   : > { %6066 = vst [vmem:[#allocation37_spill] sm:$0xff] %v4730_v25  ;;  %v1244_v0 = vmul.f32 %v4730_v25, %v4362_v16 }
 0x8f3   : > { %1246 = vperm.xlu0 %3858, %v4663_v8   ;;  %v1252_v10 = vrot.slane %v1244_v0, %v4367_v18  ;;  %v1294_v52 = vrot.slane %v1244_v0, %v4296_v40 }
 0x957   : > { %v4726_v14 = vpop.permute.xlu0 %1204 }
 0x958   : > { %6064 = vst [vmem:[#allocation35_spill] sm:$0xff] %v4726_v14 }
 0x95c   : > { %v4728_v42 = vpop.permute.xlu0 %1218 }
 0x95d   : > { %6065 = vst [vmem:[#allocation36_spill] sm:$0xff] %v4728_v42 }
 0x961   : > { %v4734_v26 = vpop.permute.xlu0 %1232 }
 0x962   : > { %6067 = vst [vmem:[#allocation38_spill] sm:$0xff] %v4734_v26 }
 0x96e   : > { %v1247_v33 = vpop.permute.xlu0 %1246 }
 0x96f   : > { %v1253_v1 = vmul.f32 %v1252_v10, %v1247_v33  ;;  %v1304_v10 = vrot.slane %v4744_v57, %v4367_v18  ;;  %v5958_v33 = vmov 64  }
 0x970   : > { %3862 = vset.pattern.permute.xlu0 %v5958_v33 }
 0x971   : > { %1255 = vrot.lane.b32.xlu1 %v1253_v1, %s4122_s30 }
 0x975   : > { %1260 = vperm.xlu1 %3859, %v4663_v8  }
 0x979   : > { %3860 = vset.pattern.permute.xlu1 %v5955_v46  ;;  %v1266_v46 = vrot.slane %v1244_v0, %v4253_v6 }
 0x97a   : > { %1274 = vperm.xlu1 %3860, %v4663_v8  }
 0x97e   : > { %3861 = vset.pattern.permute.xlu1 %v5957_v44  ;;  %v1280_v44 = vrot.slane %v1244_v0, %v4277_v31  ;;  %v5960_v0 = vmov 66  }
 0x97f   : > { %1288 = vperm.xlu1 %3861, %v4663_v8  }
 0x983   : > { %1306 = vrot.lane.b32.xlu1 %v1304_v10, %s4126_s13  ;;  %v5959_v10 = vmov 65   ;;  %s4144_s13 = smov 33  }
 0x984   : > { %3863 = vset.pattern.permute.xlu1 %v5959_v10  ;;  %v5963_v10 = vmov 68  }
 0x9e3   : > { %v4751_v1 = vpop.permute.xlu1 %1255 }
 0x9e4   : > { %6068 = vst [vmem:[#allocation39_spill] sm:$0xff] %v4751_v1 }
 0x9f0   : > { %v1261_v25 = vpop.permute.xlu1 %1260 }
 0x9f1   : > { %v1267_v26 = vmul.f32 %v1266_v46, %v1261_v25 }
 0x9f3   : > { %1269 = vrot.lane.b32.xlu0 %v1267_v26, %s4122_s30 }
 0x9f5   : > { %v1275_v42 = vpop.permute.xlu1 %1274 }
 0x9f6   : > { %v1281_v14 = vmul.f32 %v1280_v44, %v1275_v42 }
 0x9f8   : > { %1283 = vrot.lane.b32.xlu0 %v1281_v14, %s4122_s30 }
 0x9fa   : > { %v1289_v28 = vpop.permute.xlu1 %1288 }
 0x9fb   : > { %v1295_v33 = vmul.f32 %v1294_v52, %v1289_v28 }
 0x9fd   : > { %1297 = vrot.lane.b32.xlu0 %v1295_v33, %s4122_s30  ;;  %v5961_v33 = vmov 67  }
 0x9fe   : > { %v4765_v46 = vpop.permute.xlu1 %1306 }
 0x9ff   : > { %6071 = vst [vmem:[#allocation42_spill] sm:$0xff] %v4765_v46  ;;  %v1309_v44 = vmul.f32 %v4765_v46, %v4362_v16  ;;  %v1369_v16 = vrot.slane %v4744_v57, %v4253_v6 }
 0xa01   : > { %1311 = vperm.xlu0 %3862, %v4663_v8   ;;  %v1317_v28 = vrot.slane %v1309_v44, %v4367_v18 }
 0xa05   : > { %3866 = vset.pattern.permute.xlu0 %v5963_v10 }
 0xa65   : > { %v4761_v25 = vpop.permute.xlu0 %1269 }
 0xa66   : > { %6069 = vst [vmem:[#allocation40_spill] sm:$0xff] %v4761_v25 }
 0xa6a   : > { %v4763_v26 = vpop.permute.xlu0 %1283 }
 0xa6b   : > { %6070 = vst [vmem:[#allocation41_spill] sm:$0xff] %v4763_v26  ;;  %v1359_v26 = vrot.slane %v1309_v44, %v4296_v40 }
 0xa6f   : > { %v4769_v14 = vpop.permute.xlu0 %1297 }
 0xa70   : > { %6072 = vst [vmem:[#allocation43_spill] sm:$0xff] %v4769_v14 }
 0xa7c   : > { %v1312_v52 = vpop.permute.xlu0 %1311 }
 0xa7d   : > { %v1318_v42 = vmul.f32 %v1317_v28, %v1312_v52  ;;  %v1331_v52 = vrot.slane %v1309_v44, %v4253_v6 }
 0xa7f   : > { %1320 = vrot.lane.b32.xlu1 %v1318_v42, %s4128_s14 }
 0xa83   : > { %1325 = vperm.xlu1 %3863, %v4663_v8  }
 0xa87   : > { %3864 = vset.pattern.permute.xlu1 %v5960_v0 }
 0xa88   : > { %1339 = vperm.xlu1 %3864, %v4663_v8  }
 0xa8c   : > { %3865 = vset.pattern.permute.xlu1 %v5961_v33  ;;  %v1345_v33 = vrot.slane %v1309_v44, %v4277_v31 }
 0xa8d   : > { %1353 = vperm.xlu1 %3865, %v4663_v8  }
 0xa91   : > { %1371 = vrot.lane.b32.xlu1 %v1369_v16, %s4132_s25  ;;  %v5964_v16 = vmov 69   ;;  %s6000_s25 = smov 95  }
 0xa92   : > { %3867 = vset.pattern.permute.xlu1 %v5964_v16  ;;  %v5967_v16 = vmov 71  }
 0xaf1   : > { %v4781_v28 = vpop.permute.xlu1 %1320 }
 0xaf2   : > { %6073 = vst [vmem:[#allocation44_spill] sm:$0xff] %v4781_v28 }
 0xafe   : > { %v1326_v42 = vpop.permute.xlu1 %1325 }
 0xaff   : > { %v1332_v0 = vmul.f32 %v1331_v52, %v1326_v42 }
 0xb01   : > { %1334 = vrot.lane.b32.xlu0 %v1332_v0, %s4128_s14 }
 0xb03   : > { %v1340_v46 = vpop.permute.xlu1 %1339 }
 0xb04   : > { %v1346_v14 = vmul.f32 %v1345_v33, %v1340_v46  ;;  %v4797_v46 = vld [vmem:[#allocation2] sm:$0xf]  ;;  %v5966_v33 = vmov 70  }
 0xb06   : > { %1348 = vrot.lane.b32.xlu0 %v1346_v14, %s4128_s14 }
 0xb08   : > { %v1354_v25 = vpop.permute.xlu1 %1353 }
 0xb09   : > { %v1360_v10 = vmul.f32 %v1359_v26, %v1354_v25 }
 0xb0b   : > { %1362 = vrot.lane.b32.xlu0 %v1360_v10, %s4128_s14 }
 0xb0c   : > { %v4795_v42 = vpop.permute.xlu1 %1371 }
 0xb0d   : > { %6076 = vst [vmem:[#allocation47_spill] sm:$0xff] %v4795_v42  ;;  %v1374_v44 = vmul.f32 %v4797_v46, %v4795_v42  ;;  %v1434_v42 = vrot.slane %v4744_v57, %v4277_v31 }
 0xb0f   : > { %1376 = vperm.xlu0 %3866, %v4663_v8   ;;  %v1382_v10 = vrot.slane %v1374_v44, %v4367_v18  ;;  %v1424_v28 = vrot.slane %v1374_v44, %v4296_v40 }
 0xb73   : > { %v4791_v52 = vpop.permute.xlu0 %1334 }
 0xb74   : > { %6074 = vst [vmem:[#allocation45_spill] sm:$0xff] %v4791_v52 }
 0xb78   : > { %v4793_v0 = vpop.permute.xlu0 %1348 }
 0xb79   : > { %6075 = vst [vmem:[#allocation46_spill] sm:$0xff] %v4793_v0 }
 0xb7d   : > { %v4801_v14 = vpop.permute.xlu0 %1362 }
 0xb7e   : > { %6077 = vst [vmem:[#allocation48_spill] sm:$0xff] %v4801_v14  ;;  %v5968_v14 = vmov 72  }
 0xb7f   : > { %3870 = vset.pattern.permute.xlu0 %v5968_v14 }
 0xb8a   : > { %v1377_v25 = vpop.permute.xlu0 %1376 }
 0xb8b   : > { %v1383_v26 = vmul.f32 %v1382_v10, %v1377_v25  ;;  %v1396_v25 = vrot.slane %v1374_v44, %v4253_v6 }
 0xb8d   : > { %1385 = vrot.lane.b32.xlu1 %v1383_v26, %s6028_s28 }
 0xb91   : > { %1390 = vperm.xlu1 %3867, %v4663_v8  }
 0xb95   : > { %3868 = vset.pattern.permute.xlu1 %v5966_v33 }
 0xb96   : > { %1404 = vperm.xlu1 %3868, %v4663_v8  }
 0xb9a   : > { %3869 = vset.pattern.permute.xlu1 %v5967_v16  ;;  %v1410_v16 = vrot.slane %v1374_v44, %v4277_v31  ;;  %v5971_v44 = vmov 74  }
 0xb9b   : > { %1418 = vperm.xlu1 %3869, %v4663_v8  }
 0xb9f   : > { %1436 = vrot.lane.b32.xlu1 %v1434_v42, %s4138_s9  ;;  %v5969_v42 = vmov 73   ;;  %s4150_s9 = smov 34  }
 0xba0   : > { %3871 = vset.pattern.permute.xlu1 %v5969_v42  ;;  %v1499_v42 = vrot.slane %v4744_v57, %v4296_v40 }
 0xbff   : > { %v4813_v10 = vpop.permute.xlu1 %1385 }
 0xc00   : > { %6078 = vst [vmem:[#allocation49_spill] sm:$0xff] %v4813_v10 }
 0xc0c   : > { %v1391_v26 = vpop.permute.xlu1 %1390 }
 0xc0d   : > { %v1397_v33 = vmul.f32 %v1396_v25, %v1391_v26 }
 0xc0f   : > { %1399 = vrot.lane.b32.xlu0 %v1397_v33, %s6028_s28 }
 0xc11   : > { %v1405_v0 = vpop.permute.xlu1 %1404 }
 0xc12   : > { %v1411_v52 = vmul.f32 %v1410_v16, %v1405_v0 }
 0xc14   : > { %1413 = vrot.lane.b32.xlu0 %v1411_v52, %s6028_s28 }
 0xc16   : > { %v1419_v1 = vpop.permute.xlu1 %1418 }
 0xc17   : > { %v1425_v14 = vmul.f32 %v1424_v28, %v1419_v1 }
 0xc19   : > { %1427 = vrot.lane.b32.xlu0 %v1425_v14, %s6028_s28  ;;  %v5972_v14 = vmov 75  }
 0xc1a   : > { %v4827_v26 = vpop.permute.xlu1 %1436 }
 0xc1b   : > { %6081 = vst [vmem:[#allocation52_spill] sm:$0xff] %v4827_v26  ;;  %v1439_v16 = vmul.f32 %v4797_v46, %v4827_v26  ;;  %v5973_v26 = vmov 76  }
 0xc1d   : > { %1441 = vperm.xlu0 %3870, %v4663_v8   ;;  %v1447_v1 = vrot.slane %v1439_v16, %v4367_v18 }
 0xc21   : > { %3874 = vset.pattern.permute.xlu0 %v5973_v26 }
 0xc81   : > { %v4823_v25 = vpop.permute.xlu0 %1399 }
 0xc82   : > { %6079 = vst [vmem:[#allocation50_spill] sm:$0xff] %v4823_v25  ;;  %v1489_v25 = vrot.slane %v1439_v16, %v4296_v40 }
 0xc86   : > { %v4825_v33 = vpop.permute.xlu0 %1413 }
 0xc87   : > { %6080 = vst [vmem:[#allocation51_spill] sm:$0xff] %v4825_v33 }
 0xc8b   : > { %v4831_v52 = vpop.permute.xlu0 %1427 }
 0xc8c   : > { %6082 = vst [vmem:[#allocation53_spill] sm:$0xff] %v4831_v52 }
 0xc98   : > { %v1442_v28 = vpop.permute.xlu0 %1441 }
 0xc99   : > { %v1448_v0 = vmul.f32 %v1447_v1, %v1442_v28  ;;  %v1461_v28 = vrot.slane %v1439_v16, %v4253_v6 }
 0xc9b   : > { %1450 = vrot.lane.b32.xlu1 %v1448_v0, %s6003_s11 }
 0xc9f   : > { %1455 = vperm.xlu1 %3871, %v4663_v8  }
 0xca3   : > { %3872 = vset.pattern.permute.xlu1 %v5971_v44 }
 0xca4   : > { %1469 = vperm.xlu1 %3872, %v4663_v8  }
 0xca8   : > { %3873 = vset.pattern.permute.xlu1 %v5972_v14  ;;  %v1475_v14 = vrot.slane %v1439_v16, %v4277_v31  ;;  %v5976_v16 = vmov 78  }
 0xca9   : > { %1483 = vperm.xlu1 %3873, %v4663_v8  }
 0xcad   : > { %1501 = vrot.lane.b32.xlu1 %v1499_v42, %s4144_s13  ;;  %v5974_v42 = vmov 77   ;;  %s5986_s13 = smov 94  }
 0xcae   : > { %3875 = vset.pattern.permute.xlu1 %v5974_v42  ;;  %v1564_v42 = vrot.slane %v4744_v57, %v4307_v45 }
 0xd0d   : > { %v4843_v1 = vpop.permute.xlu1 %1450 }
 0xd1a   : > { %v1456_v0 = vpop.permute.xlu1 %1455 }
 0xd1b   : > { %v1462_v44 = vmul.f32 %v1461_v28, %v1456_v0 }
 0xd1d   : > { %1464 = vrot.lane.b32.xlu0 %v1462_v44, %s6003_s11 }
 0xd1f   : > { %v1470_v52 = vpop.permute.xlu1 %1469 }
 0xd20   : > { %v1476_v33 = vmul.f32 %v1475_v14, %v1470_v52  ;;  %v5977_v14 = vmov 79  }
 0xd22   : > { %1478 = vrot.lane.b32.xlu0 %v1476_v33, %s6003_s11 }
 0xd24   : > { %v1484_v10 = vpop.permute.xlu1 %1483 }
 0xd25   : > { %v1490_v26 = vmul.f32 %v1489_v25, %v1484_v10 }
 0xd27   : > { %1492 = vrot.lane.b32.xlu0 %v1490_v26, %s6003_s11  ;;  %s4174_s11 = smov 40  }
 0xd28   : > { %v4857_v0 = vpop.permute.xlu1 %1501 }
 0xd29   : > { %6085 = vst [vmem:[#allocation56_spill] sm:$0xff] %v4857_v0  ;;  %v1504_v33 = vmul.f32 %v4797_v46, %v4857_v0  ;;  %v5978_v0 = vmov 80  }
 0xd2b   : > { %1506 = vperm.xlu0 %3874, %v4663_v8   ;;  %v1512_v10 = vrot.slane %v1504_v33, %v4367_v18  ;;  %v1554_v45 = vrot.slane %v1504_v33, %v4296_v40 }
 0xd2f   : > { %3878 = vset.pattern.permute.xlu0 %v5978_v0 }
 0xd8f   : > { %v4853_v28 = vpop.permute.xlu0 %1464 }
 0xd90   : > { %6083 = vst [vmem:[#allocation54_spill] sm:$0xff] %v4853_v28 }
 0xd94   : > { %v4855_v44 = vpop.permute.xlu0 %1478 }
 0xd95   : > { %6084 = vst [vmem:[#allocation55_spill] sm:$0xff] %v4855_v44 }
 0xd99   : > { %v4861_v52 = vpop.permute.xlu0 %1492 }
 0xd9a   : > { %6086 = vst [vmem:[#allocation57_spill] sm:$0xff] %v4861_v52 }
 0xda6   : > { %v1507_v25 = vpop.permute.xlu0 %1506 }
 0xda7   : > { %v1513_v26 = vmul.f32 %v1512_v10, %v1507_v25  ;;  %v1526_v25 = vrot.slane %v1504_v33, %v4253_v6 }
 0xda9   : > { %1515 = vrot.lane.b32.xlu1 %v1513_v26, %s6000_s25 }
 0xdad   : > { %1520 = vperm.xlu1 %3875, %v4663_v8  }
 0xdb1   : > { %3876 = vset.pattern.permute.xlu1 %v5976_v16 }
 0xdb2   : > { %1534 = vperm.xlu1 %3876, %v4663_v8  }
 0xdb6   : > { %3877 = vset.pattern.permute.xlu1 %v5977_v14  ;;  %v1540_v14 = vrot.slane %v1504_v33, %v4277_v31 }
 0xdb7   : > { %1548 = vperm.xlu1 %3877, %v4663_v8  }
 0xdbb   : > { %1566 = vrot.lane.b32.xlu1 %v1564_v42, %s4150_s9  ;;  %v5979_v42 = vmov 81   ;;  %s4156_s9 = smov 36  }
 0xdbc   : > { %3879 = vset.pattern.permute.xlu1 %v5979_v42  ;;  %v1629_v42 = vrot.slane %v4744_v57, %v4318_v50 }
 0xe1b   : > { %v4873_v10 = vpop.permute.xlu1 %1515 }
 0xe28   : > { %v1521_v26 = vpop.permute.xlu1 %1520 }
 0xe29   : > { %v1527_v16 = vmul.f32 %v1526_v25, %v1521_v26 }
 0xe2b   : > { %1529 = vrot.lane.b32.xlu0 %v1527_v16, %s6000_s25 }
 0xe2d   : > { %v1535_v52 = vpop.permute.xlu1 %1534 }
 0xe2e   : > { %v1541_v44 = vmul.f32 %v1540_v14, %v1535_v52  ;;  %v5981_v14 = vmov 82  }
 0xe30   : > { %1543 = vrot.lane.b32.xlu0 %v1541_v44, %s6000_s25 }
 0xe32   : > { %v1549_v28 = vpop.permute.xlu1 %1548 }
 0xe33   : > { %v1555_v0 = vmul.f32 %v1554_v45, %v1549_v28  ;;  %v5982_v45 = vmov 83  }
 0xe35   : > { %1557 = vrot.lane.b32.xlu0 %v1555_v0, %s6000_s25  ;;  %s4180_s25 = smov 41  }
 0xe36   : > { %v4887_v26 = vpop.permute.xlu1 %1566 }
 0xe37   : > { %6089 = vst [vmem:[#allocation60_spill] sm:$0xff] %v4887_v26  ;;  %v1569_v44 = vmul.f32 %v4797_v46, %v4887_v26  ;;  %v5983_v26 = vmov 84  }
 0xe39   : > { %1571 = vperm.xlu0 %3878, %v4663_v8   ;;  %v1577_v28 = vrot.slane %v1569_v44, %v4367_v18  ;;  %v1619_v50 = vrot.slane %v1569_v44, %v4296_v40 }
 0xe3d   : > { %3882 = vset.pattern.permute.xlu0 %v5983_v26 }
 0xe9d   : > { %v4883_v25 = vpop.permute.xlu0 %1529 }
 0xe9e   : > { %6087 = vst [vmem:[#allocation58_spill] sm:$0xff] %v4883_v25 }
 0xea2   : > { %v4885_v16 = vpop.permute.xlu0 %1543 }
 0xea3   : > { %6088 = vst [vmem:[#allocation59_spill] sm:$0xff] %v4885_v16 }
 0xea7   : > { %v4891_v52 = vpop.permute.xlu0 %1557 }
 0xea8   : > { %6090 = vst [vmem:[#allocation61_spill] sm:$0xff] %v4891_v52 }
 0xeb4   : > { %v1572_v33 = vpop.permute.xlu0 %1571 }
 0xeb5   : > { %v1578_v0 = vmul.f32 %v1577_v28, %v1572_v33  ;;  %v1591_v33 = vrot.slane %v1569_v44, %v4253_v6 }
 0xeb7   : > { %1580 = vrot.lane.b32.xlu1 %v1578_v0, %s5986_s13 }
 0xebb   : > { %1585 = vperm.xlu1 %3879, %v4663_v8  }
 0xebf   : > { %3880 = vset.pattern.permute.xlu1 %v5981_v14 }
 0xec0   : > { %1599 = vperm.xlu1 %3880, %v4663_v8  }
 0xec4   : > { %3881 = vset.pattern.permute.xlu1 %v5982_v45  ;;  %v1605_v45 = vrot.slane %v1569_v44, %v4277_v31 }
 0xec5   : > { %1613 = vperm.xlu1 %3881, %v4663_v8  }
 0xec9   : > { %1631 = vrot.lane.b32.xlu1 %v1629_v42, %s4156_s9  ;;  %v5984_v42 = vmov 85   ;;  %s5993_s9 = smov 92  }
 0xeca   : > { %3883 = vset.pattern.permute.xlu1 %v5984_v42  ;;  %v1694_v42 = vrot.slane %v4744_v57, %v4329_v55 }
 0xf29   : > { %v4903_v28 = vpop.permute.xlu1 %1580 }
 0xf36   : > { %v1586_v0 = vpop.permute.xlu1 %1585 }
 0xf37   : > { %v1592_v14 = vmul.f32 %v1591_v33, %v1586_v0 }
 0xf39   : > { %1594 = vrot.lane.b32.xlu0 %v1592_v14, %s5986_s13 }
 0xf3b   : > { %v1600_v52 = vpop.permute.xlu1 %1599 }
 0xf3c   : > { %v1606_v16 = vmul.f32 %v1605_v45, %v1600_v52  ;;  %v5988_v45 = vmov 86  }
 0xf3e   : > { %1608 = vrot.lane.b32.xlu0 %v1606_v16, %s5986_s13 }
 0xf40   : > { %v1614_v25 = vpop.permute.xlu1 %1613 }
 0xf41   : > { %v1620_v26 = vmul.f32 %v1619_v50, %v1614_v25  ;;  %v5989_v50 = vmov 87  }
 0xf43   : > { %1622 = vrot.lane.b32.xlu0 %v1620_v26, %s5986_s13  ;;  %s4162_s13 = smov 37  }
 0xf44   : > { %v4917_v0 = vpop.permute.xlu1 %1631 }
 0xf45   : > { %6093 = vst [vmem:[#allocation64_spill] sm:$0xff] %v4917_v0  ;;  %v1634_v16 = vmul.f32 %v4797_v46, %v4917_v0  ;;  %v5990_v0 = vmov 88  }
 0xf47   : > { %1636 = vperm.xlu0 %3882, %v4663_v8   ;;  %v1642_v25 = vrot.slane %v1634_v16, %v4367_v18  ;;  %v1684_v55 = vrot.slane %v1634_v16, %v4296_v40 }
 0xf4b   : > { %3886 = vset.pattern.permute.xlu0 %v5990_v0 }
 0xfab   : > { %v4913_v33 = vpop.permute.xlu0 %1594 }
 0xfac   : > { %6091 = vst [vmem:[#allocation62_spill] sm:$0xff] %v4913_v33 }
 0xfb0   : > { %v4915_v14 = vpop.permute.xlu0 %1608 }
 0xfb1   : > { %6092 = vst [vmem:[#allocation63_spill] sm:$0xff] %v4915_v14 }
 0xfb5   : > { %v4921_v52 = vpop.permute.xlu0 %1622 }
 0xfb6   : > { %6094 = vst [vmem:[#allocation65_spill] sm:$0xff] %v4921_v52 }
 0xfc2   : > { %v1637_v44 = vpop.permute.xlu0 %1636 }
 0xfc3   : > { %v1643_v26 = vmul.f32 %v1642_v25, %v1637_v44  ;;  %v1656_v44 = vrot.slane %v1634_v16, %v4253_v6 }
 0xfc5   : > { %1645 = vrot.lane.b32.xlu1 %v1643_v26, %s5993_s9 }
 0xfc9   : > { %1650 = vperm.xlu1 %3883, %v4663_v8  }
 0xfcd   : > { %3884 = vset.pattern.permute.xlu1 %v5988_v45 }
 0xfce   : > { %1664 = vperm.xlu1 %3884, %v4663_v8  }
 0xfd2   : > { %3885 = vset.pattern.permute.xlu1 %v5989_v50  ;;  %v1670_v50 = vrot.slane %v1634_v16, %v4277_v31 }
 0xfd3   : > { %1678 = vperm.xlu1 %3885, %v4663_v8  }
 0xfd7   : > { %1696 = vrot.lane.b32.xlu1 %v1694_v42, %s4162_s13  ;;  %v5991_v42 = vmov 89   ;;  %s5998_s13 = smov 91  }
 0xfd8   : > { %3887 = vset.pattern.permute.xlu1 %v5991_v42  ;;  %v1759_v42 = vrot.slane %v4744_v57, %v4340_v60 }
0x1037   : > { %v4933_v25 = vpop.permute.xlu1 %1645 }
0x1044   : > { %v1651_v26 = vpop.permute.xlu1 %1650 }
0x1045   : > { %v1657_v45 = vmul.f32 %v1656_v44, %v1651_v26 }
0x1047   : > { %1659 = vrot.lane.b32.xlu0 %v1657_v45, %s5993_s9 }
0x1049   : > { %v1665_v52 = vpop.permute.xlu1 %1664 }
0x104a   : > { %v1671_v14 = vmul.f32 %v1670_v50, %v1665_v52  ;;  %v5995_v50 = vmov 90  }
0x104c   : > { %1673 = vrot.lane.b32.xlu0 %v1671_v14, %s5993_s9 }
0x104e   : > { %v1679_v33 = vpop.permute.xlu1 %1678 }
0x104f   : > { %v1685_v0 = vmul.f32 %v1684_v55, %v1679_v33  ;;  %v5996_v55 = vmov 91  }
0x1051   : > { %1687 = vrot.lane.b32.xlu0 %v1685_v0, %s5993_s9  ;;  %s4168_s9 = smov 38  }
0x1052   : > { %v4947_v26 = vpop.permute.xlu1 %1696 }
0x1053   : > { %6097 = vst [vmem:[#allocation68_spill] sm:$0xff] %v4947_v26  ;;  %v1699_v14 = vmul.f32 %v4797_v46, %v4947_v26  ;;  %v5997_v26 = vmov 92  }
0x1055   : > { %1701 = vperm.xlu0 %3886, %v4663_v8   ;;  %v1707_v33 = vrot.slane %v1699_v14, %v4367_v18  ;;  %v1749_v60 = vrot.slane %v1699_v14, %v4296_v40 }
0x1059   : > { %3890 = vset.pattern.permute.xlu0 %v5997_v26 }
0x10b9   : > { %v4943_v44 = vpop.permute.xlu0 %1659 }
0x10ba   : > { %6095 = vst [vmem:[#allocation66_spill] sm:$0xff] %v4943_v44 }
0x10be   : > { %v4945_v45 = vpop.permute.xlu0 %1673 }
0x10bf   : > { %6096 = vst [vmem:[#allocation67_spill] sm:$0xff] %v4945_v45 }
0x10c3   : > { %v4951_v52 = vpop.permute.xlu0 %1687 }
0x10c4   : > { %6098 = vst [vmem:[#allocation69_spill] sm:$0xff] %v4951_v52 }
0x10d0   : > { %v1702_v16 = vpop.permute.xlu0 %1701 }
0x10d1   : > { %v1708_v0 = vmul.f32 %v1707_v33, %v1702_v16  ;;  %v1721_v16 = vrot.slane %v1699_v14, %v4253_v6 }
0x10d3   : > { %1710 = vrot.lane.b32.xlu1 %v1708_v0, %s5998_s13 }
0x10d7   : > { %1715 = vperm.xlu1 %3887, %v4663_v8  }
0x10db   : > { %3888 = vset.pattern.permute.xlu1 %v5995_v50 }
0x10dc   : > { %1729 = vperm.xlu1 %3888, %v4663_v8  }
0x10e0   : > { %3889 = vset.pattern.permute.xlu1 %v5996_v55  ;;  %v1735_v55 = vrot.slane %v1699_v14, %v4277_v31 }
0x10e1   : > { %1743 = vperm.xlu1 %3889, %v4663_v8  }
0x10e5   : > { %1761 = vrot.lane.b32.xlu1 %v1759_v42, %s4168_s9  ;;  %v6002_v42 = vmov 93   ;;  %s6026_s9 = smov 90  }
0x10e6   : > { %3891 = vset.pattern.permute.xlu1 %v6002_v42  ;;  %v6007_v42 = vmov 95  }
0x1145   : > { %v4963_v33 = vpop.permute.xlu1 %1710 }
0x1146   : > { %6099 = vst [vmem:[#allocation70_spill] sm:$0xff] %v4963_v33 }
0x1152   : > { %v1716_v0 = vpop.permute.xlu1 %1715 }
0x1153   : > { %v1722_v50 = vmul.f32 %v1721_v16, %v1716_v0 }
0x1155   : > { %1724 = vrot.lane.b32.xlu0 %v1722_v50, %s5998_s13 }
0x1157   : > { %v1730_v52 = vpop.permute.xlu1 %1729 }
0x1158   : > { %v1736_v45 = vmul.f32 %v1735_v55, %v1730_v52 }
0x115a   : > { %1738 = vrot.lane.b32.xlu0 %v1736_v45, %s5998_s13 }
0x115c   : > { %v1744_v57 = vpop.permute.xlu1 %1743 }
0x115d   : > { %v1750_v26 = vmul.f32 %v1749_v60, %v1744_v57  ;;  %v6005_v60 = vmov 94   ;;  %v4991_v57 = vld [vmem:[%s5872_s1 + $0x18] sm:$0x7] }
0x115f   : > { %1752 = vrot.lane.b32.xlu0 %v1750_v26, %s5998_s13  ;;  %s6019_s13 = smov 87  }
0x1160   : > { %v4977_v0 = vpop.permute.xlu1 %1761 }
0x1161   : > { %6102 = vst [vmem:[#allocation73_spill] sm:$0xff] %v4977_v0  ;;  %v1764_v45 = vmul.f32 %v4797_v46, %v4977_v0 }
0x1163   : > { %1766 = vperm.xlu0 %3890, %v4663_v8   ;;  %v1772_v14 = vrot.slane %v1764_v45, %v4367_v18  ;;  %v1814_v33 = vrot.slane %v1764_v45, %v4296_v40 }
0x11c7   : > { %v4973_v16 = vpop.permute.xlu0 %1724 }
0x11c8   : > { %6100 = vst [vmem:[#allocation71_spill] sm:$0xff] %v4973_v16 }
0x11cc   : > { %v4975_v50 = vpop.permute.xlu0 %1738 }
0x11cd   : > { %6101 = vst [vmem:[#allocation72_spill] sm:$0xff] %v4975_v50 }
0x11d1   : > { %v4981_v52 = vpop.permute.xlu0 %1752 }
0x11d2   : > { %6103 = vst [vmem:[#allocation74_spill] sm:$0xff] %v4981_v52 }
0x11de   : > { %v1767_v55 = vpop.permute.xlu0 %1766 }
0x11df   : > { %v1773_v26 = vmul.f32 %v1772_v14, %v1767_v55  ;;  %v1824_v14 = vrot.slane %v4991_v57, %v4367_v18  ;;  %v6008_v55 = vmov 96  }
0x11e0   : > { %3894 = vset.pattern.permute.xlu0 %v6008_v55 }
0x11e1   : > { %1775 = vrot.lane.b32.xlu1 %v1773_v26, %s6026_s9 }
0x11e5   : > { %1780 = vperm.xlu1 %3891, %v4663_v8  }
0x11e9   : > { %3892 = vset.pattern.permute.xlu1 %v6005_v60  ;;  %v1786_v60 = vrot.slane %v1764_v45, %v4253_v6 }
0x11ea   : > { %1794 = vperm.xlu1 %3892, %v4663_v8  }
0x11ee   : > { %3893 = vset.pattern.permute.xlu1 %v6007_v42  ;;  %v1800_v42 = vrot.slane %v1764_v45, %v4277_v31  ;;  %v6011_v45 = vmov 98  }
0x11ef   : > { %1808 = vperm.xlu1 %3893, %v4663_v8  }
0x11f3   : > { %1826 = vrot.lane.b32.xlu1 %v1824_v14, %s4174_s11  ;;  %v6009_v14 = vmov 97   ;;  %s6021_s11 = smov 88  }
0x11f4   : > { %3895 = vset.pattern.permute.xlu1 %v6009_v14  ;;  %v1889_v14 = vrot.slane %v4991_v57, %v4253_v6 }
0x1253   : > { %v4998_v26 = vpop.permute.xlu1 %1775 }
0x1254   : > { %6104 = vst [vmem:[#allocation75_spill] sm:$0xff] %v4998_v26 }
0x1260   : > { %v1781_v0 = vpop.permute.xlu1 %1780 }
0x1261   : > { %v1787_v52 = vmul.f32 %v1786_v60, %v1781_v0 }
0x1263   : > { %1789 = vrot.lane.b32.xlu0 %v1787_v52, %s6026_s9 }
0x1265   : > { %v1795_v50 = vpop.permute.xlu1 %1794 }
0x1266   : > { %v1801_v16 = vmul.f32 %v1800_v42, %v1795_v50 }
0x1268   : > { %1803 = vrot.lane.b32.xlu0 %v1801_v16, %s6026_s9 }
0x126a   : > { %v1809_v44 = vpop.permute.xlu1 %1808 }
0x126b   : > { %v1815_v55 = vmul.f32 %v1814_v33, %v1809_v44 }
0x126d   : > { %1817 = vrot.lane.b32.xlu0 %v1815_v55, %s6026_s9  ;;  %v6012_v55 = vmov 99  }
0x126e   : > { %v5012_v60 = vpop.permute.xlu1 %1826 }
0x126f   : > { %6107 = vst [vmem:[#allocation78_spill] sm:$0xff] %v5012_v60  ;;  %v1829_v42 = vmul.f32 %v4797_v46, %v5012_v60  ;;  %v6013_v60 = vmov 100  }
0x1271   : > { %1831 = vperm.xlu0 %3894, %v4663_v8   ;;  %v1837_v44 = vrot.slane %v1829_v42, %v4367_v18 }
0x1275   : > { %3898 = vset.pattern.permute.xlu0 %v6013_v60 }
0x12d5   : > { %v5008_v0 = vpop.permute.xlu0 %1789 }
0x12d6   : > { %6105 = vst [vmem:[#allocation76_spill] sm:$0xff] %v5008_v0  ;;  %v1879_v0 = vrot.slane %v1829_v42, %v4296_v40 }
0x12da   : > { %v5010_v52 = vpop.permute.xlu0 %1803 }
0x12db   : > { %6106 = vst [vmem:[#allocation77_spill] sm:$0xff] %v5010_v52 }
0x12df   : > { %v5016_v16 = vpop.permute.xlu0 %1817 }
0x12e0   : > { %6108 = vst [vmem:[#allocation79_spill] sm:$0xff] %v5016_v16 }
0x12ec   : > { %v1832_v33 = vpop.permute.xlu0 %1831 }
0x12ed   : > { %v1838_v50 = vmul.f32 %v1837_v44, %v1832_v33  ;;  %v1851_v33 = vrot.slane %v1829_v42, %v4253_v6 }
0x12ef   : > { %1840 = vrot.lane.b32.xlu1 %v1838_v50, %s6021_s11 }
0x12f3   : > { %1845 = vperm.xlu1 %3895, %v4663_v8  }
0x12f7   : > { %3896 = vset.pattern.permute.xlu1 %v6011_v45 }
0x12f8   : > { %1859 = vperm.xlu1 %3896, %v4663_v8  }
0x12fc   : > { %3897 = vset.pattern.permute.xlu1 %v6012_v55  ;;  %v1865_v55 = vrot.slane %v1829_v42, %v4277_v31  ;;  %v6016_v42 = vmov 102  }
0x12fd   : > { %1873 = vperm.xlu1 %3897, %v4663_v8  }
0x1301   : > { %1891 = vrot.lane.b32.xlu1 %v1889_v14, %s4180_s25  ;;  %v6014_v14 = vmov 101   ;;  %s4186_s25 = smov 42  }
0x1302   : > { %3899 = vset.pattern.permute.xlu1 %v6014_v14  ;;  %v1954_v14 = vrot.slane %v4991_v57, %v4277_v31 }
0x1361   : > { %v5028_v44 = vpop.permute.xlu1 %1840 }
0x136e   : > { %v1846_v50 = vpop.permute.xlu1 %1845 }
0x136f   : > { %v1852_v45 = vmul.f32 %v1851_v33, %v1846_v50 }
0x1371   : > { %1854 = vrot.lane.b32.xlu0 %v1852_v45, %s6021_s11 }
0x1373   : > { %v1860_v16 = vpop.permute.xlu1 %1859 }
0x1374   : > { %v1866_v52 = vmul.f32 %v1865_v55, %v1860_v16  ;;  %v6017_v55 = vmov 103  }
0x1376   : > { %1868 = vrot.lane.b32.xlu0 %v1866_v52, %s6021_s11 }
0x1378   : > { %v1874_v26 = vpop.permute.xlu1 %1873 }
0x1379   : > { %v1880_v60 = vmul.f32 %v1879_v0, %v1874_v26 }
0x137b   : > { %1882 = vrot.lane.b32.xlu0 %v1880_v60, %s6021_s11  ;;  %s4188_s11 = smov 86  }
0x137c   : > { %v5042_v50 = vpop.permute.xlu1 %1891 }
0x137d   : > { %6111 = vst [vmem:[#allocation82_spill] sm:$0xff] %v5042_v50  ;;  %v1894_v52 = vmul.f32 %v4797_v46, %v5042_v50  ;;  %v6018_v50 = vmov 104  }
0x137f   : > { %1896 = vperm.xlu0 %3898, %v4663_v8   ;;  %v1902_v26 = vrot.slane %v1894_v52, %v4367_v18  ;;  %v1944_v57 = vrot.slane %v1894_v52, %v4296_v40 }
0x1383   : > { %3902 = vset.pattern.permute.xlu0 %v6018_v50 }
0x13e3   : > { %v5038_v33 = vpop.permute.xlu0 %1854 }
0x13e4   : > { %6109 = vst [vmem:[#allocation80_spill] sm:$0xff] %v5038_v33 }
0x13e8   : > { %v5040_v45 = vpop.permute.xlu0 %1868 }
0x13e9   : > { %6110 = vst [vmem:[#allocation81_spill] sm:$0xff] %v5040_v45 }
0x13ed   : > { %v5046_v16 = vpop.permute.xlu0 %1882 }
0x13ee   : > { %6112 = vst [vmem:[#allocation83_spill] sm:$0xff] %v5046_v16 }
0x13fa   : > { %v1897_v0 = vpop.permute.xlu0 %1896 }
0x13fb   : > { %v1903_v60 = vmul.f32 %v1902_v26, %v1897_v0  ;;  %v1916_v0 = vrot.slane %v1894_v52, %v4253_v6 }
0x13fd   : > { %1905 = vrot.lane.b32.xlu1 %v1903_v60, %s6019_s13 }
0x1401   : > { %1910 = vperm.xlu1 %3899, %v4663_v8  }
0x1405   : > { %3900 = vset.pattern.permute.xlu1 %v6016_v42 }
0x1406   : > { %1924 = vperm.xlu1 %3900, %v4663_v8  }
0x140a   : > { %3901 = vset.pattern.permute.xlu1 %v6017_v55  ;;  %v1930_v55 = vrot.slane %v1894_v52, %v4277_v31 }
0x140b   : > { %1938 = vperm.xlu1 %3901, %v4663_v8  }
0x140f   : > { %1956 = vrot.lane.b32.xlu1 %v1954_v14, %s4186_s25  ;;  %v6023_v14 = vmov 105  }
0x1410   : > { %3903 = vset.pattern.permute.xlu1 %v6023_v14 }
0x146f   : > { %v5058_v26 = vpop.permute.xlu1 %1905 }
0x147c   : > { %v1911_v60 = vpop.permute.xlu1 %1910 }
0x147d   : > { %v1917_v42 = vmul.f32 %v1916_v0, %v1911_v60  ;;  %v6113_v0 = vmov 1  }
0x147f   : > { %1919 = vrot.lane.b32.xlu0 %v1917_v42, %s6019_s13 }
0x1481   : > { %v1925_v16 = vpop.permute.xlu1 %1924 }
0x1482   : > { %v1931_v45 = vmul.f32 %v1930_v55, %v1925_v16 }
0x1484   : > { %1933 = vrot.lane.b32.xlu0 %v1931_v45, %s6019_s13 }
0x1486   : > { %v1939_v33 = vpop.permute.xlu1 %1938 }
0x1487   : > { %v1945_v50 = vmul.f32 %v1944_v57, %v1939_v33  ;;  %v4018_v57 = vld [vmem:[%s5872_s1] sm:$0xff] }
0x1489   : > { %1947 = vrot.lane.b32.xlu0 %v1945_v50, %s6019_s13 }
0x148a   : > { %v5073_v16 = vpop.permute.xlu1 %1956 }
0x148b   : > { %6116 = vst [vmem:[#allocation86_spill] sm:$0xff] %v5073_v16  ;;  %v5077_v45 = vmul.f32 %v4797_v46, %v5073_v16 }
0x148d   : > { %1961 = vperm.xlu0 %3902, %v4663_v8   ;;  %v1967_v50 = vrot.slane %v5077_v45, %v4367_v18 }
0x1491   : > { %3907 = vset.pattern.permute.xlu0 %v6113_v0  ;;  %v5087_v0 = vrot.slane %v4018_v57, %v4367_v18 }
0x1493   : > { %6118 = vst [vmem:[#allocation88_spill] sm:$0xff] %v5087_v0  ;;  %v284_v14 = vmul.f32 %v4797_v46, %v5087_v0  ;;  %v4190_v0 = vmov 107  }
0x1495   : > { %v293_v16 = vrot.slane %v284_v14, %v4367_v18  ;;  %v313_v46 = vrot.slane %v284_v14, %v4277_v31 }
0x1497   : > { %v294_v57 = vmul.f32 %v293_v16, %v4348_v3  ;;  %v314_v18 = vmul.f32 %v313_v46, %v4353_v11  ;;  %v6124_v46 = vmov 7  }
0x14f1   : > { %v5069_v42 = vpop.permute.xlu0 %1919 }
0x14f2   : > { %6114 = vst [vmem:[#allocation84_spill] sm:$0xff] %v5069_v42  ;;  %v6119_v42 = vmov 0  }
0x14f6   : > { %v5071_v60 = vpop.permute.xlu0 %1933 }
0x14f7   : > { %6115 = vst [vmem:[#allocation85_spill] sm:$0xff] %v5071_v60  ;;  %v323_v60 = vrot.slane %v284_v14, %v4296_v40 }
0x14f9   : > { %v324_v16 = vmul.f32 %v323_v60, %v4358_v13  ;;  %v6122_v60 = vmov 5  }
0x14fb   : > { %v5079_v33 = vpop.permute.xlu0 %1947 }
0x14fc   : > { %6117 = vst [vmem:[#allocation87_spill] sm:$0xff] %v5079_v33  ;;  %v303_v33 = vrot.slane %v284_v14, %v4253_v6 }
0x1508   : > { %v1962_v52 = vpop.permute.xlu0 %1961 }
0x1509   : > { %v1968_v55 = vmul.f32 %v1967_v50, %v1962_v52  ;;  %v6030_v50 = vmov 106   ;;  %v4019_v52 = vld [vmem:[%s5873_s2] sm:$0xf] }
0x150b   : > { %1970 = vrot.lane.b32.xlu1 %v1968_v55, %s4188_s11  ;;  %v304_v55 = vmul.f32 %v303_v33, %v4346_v63  ;;  %v5112_v63 = vld [vmem:[%s5875_s4] sm:$0xff] }
0x150f   : > { %1975 = vperm.xlu1 %3903, %v4663_v8   ;;  %v305_v8 = vadd.f32 %v304_v55, %v294_v57  ;;  %v6120_v57 = vmov 2  }
0x1511   : > { %v315_v3 = vadd.f32 %v314_v18, %v305_v8 }
0x1513   : > { %3904 = vset.pattern.permute.xlu1 %v6030_v50  ;;  %v270_v50 = vld [vmem:[%s5874_s3] sm:$0xf]  ;;  %v325_v33 = vadd.f32 %v324_v16, %v315_v3  ;;  %v6126_v3 = vmov 9   ;;  %v6127_v16 = vmov 10  }
0x1514   : > { %1989 = vperm.xlu1 %3904, %v4019_v52  }
0x1518   : > { %3905 = vset.pattern.permute.xlu1 %v4190_v0 }
0x1519   : > { %2003 = vperm.xlu1 %3905, %v4019_v52   ;;  %v348_v52 = vadd.f32 %v4472_v23, %v325_v33  ;;  %v6123_v23 = vmov 6   ;;  %v6128_v33 = vmov 11  }
0x151b   : > { %v362_v11 = vadd.f32 %v4474_v9, %v348_v52 }
0x151d   : > { %3906 = vset.pattern.permute.xlu1 %v6119_v42  ;;  %v376_v18 = vadd.f32 %v4476_v39, %v362_v11  ;;  %v6130_v11 = vmov 13  }
0x151e   : > { %2018 = vperm.xlu1 %3906, %v270_v50   ;;  %v6121_v50 = vmov 3  }
0x151f   : > { %v390_v14 = vadd.f32 %v4478_v61, %v376_v18  ;;  %v6132_v18 = vmov 15  }
0x1521   : > { %v413_v55 = vadd.f32 %v4456_v15, %v390_v14  ;;  %v6125_v15 = vmov 8   ;;  %v6133_v14 = vmov 16  }
0x1522   : > { %2035 = vperm.xlu1 %3906, %v5112_v63  }
0x1523   : > { %v427_v13 = vadd.f32 %v4480_v59, %v413_v55  ;;  %v6135_v55 = vmov 18  }
0x1525   : > { %v441_v9 = vadd.f32 %v4482_v12, %v427_v13 }
0x1526   : > { %3908 = vset.pattern.permute.xlu1 %v6120_v57  ;;  %v6131_v57 = vmov 14  }
0x1527   : > { %2055 = vperm.xlu1 %3908, %v5112_v63   ;;  %v455_v39 = vadd.f32 %v4484_v62, %v441_v9 }
0x1529   : > { %v478_v61 = vadd.f32 %v4458_v19, %v455_v39 }
0x152b   : > { %3909 = vset.pattern.permute.xlu1 %v6121_v50  ;;  %v492_v59 = vadd.f32 %v4486_v21, %v478_v61  ;;  %v6134_v50 = vmov 17   ;;  %v6136_v61 = vld [vmem:[#allocation15_spill] sm:$0xff] }
0x152c   : > { %2065 = vperm.xlu1 %3909, %v5112_v63  }
0x152d   : > { %v506_v8 = vadd.f32 %v4488_v17, %v492_v59 }
0x152f   : > { %v520_v12 = vadd.f32 %v4490_v24, %v506_v8 }
0x1530   : > { %3911 = vset.pattern.permute.xlu1 %v6122_v60 }
0x1531   : > { %2090 = vperm.xlu1 %3911, %v5112_v63   ;;  %v543_v62 = vadd.f32 %v4460_v20, %v520_v12  ;;  %v6129_v20 = vmov 12  }
0x1533   : > { %v557_v19 = vadd.f32 %v4492_v58, %v543_v62  ;;  %v6141_v62 = vld [vmem:[#allocation21_spill] sm:$0xff] }
0x1535   : > { %3912 = vset.pattern.permute.xlu1 %v6123_v23  ;;  %v571_v21 = vadd.f32 %v4494_v37, %v557_v19 }
0x1536   : > { %2104 = vperm.xlu1 %3912, %v5112_v63  }
0x1537   : > { %v585_v17 = vadd.f32 %v4496_v56, %v571_v21 }
0x1539   : > { %v608_v24 = vadd.f32 %v4462_v4, %v585_v17  ;;  %v2009_v17 = vrot.slane %v5077_v45, %v4296_v40 }
0x153a   : > { %3913 = vset.pattern.permute.xlu1 %v6124_v46 }
0x153b   : > { %2118 = vperm.xlu1 %3913, %v5112_v63   ;;  %v622_v52 = vadd.f32 %v4498_v54, %v608_v24 }
0x153d   : > { %v636_v58 = vadd.f32 %v4500_v53, %v622_v52 }
0x153f   : > { %3914 = vset.pattern.permute.xlu1 %v6125_v15  ;;  %v650_v37 = vadd.f32 %v4502_v35, %v636_v58  ;;  %v6144_v58 = vld [vmem:[#allocation25_spill] sm:$0xff] }
0x1540   : > { %2133 = vperm.xlu1 %3914, %v5112_v63  }
0x1541   : > { %v673_v56 = vadd.f32 %v4464_v34, %v650_v37  ;;  %v6145_v37 = vld [vmem:[#allocation26_spill] sm:$0xff] }
0x1543   : > { %v687_v4 = vadd.f32 %v4504_v51, %v673_v56 }
0x1544   : > { %3915 = vset.pattern.permute.xlu1 %v6126_v3 }
0x1545   : > { %2147 = vperm.xlu1 %3915, %v5112_v63   ;;  %v701_v53 = vadd.f32 %v4506_v27, %v687_v4 }
0x1547   : > { %v715_v54 = vadd.f32 %v4508_v49, %v701_v53 }
0x1549   : > { %3916 = vset.pattern.permute.xlu1 %v6127_v16  ;;  %v738_v35 = vadd.f32 %v4466_v47, %v715_v54  ;;  %v6142_v16 = vld [vmem:[#allocation23_spill] sm:$0xff]  ;;  %v6148_v54 = vld [vmem:[#allocation30_spill] sm:$0xff] }
0x154a   : > { %2161 = vperm.xlu1 %3916, %v5112_v63  }
0x154b   : > { %v752_v34 = vadd.f32 %v4510_v48, %v738_v35  ;;  %v6149_v35 = vld [vmem:[#allocation31_spill] sm:$0xff] }
0x154d   : > { %v766_v51 = vadd.f32 %v4512_v32, %v752_v34 }
0x154e   : > { %3917 = vset.pattern.permute.xlu1 %v6128_v33  ;;  %v6143_v33 = vld [vmem:[#allocation24_spill] sm:$0xff] }
0x154f   : > { %2175 = vperm.xlu1 %3917, %v5112_v63   ;;  %v780_v27 = vadd.f32 %v4518_v43, %v766_v51  ;;  %v6151_v51 = vld [vmem:[#allocation34_spill] sm:$0xff] }
0x1551   : > { %v803_v49 = vadd.f32 %v4530_v29, %v780_v27  ;;  %v6137_v29 = vld [vmem:[#allocation16_spill] sm:$0xff]  ;;  %v6152_v27 = vld [vmem:[#allocation35_spill] sm:$0xff] }
0x1553   : > { %3918 = vset.pattern.permute.xlu1 %v6129_v20  ;;  %v817_v13 = vadd.f32 %v4540_v38, %v803_v49 }
0x1554   : > { %2190 = vperm.xlu1 %3918, %v5112_v63  }
0x1555   : > { %v831_v47 = vadd.f32 %v4542_v36, %v817_v13  ;;  %v1981_v36 = vrot.slane %v5077_v45, %v4253_v6  ;;  %v6153_v13 = vld [vmem:[#allocation36_spill] sm:$0xff] }
0x1557   : > { %v845_v60 = vadd.f32 %v4548_v22, %v831_v47  ;;  %v6138_v22 = vld [vmem:[#allocation18_spill] sm:$0xff] }
0x1558   : > { %3919 = vset.pattern.permute.xlu1 %v6130_v11 }
0x1559   : > { %2204 = vperm.xlu1 %3919, %v5112_v63   ;;  %v868_v48 = vadd.f32 %v4560_v2, %v845_v60  ;;  %v6154_v60 = vld [vmem:[#allocation38_spill] sm:$0xff] }
0x155b   : > { %v882_v9 = vadd.f32 %v4570_v7, %v868_v48  ;;  %v6139_v7 = vld [vmem:[#allocation19_spill] sm:$0xff] }
0x155d   : > { %3920 = vset.pattern.permute.xlu1 %v6131_v57  ;;  %v896_v23 = vadd.f32 %v4572_v30, %v882_v9  ;;  %v6140_v30 = vld [vmem:[#allocation20_spill] sm:$0xff]  ;;  %v6155_v9 = vld [vmem:[#allocation39_spill] sm:$0xff] }
0x155e   : > { %2218 = vperm.xlu1 %3920, %v5112_v63   ;;  %v6146_v57 = vld [vmem:[#allocation28_spill] sm:$0xff] }
0x155f   : > { %v910_v32 = vadd.f32 %v4578_v41, %v896_v23 }
0x1561   : > { %v933_v39 = vadd.f32 %v4590_v5, %v910_v32  ;;  %v1995_v5 = vrot.slane %v5077_v45, %v4277_v31  ;;  %v6156_v32 = vld [vmem:[#allocation40_spill] sm:$0xff] }
0x1562   : > { %3921 = vset.pattern.permute.xlu1 %v6132_v18  ;;  %v6147_v18 = vld [vmem:[#allocation29_spill] sm:$0xff] }
0x1563   : > { %2232 = vperm.xlu1 %3921, %v5112_v63   ;;  %v947_v43 = vadd.f32 %v6136_v61, %v933_v39  ;;  %v6157_v61 = vld [vmem:[#allocation41_spill] sm:$0xff] }
0x1565   : > { %v961_v38 = vadd.f32 %v6137_v29, %v947_v43  ;;  %v6158_v29 = vld [vmem:[#allocation43_spill] sm:$0xff] }
0x1567   : > { %3922 = vset.pattern.permute.xlu1 %v6133_v14  ;;  %v975_v59 = vadd.f32 %v6138_v22, %v961_v38 }
0x1568   : > { %2247 = vperm.xlu1 %3922, %v5112_v63  }
0x1569   : > { %v998_v8 = vadd.f32 %v6139_v7, %v975_v59  ;;  %v6160_v59 = vld [vmem:[#allocation45_spill] sm:$0xff] }
0x156b   : > { %v1012_v41 = vadd.f32 %v6140_v30, %v998_v8  ;;  %v6162_v8 = vld [vmem:[#allocation48_spill] sm:$0xff] }
0x156c   : > { %3923 = vset.pattern.permute.xlu1 %v6134_v50  ;;  %v6150_v50 = vld [vmem:[#allocation33_spill] sm:$0xff] }
0x156d   : > { %2261 = vperm.xlu1 %3923, %v5112_v63   ;;  %v1026_v3 = vadd.f32 %v6141_v62, %v1012_v41  ;;  %v6163_v41 = vld [vmem:[#allocation49_spill] sm:$0xff] }
0x156f   : > { %v1040_v21 = vadd.f32 %v6142_v16, %v1026_v3  ;;  %v6165_v3 = vld [vmem:[#allocation51_spill] sm:$0xff]  ;;  %v6166_v16 = vld [vmem:[#allocation53_spill] sm:$0xff] }
0x1571   : > { %3924 = vset.pattern.permute.xlu1 %v6135_v55  ;;  %v1063_v24 = vadd.f32 %v6143_v33, %v1040_v21  ;;  %v6167_v33 = vld [vmem:[#allocation54_spill] sm:$0xff] }
0x1573   : > { %v1077_v11 = vadd.f32 %v6144_v58, %v1063_v24  ;;  %v6169_v58 = vld [vmem:[#allocation57_spill] sm:$0xff] }
0x1575   : > { %v1091_v56 = vadd.f32 %v6145_v37, %v1077_v11 }
0x1577   : > { %v1105_v4 = vadd.f32 %v6146_v57, %v1091_v56  ;;  %v6170_v56 = vld [vmem:[#allocation58_spill] sm:$0xff] }
0x1579   : > { %v1128_v53 = vadd.f32 %v6147_v18, %v1105_v4  ;;  %v6171_v4 = vld [vmem:[#allocation59_spill] sm:$0xff] }
0x157b   : > { %v1142_v14 = vadd.f32 %v6148_v54, %v1128_v53  ;;  %v6172_v53 = vld [vmem:[#allocation61_spill] sm:$0xff] }
0x157d   : > { %v5185_v46 = vpop.permute.xlu1 %1970  ;;  %v1156_v34 = vadd.f32 %v6149_v35, %v1142_v14  ;;  %v6173_v35 = vld [vmem:[#allocation62_spill] sm:$0xff] }
0x157f   : > { %v1170_v45 = vadd.f32 %v6150_v50, %v1156_v34  ;;  %v6174_v50 = vld [vmem:[#allocation63_spill] sm:$0xff] }
0x1581   : > { %v1193_v55 = vadd.f32 %v6151_v51, %v1170_v45  ;;  %v6175_v45 = vld [vmem:[#allocation65_spill] sm:$0xff] }
0x1583   : > { %v1207_v49 = vadd.f32 %v6152_v27, %v1193_v55  ;;  %v6176_v27 = vld [vmem:[#allocation66_spill] sm:$0xff] }
0x1585   : > { %v1221_v47 = vadd.f32 %v6153_v13, %v1207_v49  ;;  %v6177_v13 = vld [vmem:[#allocation67_spill] sm:$0xff] }
0x1587   : > { %v1235_v48 = vadd.f32 %v6154_v60, %v1221_v47  ;;  %v6178_v47 = vld [vmem:[#allocation69_spill] sm:$0xff] }
0x1589   : > { %v1258_v23 = vadd.f32 %v6155_v9, %v1235_v48  ;;  %v6179_v48 = vld [vmem:[#allocation70_spill] sm:$0xff] }
0x158a   : > { %v1976_v2 = vpop.permute.xlu1 %1975 }
0x158b   : > { %v1982_v15 = vmul.f32 %v1981_v36, %v1976_v2  ;;  %v1272_v39 = vadd.f32 %v6156_v32, %v1258_v23  ;;  %v6159_v36 = vld [vmem:[#allocation44_spill] sm:$0xff]  ;;  %v6180_v23 = vld [vmem:[#allocation71_spill] sm:$0xff] }
0x158d   : > { %1984 = vrot.lane.b32.xlu0 %v1982_v15, %s4188_s11  ;;  %v1286_v43 = vadd.f32 %v6157_v61, %v1272_v39  ;;  %v6161_v15 = vld [vmem:[#allocation46_spill] sm:$0xff]  ;;  %v6181_v39 = vld [vmem:[#allocation72_spill] sm:$0xff] }
0x158e   : > { %v6182_v61 = vld [vmem:[#allocation74_spill] sm:$0xff] }
0x158f   : > { %v1990_v12 = vpop.permute.xlu1 %1989  ;;  %v1300_v38 = vadd.f32 %v6158_v29, %v1286_v43  ;;  %v6183_v29 = vld [vmem:[#allocation75_spill] sm:$0xff] }
0x1590   : > { %v1996_v19 = vmul.f32 %v1995_v5, %v1990_v12  ;;  %v6164_v12 = vld [vmem:[#allocation50_spill] sm:$0xff] }
0x1591   : > { %v1323_v22 = vadd.f32 %v6159_v36, %v1300_v38  ;;  %v6184_v36 = vld [vmem:[#allocation76_spill] sm:$0xff] }
0x1592   : > { %1998 = vrot.lane.b32.xlu0 %v1996_v19, %s4188_s11 }
0x1593   : > { %v1337_v2 = vadd.f32 %v6160_v59, %v1323_v22  ;;  %v6185_v59 = vld [vmem:[#allocation77_spill] sm:$0xff] }
0x1594   : > { %v2004_v20 = vpop.permute.xlu1 %2003 }
0x1595   : > { %v2010_v52 = vmul.f32 %v2009_v17, %v2004_v20  ;;  %v1351_v7 = vadd.f32 %v6161_v15, %v1337_v2  ;;  %v6168_v20 = vld [vmem:[#allocation55_spill] sm:$0xff] }
0x1596   : > { %v6186_v2 = vld [vmem:[#allocation79_spill] sm:$0xff] }
0x1597   : > { %2012 = vrot.lane.b32.xlu0 %v2010_v52, %s4188_s11  ;;  %v1365_v30 = vadd.f32 %v6162_v8, %v1351_v7  ;;  %v6187_v8 = vld [vmem:[#allocation80_spill] sm:$0xff] }
0x1599   : > { %v1388_v5 = vadd.f32 %v6163_v41, %v1365_v30  ;;  %v6188_v41 = vld [vmem:[#allocation81_spill] sm:$0xff] }
0x159b   : > { %v1402_v62 = vadd.f32 %v6164_v12, %v1388_v5  ;;  %v6189_v12 = vld [vmem:[#allocation83_spill] sm:$0xff] }
0x159d   : > { %v1416_v19 = vadd.f32 %v6165_v3, %v1402_v62 }
0x159f   : > { %v1430_v21 = vadd.f32 %v6166_v16, %v1416_v19  ;;  %v6190_v19 = vld [vmem:[#allocation84_spill] sm:$0xff] }
0x15a1   : > { %v1453_v17 = vadd.f32 %v4843_v1, %v1430_v21 }
0x15a3   : > { %v1467_v24 = vadd.f32 %v6167_v33, %v1453_v17  ;;  %v6191_v17 = vld [vmem:[#allocation85_spill] sm:$0xff] }
0x15a5   : > { %v1481_v52 = vadd.f32 %v6168_v20, %v1467_v24  ;;  %v6192_v24 = vld [vmem:[#allocation87_spill] sm:$0xff] }
0x15a7   : > { %v1495_v11 = vadd.f32 %v6169_v58, %v1481_v52 }
0x15a9   : > { %v1518_v37 = vadd.f32 %v4873_v10, %v1495_v11 }
0x15ab   : > { %v1532_v57 = vadd.f32 %v6170_v56, %v1518_v37 }
0x15ad   : > { %v1546_v18 = vadd.f32 %v6171_v4, %v1532_v57  ;;  %v2019_v57 = vpop.permute.xlu1 %2018 }
0x15af   : > { %v1560_v54 = vadd.f32 %v6172_v53, %v1546_v18  ;;  %v6194_v53 = vmov 78  }
0x15b1   : > { %v1583_v14 = vadd.f32 %v4903_v28, %v1560_v54  ;;  %v5264_v54 = vpop.permute.xlu1 %2035 }
0x15b3   : > { %v1597_v34 = vadd.f32 %v6173_v35, %v1583_v14 }
0x15b5   : > { %v1611_v1 = vadd.f32 %v6174_v50, %v1597_v34 }
0x15b7   : > { %v1625_v51 = vadd.f32 %v6175_v45, %v1611_v1 }
0x15b9   : > { %v1648_v55 = vadd.f32 %v4933_v25, %v1625_v51 }
0x15bb   : > { %v1662_v49 = vadd.f32 %v6176_v27, %v1648_v55  ;;  %v6195_v55 = vld [vmem:[#allocation4_spill] sm:$0xff] }
0x15bd   : > { %v1676_v10 = vadd.f32 %v6177_v13, %v1662_v49 }
0x15bf   : > { %v1690_v60 = vadd.f32 %v6178_v47, %v1676_v10 }
0x15c1   : > { %v1713_v9 = vadd.f32 %v6179_v48, %v1690_v60  ;;  %v6196_v60 = vld [vmem:[#allocation5_spill] sm:$0xff] }
0x15c3   : > { %v1727_v32 = vadd.f32 %v6180_v23, %v1713_v9 }
0x15c5   : > { %v1741_v28 = vadd.f32 %v6181_v39, %v1727_v32 }
0x15c7   : > { %v1755_v43 = vadd.f32 %v6182_v61, %v1741_v28 }
0x15c9   : > { %v1778_v38 = vadd.f32 %v6183_v29, %v1755_v43  ;;  %v6197_v43 = vld [vmem:[#allocation6_spill] sm:$0xff] }
0x15cb   : > { %v1792_v22 = vadd.f32 %v6184_v36, %v1778_v38 }
0x15cd   : > { %v1806_v25 = vadd.f32 %v6185_v59, %v1792_v22 }
0x15cf   : > { %v1820_v15 = vadd.f32 %v6186_v2, %v1806_v25  ;;  %v6198_v25 = vmov 19  }
0x15d1   : > { %v1843_v7 = vadd.f32 %v5028_v44, %v1820_v15 }
0x15d3   : > { %v1857_v30 = vadd.f32 %v6187_v8, %v1843_v7 }
0x15d5   : > { %v1871_v5 = vadd.f32 %v6188_v41, %v1857_v30  ;;  %v6199_v30 = vmov 20   ;;  %v6200_v41 = vld [vmem:[#allocation7_spill] sm:$0xff] }
0x15d7   : > { %v1885_v62 = vadd.f32 %v6189_v12, %v1871_v5 }
0x15d9   : > { %v1908_v3 = vadd.f32 %v5058_v26, %v1885_v62  ;;  %v6193_v26 = vmov 4  }
0x15db   : > { %v1922_v16 = vadd.f32 %v6190_v19, %v1908_v3  ;;  %v6201_v19 = vmov 21  }
0x15dd   : > { %v1936_v33 = vadd.f32 %v6191_v17, %v1922_v16 }
0x15df   : > { %v1950_v20 = vadd.f32 %v6192_v24, %v1936_v33  ;;  %v6202_v33 = vmov 22  }
0x15e1   : > { %v1973_v52 = vadd.f32 %v5185_v46, %v1950_v20  ;;  %v5266_v46 = vpop.permute.xlu1 %2055 }
0x15e5   : > { %v5268_v14 = vpop.permute.xlu1 %2065 }
0x15e9   : > { %v2091_v35 = vpop.permute.xlu1 %2090 }
0x15ed   : > { %v2105_v34 = vpop.permute.xlu1 %2104 }
0x15f1   : > { %v2119_v1 = vpop.permute.xlu1 %2118 }
0x15f5   : > { %v2134_v45 = vpop.permute.xlu1 %2133 }
0x15f9   : > { %v2148_v13 = vpop.permute.xlu1 %2147 }
0x15fd   : > { %v2162_v39 = vpop.permute.xlu1 %2161 }
0x15ff   : > { %v1985_v21 = vpop.permute.xlu0 %1984 }
0x1600   : > { %v1987_v11 = vadd.f32 %v1985_v21, %v1973_v52 }
0x1601   : > { %v2176_v22 = vpop.permute.xlu1 %2175 }
0x1604   : > { %v1999_v58 = vpop.permute.xlu0 %1998 }
0x1605   : > { %v2001_v44 = vadd.f32 %v1999_v58, %v1987_v11  ;;  %v2191_v15 = vpop.permute.xlu1 %2190  ;;  %v6203_v11 = vmov 23  }
0x1609   : > { %v2013_v37 = vpop.permute.xlu0 %2012  ;;  %v2205_v3 = vpop.permute.xlu1 %2204 }
0x160a   : > { %v2015_v56 = vadd.f32 %v2013_v37, %v2001_v44 }
0x160c   : > { %v2021_v4 = vadd.f32 %v2019_v57, %v2015_v56  ;;  %v6204_v57 = vld [vmem:[#allocation8_spill] sm:$0xff] }
0x160d   : > { %v2219_v17 = vpop.permute.xlu1 %2218 }
0x160e   : > { %v2022_v18 = vmax.f32 %v2021_v4, 0.0 }
0x1610   : > { %2027 = vrot.lane.b32.xlu0 %v2022_v18, %s4038_s8  ;;  %v6205_v18 = vmov 24  }
0x1611   : > { %v2233_v44 = vpop.permute.xlu1 %2232 }
0x1614   : > { %2045 = vperm.xlu0 %3907, %v5112_v63  }
0x1618   : > { %3910 = vset.pattern.permute.xlu0 %v6193_v26  ;;  %v2248_v26 = vpop.permute.xlu1 %2247 }
0x1619   : > { %2076 = vperm.xlu0 %3910, %v5112_v63  }
0x161d   : > { %3984 = vset.pattern.permute.xlu0 %v6194_v53 }
0x1682   : > { %v2028_v50 = vpop.permute.xlu0 %2027 }
0x1683   : > { %2030 = vst.msk [vmem:[#allocation3] sm:$0xf] %vm277_vm1, %v2028_v50 }
0x168a   : > { %v5271_v51 = vld [vmem:[#allocation3] sm:$0xf] }
0x168b   : > { %v2074_v27 = vmul.f32 %v5271_v51, %v6195_v55  ;;  %v2131_v29 = vmul.f32 %v5271_v51, %v6197_v43  ;;  %v2188_v5 = vmul.f32 %v5271_v51, %v6200_v41  ;;  %v2245_v4 = vmul.f32 %v5271_v51, %v6204_v57 }
0x168c   : > { %v6207_v55 = vmov 26   ;;  %v6218_v43 = vmov 37  }
0x168d   : > { %v2096_v10 = vrot.slane %v2074_v27, %v4253_v6  ;;  %v2082_v48 = vrot.slane %v2074_v27, %v6196_v60  ;;  %v2110_v9 = vrot.slane %v2074_v27, %v4277_v31  ;;  %v2124_v61 = vrot.slane %v2074_v27, %v4296_v40 }
0x168e   : > { %v2139_v36 = vrot.slane %v2131_v29, %v6196_v60  ;;  %v2153_v2 = vrot.slane %v2131_v29, %v4253_v6  ;;  %v2167_v8 = vrot.slane %v2131_v29, %v4277_v31  ;;  %v2181_v62 = vrot.slane %v2131_v29, %v4296_v40 }
0x168f   : > { %v5275_v49 = vpop.permute.xlu0 %2045  ;;  %v2097_v47 = vmul.f32 %v2096_v10, %v2091_v35  ;;  %v2111_v28 = vmul.f32 %v2110_v9, %v2105_v34  ;;  %v2125_v38 = vmul.f32 %v2124_v61, %v2119_v1  ;;  %v2196_v21 = vrot.slane %v2188_v5, %v6196_v60 }
0x1690   : > { %v2140_v59 = vmul.f32 %v2139_v36, %v2134_v45  ;;  %v2154_v7 = vmul.f32 %v2153_v2, %v2148_v13  ;;  %v2168_v12 = vmul.f32 %v2167_v8, %v2162_v39  ;;  %v2182_v16 = vmul.f32 %v2181_v62, %v2176_v22  ;;  %v2262_v45 = vpop.permute.xlu1 %2261 }
0x1691   : > { %2099 = vrot.lane.b32.xlu0 %v2097_v47, %s4071_s15  ;;  %v2197_v24 = vmul.f32 %v2196_v21, %v2191_v15  ;;  %v2210_v20 = vrot.slane %v2188_v5, %v4253_v6  ;;  %v2224_v52 = vrot.slane %v2188_v5, %v4277_v31  ;;  %v2238_v56 = vrot.slane %v2188_v5, %v4296_v40  ;;  %v6225_v5 = vld [vmem:[#allocation9_spill] sm:$0xff] }
0x1692   : > { %v2253_v35 = vrot.slane %v2245_v4, %v6196_v60  ;;  %v6206_v34 = vmov 25   ;;  %v2267_v1 = vrot.slane %v2245_v4, %v4253_v6  ;;  %v6208_v13 = vmov 27  }
0x1693   : > { %v2211_v58 = vmul.f32 %v2210_v20, %v2205_v3  ;;  %v2225_v37 = vmul.f32 %v2224_v52, %v2219_v17  ;;  %v2239_v53 = vmul.f32 %v2238_v56, %v2233_v44  ;;  %v6209_v10 = vmov 28  }
0x1694   : > { %v2077_v23 = vpop.permute.xlu0 %2076  ;;  %v2254_v50 = vmul.f32 %v2253_v35, %v2248_v26  ;;  %v2268_v27 = vmul.f32 %v2267_v1, %v2262_v45  ;;  %v6210_v47 = vmov 29   ;;  %v6212_v9 = vmov 31  }
0x1695   : > { %v2083_v32 = vmul.f32 %v2082_v48, %v2077_v23  ;;  %2113 = vrot.lane.b32.xlu0 %v2111_v28, %s4071_s15  ;;  %v6211_v48 = vmov 30   ;;  %v6213_v23 = vmov 32   ;;  %v6215_v39 = vmov 34  }
0x1696   : > { %v6216_v28 = vmov 35   ;;  %v6217_v61 = vmov 36   ;;  %v6219_v29 = vmov 38   ;;  %v6221_v36 = vmov 40  }
0x1697   : > { %2085 = vrot.lane.b32.xlu1 %v2083_v32, %s4071_s15  ;;  %v6214_v32 = vmov 33   ;;  %v6222_v22 = vmov 41   ;;  %v2281_v2 = vrot.slane %v2245_v4, %v4277_v31  ;;  %v6224_v8 = vmov 43  }
0x1698   : > { %v6226_v3 = vmov 44   ;;  %v6227_v17 = vmov 45   ;;  %v6228_v52 = vmov 46   ;;  %v6232_v1 = vmov 49  }
0x1699   : > { %2127 = vrot.lane.b32.xlu0 %v2125_v38, %s4071_s15  ;;  %v6220_v38 = vmov 39  }
0x169b   : > { %2275 = vperm.xlu1 %3924, %v5112_v63  }
0x169d   : > { %2142 = vrot.lane.b32.xlu0 %v2140_v59, %s4072_s16 }
0x169f   : > { %3925 = vset.pattern.permute.xlu1 %v6198_v25  ;;  %v6223_v25 = vmov 42  }
0x16a0   : > { %2289 = vperm.xlu1 %3925, %v5112_v63  }
0x16a1   : > { %2156 = vrot.lane.b32.xlu0 %v2154_v7, %s4072_s16 }
0x16a4   : > { %3926 = vset.pattern.permute.xlu1 %v6199_v30  ;;  %v2295_v30 = vrot.slane %v2245_v4, %v4296_v40  ;;  %v6230_v4 = vld [vmem:[#allocation10_spill] sm:$0xff] }
0x16a5   : > { %2304 = vperm.xlu1 %3926, %v5112_v63   ;;  %2170 = vrot.lane.b32.xlu0 %v2168_v12, %s4072_s16  ;;  %v2302_v12 = vmul.f32 %v5271_v51, %v6225_v5 }
0x16a7   : > { %v2352_v56 = vrot.slane %v2302_v12, %v4296_v40 }
0x16a9   : > { %3927 = vset.pattern.permute.xlu1 %v6201_v19  ;;  %2184 = vrot.lane.b32.xlu0 %v2182_v16, %s4072_s16  ;;  %v2310_v19 = vrot.slane %v2302_v12, %v6196_v60  ;;  %s6289_s16 = smov 102  }
0x16aa   : > { %2318 = vperm.xlu1 %3927, %v5112_v63  }
0x16ad   : > { %2199 = vrot.lane.b32.xlu0 %v2197_v24, %s4073_s17 }
0x16ae   : > { %3928 = vset.pattern.permute.xlu1 %v6202_v33  ;;  %v2324_v33 = vrot.slane %v2302_v12, %v4253_v6 }
0x16af   : > { %2332 = vperm.xlu1 %3928, %v5112_v63  }
0x16b1   : > { %2213 = vrot.lane.b32.xlu0 %v2211_v58, %s4073_s17  ;;  %v2338_v58 = vrot.slane %v2302_v12, %v4277_v31 }
0x16b3   : > { %3929 = vset.pattern.permute.xlu1 %v6203_v11 }
0x16b4   : > { %2346 = vperm.xlu1 %3929, %v5112_v63  }
0x16b5   : > { %2227 = vrot.lane.b32.xlu0 %v2225_v37, %s4073_s17  ;;  %v6229_v37 = vmov 47  }
0x16b8   : > { %3930 = vset.pattern.permute.xlu1 %v6205_v18  ;;  %v2359_v18 = vmul.f32 %v5271_v51, %v6230_v4 }
0x16b9   : > { %2361 = vperm.xlu1 %3930, %v5112_v63   ;;  %2241 = vrot.lane.b32.xlu0 %v2239_v53, %s4073_s17  ;;  %v6231_v53 = vmov 48   ;;  %s6294_s17 = smov 96  }
0x16ba   : > { %v2367_v35 = vrot.slane %v2359_v18, %v6196_v60  ;;  %v2381_v45 = vrot.slane %v2359_v18, %v4253_v6 }
0x16bd   : > { %3931 = vset.pattern.permute.xlu1 %v6206_v34  ;;  %2256 = vrot.lane.b32.xlu0 %v2254_v50, %s4074_s18 }
0x16be   : > { %2375 = vperm.xlu1 %3931, %v5112_v63  }
0x16c1   : > { %2270 = vrot.lane.b32.xlu0 %v2268_v27, %s4074_s18 }
0x16c2   : > { %3932 = vset.pattern.permute.xlu1 %v6207_v55 }
0x16c3   : > { %2389 = vperm.xlu1 %3932, %v5112_v63  }
0x16c7   : > { %3933 = vset.pattern.permute.xlu1 %v6208_v13  ;;  %v6233_v13 = vmov 50  }
0x16c8   : > { %2403 = vperm.xlu1 %3933, %v5112_v63  }
0x16cc   : > { %3934 = vset.pattern.permute.xlu1 %v6209_v10  ;;  %v2395_v10 = vrot.slane %v2359_v18, %v4277_v31 }
0x16cd   : > { %2418 = vperm.xlu1 %3934, %v5112_v63  }
0x16d1   : > { %3935 = vset.pattern.permute.xlu1 %v6210_v47 }
0x16d2   : > { %2432 = vperm.xlu1 %3935, %v5112_v63  }
0x16d6   : > { %3936 = vset.pattern.permute.xlu1 %v6211_v48 }
0x16d7   : > { %2446 = vperm.xlu1 %3936, %v5112_v63  }
0x16db   : > { %3937 = vset.pattern.permute.xlu1 %v6212_v9 }
0x16dc   : > { %2460 = vperm.xlu1 %3937, %v5112_v63  }
0x16e0   : > { %3938 = vset.pattern.permute.xlu1 %v6213_v23  ;;  %v6234_v23 = vmov 51  }
0x16e1   : > { %2475 = vperm.xlu1 %3938, %v5112_v63  }
0x16e5   : > { %3939 = vset.pattern.permute.xlu1 %v6214_v32  ;;  %v2409_v32 = vrot.slane %v2359_v18, %v4296_v40 }
0x16e6   : > { %2489 = vperm.xlu1 %3939, %v5112_v63  }
0x16ea   : > { %3940 = vset.pattern.permute.xlu1 %v6215_v39 }
0x16eb   : > { %2503 = vperm.xlu1 %3940, %v5112_v63  }
0x16ef   : > { %3941 = vset.pattern.permute.xlu1 %v6216_v28  ;;  %v6235_v28 = vld [vmem:[#allocation11_spill] sm:$0xff] }
0x16f0   : > { %2517 = vperm.xlu1 %3941, %v5112_v63  }
0x16f4   : > { %3942 = vset.pattern.permute.xlu1 %v6217_v61  ;;  %v2416_v61 = vmul.f32 %v5271_v51, %v6235_v28 }
0x16f5   : > { %2532 = vperm.xlu1 %3942, %v5112_v63  }
0x16f6   : > { %v2452_v12 = vrot.slane %v2416_v61, %v4277_v31 }
0x16f9   : > { %3943 = vset.pattern.permute.xlu1 %v6218_v43 }
0x16fa   : > { %2546 = vperm.xlu1 %3943, %v5112_v63  }
0x16fe   : > { %3944 = vset.pattern.permute.xlu1 %v6219_v29  ;;  %v6236_v29 = vmov 52  }
0x16ff   : > { %2560 = vperm.xlu1 %3944, %v5112_v63  }
0x1703   : > { %3945 = vset.pattern.permute.xlu1 %v6220_v38  ;;  %v5399_v48 = vpop.permute.xlu0 %2099 }
0x1704   : > { %2574 = vperm.xlu1 %3945, %v5112_v63  }
0x1707   : > { %v5408_v38 = vpop.permute.xlu0 %2113 }
0x1708   : > { %3946 = vset.pattern.permute.xlu1 %v6221_v36  ;;  %v2424_v36 = vrot.slane %v2416_v61, %v6196_v60 }
0x1709   : > { %2589 = vperm.xlu1 %3946, %v5112_v63   ;;  %v5358_v59 = vpop.permute.xlu1 %2085 }
0x170d   : > { %3947 = vset.pattern.permute.xlu1 %v6222_v22 }
0x170e   : > { %2603 = vperm.xlu1 %3947, %v5112_v63  }
0x1712   : > { %3948 = vset.pattern.permute.xlu1 %v6223_v25 }
0x1713   : > { %2617 = vperm.xlu1 %3948, %v5112_v63  }
0x1716   : > { %v2276_v15 = vpop.permute.xlu1 %2275 }
0x1717   : > { %v2282_v7 = vmul.f32 %v2281_v2, %v2276_v15  ;;  %3949 = vset.pattern.permute.xlu1 %v6224_v8  ;;  %v6237_v2 = vmov 53   ;;  %v5415_v15 = vpop.permute.xlu0 %2127 }
0x1718   : > { %2631 = vperm.xlu1 %3949, %v5112_v63  }
0x1719   : > { %2284 = vrot.lane.b32.xlu0 %v2282_v7, %s4074_s18  ;;  %v2438_v7 = vrot.slane %v2416_v61, %v4253_v6 }
0x171b   : > { %v2290_v41 = vpop.permute.xlu1 %2289  ;;  %v5422_v5 = vpop.permute.xlu0 %2142 }
0x171c   : > { %v2296_v62 = vmul.f32 %v2295_v30, %v2290_v41  ;;  %3950 = vset.pattern.permute.xlu1 %v6226_v3  ;;  %v6238_v41 = vmov 54  }
0x171d   : > { %2646 = vperm.xlu1 %3950, %v5112_v63  }
0x171e   : > { %2298 = vrot.lane.b32.xlu0 %v2296_v62, %s4074_s18  ;;  %s6296_s18 = smov 95  }
0x1720   : > { %v2305_v16 = vpop.permute.xlu1 %2304 }
0x1721   : > { %v2311_v21 = vmul.f32 %v2310_v19, %v2305_v16  ;;  %3951 = vset.pattern.permute.xlu1 %v6227_v17  ;;  %v6239_v19 = vmov 55   ;;  %v2466_v16 = vrot.slane %v2416_v61, %v4296_v40  ;;  %v6247_v61 = vmov 61  }
0x1722   : > { %2660 = vperm.xlu1 %3951, %v5112_v63  }
0x1723   : > { %2313 = vrot.lane.b32.xlu0 %v2311_v21, %s4075_s19  ;;  %v5429_v21 = vpop.permute.xlu0 %2156 }
0x1725   : > { %v2319_v24 = vpop.permute.xlu1 %2318 }
0x1726   : > { %v2325_v20 = vmul.f32 %v2324_v33, %v2319_v24  ;;  %3952 = vset.pattern.permute.xlu1 %v6228_v52  ;;  %v6240_v33 = vld [vmem:[#allocation12_spill] sm:$0xff]  ;;  %v6241_v52 = vmov 56  }
0x1727   : > { %2674 = vperm.xlu1 %3952, %v5112_v63   ;;  %v2473_v24 = vmul.f32 %v5271_v51, %v6240_v33 }
0x1728   : > { %2327 = vrot.lane.b32.xlu0 %v2325_v20, %s4075_s19 }
0x172a   : > { %v2333_v11 = vpop.permute.xlu1 %2332 }
0x172b   : > { %v2339_v44 = vmul.f32 %v2338_v58, %v2333_v11  ;;  %3953 = vset.pattern.permute.xlu1 %v6229_v37  ;;  %v2481_v58 = vrot.slane %v2473_v24, %v6196_v60 }
0x172c   : > { %2688 = vperm.xlu1 %3953, %v5112_v63  }
0x172d   : > { %2341 = vrot.lane.b32.xlu0 %v2339_v44, %s4075_s19  ;;  %v5437_v44 = vpop.permute.xlu0 %2170 }
0x172f   : > { %v2347_v57 = vpop.permute.xlu1 %2346 }
0x1730   : > { %v2353_v26 = vmul.f32 %v2352_v56, %v2347_v57  ;;  %3954 = vset.pattern.permute.xlu1 %v6231_v53  ;;  %v6242_v56 = vmov 57   ;;  %v2495_v57 = vrot.slane %v2473_v24, %v4253_v6 }
0x1731   : > { %2703 = vperm.xlu1 %3954, %v5112_v63   ;;  %v5444_v53 = vpop.permute.xlu0 %2184 }
0x1732   : > { %2355 = vrot.lane.b32.xlu0 %v2353_v26, %s4075_s19  ;;  %v6243_v26 = vmov 58   ;;  %s6308_s19 = smov 94  }
0x1734   : > { %v2362_v34 = vpop.permute.xlu1 %2361 }
0x1735   : > { %v2368_v50 = vmul.f32 %v2367_v35, %v2362_v34  ;;  %3955 = vset.pattern.permute.xlu1 %v6232_v1  ;;  %v2509_v35 = vrot.slane %v2473_v24, %v4277_v31  ;;  %v6244_v1 = vmov 59  }
0x1736   : > { %2717 = vperm.xlu1 %3955, %v5112_v63  }
0x1737   : > { %2370 = vrot.lane.b32.xlu0 %v2368_v50, %s4076_s20 }
0x1739   : > { %v2376_v55 = vpop.permute.xlu1 %2375 }
0x173a   : > { %v2382_v27 = vmul.f32 %v2381_v45, %v2376_v55  ;;  %3956 = vset.pattern.permute.xlu1 %v6233_v13  ;;  %v5451_v45 = vpop.permute.xlu0 %2199  ;;  %v2523_v55 = vrot.slane %v2473_v24, %v4296_v40  ;;  %v6245_v13 = vld [vmem:[#allocation13_spill] sm:$0xff] }
0x173b   : > { %2731 = vperm.xlu1 %3956, %v5112_v63  }
0x173c   : > { %2384 = vrot.lane.b32.xlu0 %v2382_v27, %s4076_s20 }
0x173e   : > { %v2390_v47 = vpop.permute.xlu1 %2389 }
0x173f   : > { %v2396_v9 = vmul.f32 %v2395_v10, %v2390_v47  ;;  %3957 = vset.pattern.permute.xlu1 %v6234_v23  ;;  %v2530_v10 = vmul.f32 %v5271_v51, %v6245_v13  ;;  %v5460_v23 = vpop.permute.xlu0 %2213  ;;  %v6255_v13 = vld [vmem:[#allocation17_spill] sm:$0xff] }
0x1740   : > { %2745 = vperm.xlu1 %3957, %v5112_v63  }
0x1741   : > { %2398 = vrot.lane.b32.xlu0 %v2396_v9, %s4076_s20  ;;  %v6246_v9 = vmov 60  }
0x1743   : > { %v2404_v39 = vpop.permute.xlu1 %2403 }
0x1744   : > { %v2410_v43 = vmul.f32 %v2409_v32, %v2404_v39  ;;  %3958 = vset.pattern.permute.xlu1 %v6236_v29  ;;  %v2538_v32 = vrot.slane %v2530_v10, %v6196_v60  ;;  %v5467_v29 = vpop.permute.xlu0 %2227 }
0x1745   : > { %2760 = vperm.xlu1 %3958, %v5112_v63  }
0x1746   : > { %2412 = vrot.lane.b32.xlu0 %v2410_v43, %s4076_s20  ;;  %v2552_v43 = vrot.slane %v2530_v10, %v4253_v6  ;;  %s6310_s20 = smov 92  }
0x1748   : > { %v2419_v22 = vpop.permute.xlu1 %2418 }
0x1749   : > { %v2425_v25 = vmul.f32 %v2424_v36, %v2419_v22  ;;  %3959 = vset.pattern.permute.xlu1 %v6237_v2  ;;  %v2566_v2 = vrot.slane %v2530_v10, %v4277_v31 }
0x174a   : > { %2774 = vperm.xlu1 %3959, %v5112_v63  }
0x174b   : > { %2427 = vrot.lane.b32.xlu0 %v2425_v25, %s4077_s23  ;;  %v6248_v25 = vmov 62  }
0x174d   : > { %v2433_v8 = vpop.permute.xlu1 %2432 }
0x174e   : > { %v2439_v30 = vmul.f32 %v2438_v7, %v2433_v8  ;;  %3960 = vset.pattern.permute.xlu1 %v6238_v41  ;;  %v5473_v8 = vpop.permute.xlu0 %2241  ;;  %v6249_v41 = vmov 63  }
0x174f   : > { %2788 = vperm.xlu1 %3960, %v5112_v63  }
0x1750   : > { %2441 = vrot.lane.b32.xlu0 %v2439_v30, %s4077_s23 }
0x1752   : > { %v2447_v62 = vpop.permute.xlu1 %2446  ;;  %v5482_v33 = vpop.permute.xlu0 %2256 }
0x1753   : > { %v2453_v3 = vmul.f32 %v2452_v12, %v2447_v62  ;;  %3961 = vset.pattern.permute.xlu1 %v6239_v19  ;;  %v2580_v12 = vrot.slane %v2530_v10, %v4296_v40  ;;  %v2644_v10 = vmul.f32 %v5271_v51, %v6255_v13 }
0x1754   : > { %2802 = vperm.xlu1 %3961, %v5112_v63  }
0x1755   : > { %2455 = vrot.lane.b32.xlu0 %v2453_v3, %s4077_s23  ;;  %v6250_v3 = vld [vmem:[#allocation14_spill] sm:$0xff] }
0x1756   : > { %v2587_v19 = vmul.f32 %v5271_v51, %v6250_v3  ;;  %v6259_v3 = vmov 71  }
0x1757   : > { %v2461_v17 = vpop.permute.xlu1 %2460 }
0x1758   : > { %v2467_v20 = vmul.f32 %v2466_v16, %v2461_v17  ;;  %3962 = vset.pattern.permute.xlu1 %v6241_v52  ;;  %v6251_v17 = vmov 64   ;;  %v2595_v24 = vrot.slane %v2587_v19, %v6196_v60 }
0x1759   : > { %2817 = vperm.xlu1 %3962, %v5112_v63  }
0x175a   : > { %2469 = vrot.lane.b32.xlu0 %v2467_v20, %s4077_s23  ;;  %s6312_s23 = smov 91  }
0x175c   : > { %v2476_v11 = vpop.permute.xlu1 %2475 }
0x175d   : > { %v2482_v37 = vmul.f32 %v2481_v58, %v2476_v11  ;;  %3963 = vset.pattern.permute.xlu1 %v6242_v56  ;;  %v6252_v58 = vmov 65   ;;  %v5489_v11 = vpop.permute.xlu0 %2270 }
0x175e   : > { %2831 = vperm.xlu1 %3963, %v5112_v63  }
0x175f   : > { %2484 = vrot.lane.b32.xlu0 %v2482_v37, %s4081_s27  ;;  %v2609_v37 = vrot.slane %v2587_v19, %v4253_v6 }
0x1761   : > { %v2490_v4 = vpop.permute.xlu1 %2489 }
0x1762   : > { %v2496_v18 = vmul.f32 %v2495_v57, %v2490_v4  ;;  %3964 = vset.pattern.permute.xlu1 %v6243_v26  ;;  %v6253_v4 = vmov 66   ;;  %v2623_v26 = vrot.slane %v2587_v19, %v4277_v31 }
0x1763   : > { %2845 = vperm.xlu1 %3964, %v5112_v63  }
0x1764   : > { %2498 = vrot.lane.b32.xlu0 %v2496_v18, %s4081_s27 }
0x1766   : > { %v2504_v34 = vpop.permute.xlu1 %2503 }
0x1767   : > { %v2510_v50 = vmul.f32 %v2509_v35, %v2504_v34  ;;  %3965 = vset.pattern.permute.xlu1 %v6244_v1 }
0x1768   : > { %2859 = vperm.xlu1 %3965, %v5112_v63  }
0x1769   : > { %2512 = vrot.lane.b32.xlu0 %v2510_v50, %s4081_s27  ;;  %v6254_v50 = vmov 67  }
0x176b   : > { %v2518_v27 = vpop.permute.xlu1 %2517 }
0x176c   : > { %v2524_v47 = vmul.f32 %v2523_v55, %v2518_v27  ;;  %3966 = vset.pattern.permute.xlu1 %v6246_v9  ;;  %v2637_v55 = vrot.slane %v2587_v19, %v4296_v40  ;;  %v6256_v9 = vmov 68  }
0x176d   : > { %2874 = vperm.xlu1 %3966, %v5112_v63  }
0x176e   : > { %2526 = vrot.lane.b32.xlu0 %v2524_v47, %s4081_s27  ;;  %s6314_s27 = smov 90  }
0x1770   : > { %v2533_v39 = vpop.permute.xlu1 %2532 }
0x1771   : > { %v2539_v28 = vmul.f32 %v2538_v32, %v2533_v39  ;;  %3967 = vset.pattern.permute.xlu1 %v6247_v61  ;;  %v2652_v39 = vrot.slane %v2644_v10, %v6196_v60 }
0x1772   : > { %2888 = vperm.xlu1 %3967, %v5112_v63  }
0x1773   : > { %2541 = vrot.lane.b32.xlu0 %v2539_v28, %s4087_s29 }
0x1775   : > { %v2547_v36 = vpop.permute.xlu1 %2546 }
0x1776   : > { %v2553_v22 = vmul.f32 %v2552_v43, %v2547_v36  ;;  %3968 = vset.pattern.permute.xlu1 %v6248_v25  ;;  %v6257_v43 = vmov 69  }
0x1777   : > { %2902 = vperm.xlu1 %3968, %v5112_v63  }
0x1778   : > { %2555 = vrot.lane.b32.xlu0 %v2553_v22, %s4087_s29  ;;  %v2666_v22 = vrot.slane %v2644_v10, %v4253_v6 }
0x177a   : > { %v2561_v7 = vpop.permute.xlu1 %2560 }
0x177b   : > { %v2567_v30 = vmul.f32 %v2566_v2, %v2561_v7  ;;  %3969 = vset.pattern.permute.xlu1 %v6249_v41  ;;  %v6258_v7 = vmov 70   ;;  %v2680_v41 = vrot.slane %v2644_v10, %v4277_v31 }
0x177c   : > { %2916 = vperm.xlu1 %3969, %v5112_v63  }
0x177d   : > { %2569 = vrot.lane.b32.xlu0 %v2567_v30, %s4087_s29 }
0x177f   : > { %v2575_v62 = vpop.permute.xlu1 %2574 }
0x1780   : > { %v2581_v16 = vmul.f32 %v2580_v12, %v2575_v62  ;;  %3970 = vset.pattern.permute.xlu1 %v6251_v17 }
0x1781   : > { %2931 = vperm.xlu1 %3970, %v5112_v63  }
0x1782   : > { %2583 = vrot.lane.b32.xlu0 %v2581_v16, %s4087_s29  ;;  %v2694_v16 = vrot.slane %v2644_v10, %v4296_v40  ;;  %s6316_s29 = smov 88  }
0x1784   : > { %v2590_v20 = vpop.permute.xlu1 %2589 }
0x1785   : > { %v2596_v52 = vmul.f32 %v2595_v24, %v2590_v20  ;;  %3971 = vset.pattern.permute.xlu1 %v6252_v58  ;;  %v6260_v24 = vld [vmem:[#allocation22_spill] sm:$0xff]  ;;  %v6261_v58 = vmov 72  }
0x1786   : > { %2945 = vperm.xlu1 %3971, %v5112_v63   ;;  %v2701_v20 = vmul.f32 %v5271_v51, %v6260_v24 }
0x1787   : > { %2598 = vrot.lane.b32.xlu0 %v2596_v52, %s4093_s7 }
0x1788   : > { %v2737_v10 = vrot.slane %v2701_v20, %v4277_v31 }
0x1789   : > { %v2604_v56 = vpop.permute.xlu1 %2603 }
0x178a   : > { %v2610_v57 = vmul.f32 %v2609_v37, %v2604_v56  ;;  %3972 = vset.pattern.permute.xlu1 %v6253_v4  ;;  %v2709_v56 = vrot.slane %v2701_v20, %v6196_v60 }
0x178b   : > { %2959 = vperm.xlu1 %3972, %v5112_v63   ;;  %v5495_v18 = vpop.permute.xlu0 %2284 }
0x178c   : > { %2612 = vrot.lane.b32.xlu0 %v2610_v57, %s4093_s7 }
0x178e   : > { %v2618_v35 = vpop.permute.xlu1 %2617 }
0x178f   : > { %v2624_v34 = vmul.f32 %v2623_v26, %v2618_v35  ;;  %3973 = vset.pattern.permute.xlu1 %v6254_v50  ;;  %v6262_v26 = vmov 73  }
0x1790   : > { %2973 = vperm.xlu1 %3973, %v5112_v63   ;;  %v5501_v1 = vpop.permute.xlu0 %2298 }
0x1791   : > { %2626 = vrot.lane.b32.xlu0 %v2624_v34, %s4093_s7  ;;  %v2723_v34 = vrot.slane %v2701_v20, %v4253_v6 }
0x1793   : > { %v2632_v27 = vpop.permute.xlu1 %2631 }
0x1794   : > { %v2638_v47 = vmul.f32 %v2637_v55, %v2632_v27  ;;  %3974 = vset.pattern.permute.xlu1 %v6256_v9  ;;  %v6263_v27 = vmov 74  }
0x1795   : > { %2988 = vperm.xlu1 %3974, %v5112_v63   ;;  %v5509_v32 = vpop.permute.xlu0 %2313 }
0x1796   : > { %2640 = vrot.lane.b32.xlu0 %v2638_v47, %s4093_s7  ;;  %s6318_s7 = smov 87  }
0x1798   : > { %v2647_v28 = vpop.permute.xlu1 %2646 }
0x1799   : > { %v2653_v61 = vmul.f32 %v2652_v39, %v2647_v28  ;;  %3975 = vset.pattern.permute.xlu1 %v6257_v43  ;;  %v6264_v39 = vmov 75  }
0x179a   : > { %3002 = vperm.xlu1 %3975, %v5112_v63   ;;  %v5515_v36 = vpop.permute.xlu0 %2327 }
0x179b   : > { %2655 = vrot.lane.b32.xlu0 %v2653_v61, %s4099_s10  ;;  %v2751_v61 = vrot.slane %v2701_v20, %v4296_v40 }
0x179d   : > { %v2661_v25 = vpop.permute.xlu1 %2660 }
0x179e   : > { %v2667_v2 = vmul.f32 %v2666_v22, %v2661_v25  ;;  %3976 = vset.pattern.permute.xlu1 %v6258_v7  ;;  %v6265_v22 = vld [vmem:[#allocation27_spill] sm:$0xff] }
0x179f   : > { %3016 = vperm.xlu1 %3976, %v5112_v63   ;;  %v5521_v30 = vpop.permute.xlu0 %2341  ;;  %v2758_v25 = vmul.f32 %v5271_v51, %v6265_v22 }
0x17a0   : > { %2669 = vrot.lane.b32.xlu0 %v2667_v2, %s4099_s10  ;;  %v6266_v2 = vld [vmem:[#allocation88_spill] sm:$0xff] }
0x17a1   : > { %v2032_v7 = vmul.f32 %v5271_v51, %v6266_v2 }
0x17a2   : > { %v2675_v12 = vpop.permute.xlu1 %2674 }
0x17a3   : > { %v2681_v62 = vmul.f32 %v2680_v41, %v2675_v12  ;;  %3977 = vset.pattern.permute.xlu1 %v6259_v3  ;;  %v6267_v12 = vmov 76   ;;  %v2766_v3 = vrot.slane %v2758_v25, %v6196_v60 }
0x17a4   : > { %3030 = vperm.xlu1 %3977, %v5112_v63   ;;  %v5527_v19 = vpop.permute.xlu0 %2355 }
0x17a5   : > { %2683 = vrot.lane.b32.xlu0 %v2681_v62, %s4099_s10 }
0x17a7   : > { %v2689_v17 = vpop.permute.xlu1 %2688 }
0x17a8   : > { %v2695_v52 = vmul.f32 %v2694_v16, %v2689_v17  ;;  %3978 = vset.pattern.permute.xlu1 %v6261_v58  ;;  %v2041_v16 = vrot.slane %v2032_v7, %v6196_v60  ;;  %v2051_v17 = vrot.slane %v2032_v7, %v4253_v6 }
0x17a9   : > { %3045 = vperm.xlu1 %3978, %v5112_v63   ;;  %v5535_v37 = vpop.permute.xlu0 %2370 }
0x17aa   : > { %2697 = vrot.lane.b32.xlu0 %v2695_v52, %s4099_s10  ;;  %v6268_v52 = vmov 77  }
0x17ac   : > { %v2704_v57 = vpop.permute.xlu1 %2703 }
0x17ad   : > { %v2710_v4 = vmul.f32 %v2709_v56, %v2704_v57  ;;  %3979 = vset.pattern.permute.xlu1 %v6262_v26  ;;  %v2042_v56 = vmul.f32 %v2041_v16, %v5264_v54  ;;  %v2052_v57 = vmul.f32 %v2051_v17, %v5275_v49  ;;  %v2071_v54 = vrot.slane %v2032_v7, %v4296_v40 }
0x17ae   : > { %3059 = vperm.xlu1 %3979, %v5112_v63   ;;  %v5541_v35 = vpop.permute.xlu0 %2384  ;;  %v6272_v17 = vmov 82  }
0x17af   : > { %2712 = vrot.lane.b32.xlu0 %v2710_v4, %s4105_s12  ;;  %v2780_v4 = vrot.slane %v2758_v25, %v4253_v6  ;;  %v2072_v2 = vmul.f32 %v2071_v54, %v5268_v14 }
0x17b1   : > { %v2718_v50 = vpop.permute.xlu1 %2717 }
0x17b2   : > { %v2724_v55 = vmul.f32 %v2723_v34, %v2718_v50  ;;  %3980 = vset.pattern.permute.xlu1 %v6263_v27  ;;  %v2061_v34 = vrot.slane %v2032_v7, %v4277_v31 }
0x17b3   : > { %3073 = vperm.xlu1 %3980, %v5112_v63   ;;  %v5547_v13 = vpop.permute.xlu0 %2398 }
0x17b4   : > { %2726 = vrot.lane.b32.xlu0 %v2724_v55, %s4105_s12  ;;  %v6269_v55 = vmov 79   ;;  %v2062_v49 = vmul.f32 %v2061_v34, %v5266_v46 }
0x17b6   : > { %v2732_v47 = vpop.permute.xlu1 %2731 }
0x17b7   : > { %v2738_v9 = vmul.f32 %v2737_v10, %v2732_v47  ;;  %3981 = vset.pattern.permute.xlu1 %v6264_v39  ;;  %v2053_v10 = vadd.f32 %v2052_v57, %v2042_v56  ;;  %v2794_v47 = vrot.slane %v2758_v25, %v4277_v31  ;;  %v6273_v56 = vmov 83  }
0x17b8   : > { %3087 = vperm.xlu1 %3981, %v5112_v63   ;;  %v5553_v28 = vpop.permute.xlu0 %2412  ;;  %v5565_v63 = vld [vmem:[%s5875_s4] sm:$0xff] }
0x17b9   : > { %2740 = vrot.lane.b32.xlu0 %v2738_v9, %s4105_s12 }
0x17bb   : > { %v2746_v43 = vpop.permute.xlu1 %2745 }
0x17bc   : > { %v2752_v41 = vmul.f32 %v2751_v61, %v2746_v43  ;;  %3982 = vset.pattern.permute.xlu1 %v6267_v12  ;;  %v6270_v61 = vmov 80   ;;  %v2063_v43 = vadd.f32 %v2062_v49, %v2053_v10 }
0x17bd   : > { %3102 = vperm.xlu1 %3982, %v5565_v63   ;;  %v5568_v62 = vpop.permute.xlu0 %2427 }
0x17be   : > { %2754 = vrot.lane.b32.xlu0 %v2752_v41, %s4105_s12  ;;  %v2808_v41 = vrot.slane %v2758_v25, %v4296_v40  ;;  %v2073_v46 = vadd.f32 %v2072_v2, %v2063_v43  ;;  %v6276_v2 = vld [vmem:[#allocation37_spill] sm:$0xff] }
0x17c0   : > { %v2761_v24 = vpop.permute.xlu1 %2760 }
0x17c1   : > { %v2767_v20 = vmul.f32 %v2766_v3, %v2761_v24  ;;  %3983 = vset.pattern.permute.xlu1 %v6268_v52  ;;  %v6271_v3 = vld [vmem:[#allocation32_spill] sm:$0xff] }
0x17c2   : > { %3116 = vperm.xlu1 %3983, %v5565_v63   ;;  %v5576_v58 = vpop.permute.xlu0 %2441  ;;  %v2815_v7 = vmul.f32 %v5271_v51, %v6271_v3 }
0x17c3   : > { %2769 = vrot.lane.b32.xlu0 %v2767_v20, %s4110_s24  ;;  %v2088_v20 = vadd.f32 %v5358_v59, %v2073_v46 }
0x17c4   : > { %v2823_v14 = vrot.slane %v2815_v7, %v6196_v60 }
0x17c5   : > { %v2775_v26 = vpop.permute.xlu1 %2774  ;;  %v2102_v57 = vadd.f32 %v5399_v48, %v2088_v20  ;;  %v2851_v48 = vrot.slane %v2815_v7, %v4277_v31  ;;  %v6278_v20 = vmov 89  }
0x17c6   : > { %v2781_v50 = vmul.f32 %v2780_v4, %v2775_v26  ;;  %3985 = vset.pattern.permute.xlu1 %v6269_v55  ;;  %v2837_v26 = vrot.slane %v2815_v7, %v4253_v6  ;;  %v6274_v55 = vmov 85  }
0x17c7   : > { %3144 = vperm.xlu1 %3985, %v5565_v63   ;;  %v5585_v27 = vpop.permute.xlu0 %2455  ;;  %v2116_v59 = vadd.f32 %v5408_v38, %v2102_v57 }
0x17c8   : > { %2783 = vrot.lane.b32.xlu0 %v2781_v50, %s4110_s24 }
0x17ca   : > { %v2789_v9 = vpop.permute.xlu1 %2788 }
0x17cb   : > { %v2795_v39 = vmul.f32 %v2794_v47, %v2789_v9  ;;  %3986 = vset.pattern.permute.xlu1 %v6270_v61  ;;  %v2130_v47 = vadd.f32 %v5415_v15, %v2116_v59  ;;  %v6275_v9 = vmov 86   ;;  %v2865_v61 = vrot.slane %v2815_v7, %v4296_v40 }
0x17cc   : > { %3159 = vperm.xlu1 %3986, %v5565_v63   ;;  %v5593_v22 = vpop.permute.xlu0 %2469  ;;  %v6277_v15 = vmov 88  }
0x17cd   : > { %2797 = vrot.lane.b32.xlu0 %v2795_v39, %s4110_s24  ;;  %v2145_v39 = vadd.f32 %v5422_v5, %v2130_v47 }
0x17cf   : > { %v2803_v12 = vpop.permute.xlu1 %2802  ;;  %v2159_v46 = vadd.f32 %v5429_v21, %v2145_v39 }
0x17d0   : > { %v2809_v16 = vmul.f32 %v2808_v41, %v2803_v12  ;;  %3988 = vset.pattern.permute.xlu1 %v6272_v17  ;;  %v2872_v41 = vmul.f32 %v5271_v51, %v6276_v2 }
0x17d1   : > { %3187 = vperm.xlu1 %3988, %v5565_v63   ;;  %v5602_v24 = vpop.permute.xlu0 %2484  ;;  %v2173_v5 = vadd.f32 %v5437_v44, %v2159_v46  ;;  %v6283_v46 = vmov 95  }
0x17d2   : > { %2811 = vrot.lane.b32.xlu0 %v2809_v16, %s4110_s24  ;;  %v2880_v16 = vrot.slane %v2872_v41, %v6196_v60  ;;  %v2908_v59 = vrot.slane %v2872_v41, %v4277_v31  ;;  %s3625_s24 = sshll.u32 %s6320_s22, 3 }
0x17d4   : > { %v2818_v52 = vpop.permute.xlu1 %2817 }
0x17d5   : > { %v2824_v25 = vmul.f32 %v2823_v14, %v2818_v52  ;;  %3989 = vset.pattern.permute.xlu1 %v6273_v56  ;;  %v2187_v14 = vadd.f32 %v5444_v53, %v2173_v5 }
0x17d6   : > { %3201 = vperm.xlu1 %3989, %v5565_v63   ;;  %v5610_v4 = vpop.permute.xlu0 %2498 }
0x17d7   : > { %2826 = vrot.lane.b32.xlu0 %v2824_v25, %s4116_s26  ;;  %v2202_v21 = vadd.f32 %v5451_v45, %v2187_v14  ;;  %v2894_v25 = vrot.slane %v2872_v41, %v4253_v6 }
0x17d9   : > { %v2832_v34 = vpop.permute.xlu1 %2831  ;;  %v2216_v57 = vadd.f32 %v5460_v23, %v2202_v21 }
0x17da   : > { %v2838_v50 = vmul.f32 %v2837_v26, %v2832_v34  ;;  %3991 = vset.pattern.permute.xlu1 %v6274_v55  ;;  %v6279_v26 = vmov 91  }
0x17db   : > { %3230 = vperm.xlu1 %3991, %v5565_v63   ;;  %v5617_v10 = vpop.permute.xlu0 %2512  ;;  %v2230_v53 = vadd.f32 %v5467_v29, %v2216_v57  ;;  %v6285_v57 = vmov 98  }
0x17dc   : > { %2840 = vrot.lane.b32.xlu0 %v2838_v50, %s4116_s26 }
0x17dd   : > { %v2244_v45 = vadd.f32 %v5473_v8, %v2230_v53 }
0x17de   : > { %v2846_v54 = vpop.permute.xlu1 %2845 }
0x17df   : > { %v2852_v49 = vmul.f32 %v2851_v48, %v2846_v54  ;;  %3992 = vset.pattern.permute.xlu1 %v6275_v9  ;;  %v6280_v48 = vmov 92   ;;  %v2259_v23 = vadd.f32 %v5482_v33, %v2244_v45  ;;  %v2922_v54 = vrot.slane %v2872_v41, %v4296_v40  ;;  %v6281_v9 = vld [vmem:[#allocation42_spill] sm:$0xff] }
0x17e0   : > { %3244 = vperm.xlu1 %3992, %v5565_v63   ;;  %v5624_v38 = vpop.permute.xlu0 %2526  ;;  %v2929_v8 = vmul.f32 %v5271_v51, %v6281_v9 }
0x17e1   : > { %2854 = vrot.lane.b32.xlu0 %v2852_v49, %s4116_s26  ;;  %v2273_v29 = vadd.f32 %v5489_v11, %v2259_v23 }
0x17e2   : > { %v2937_v11 = vrot.slane %v2929_v8, %v6196_v60  ;;  %v2951_v5 = vrot.slane %v2929_v8, %v4253_v6  ;;  %v2965_v21 = vrot.slane %v2929_v8, %v4277_v31 }
0x17e3   : > { %v2860_v43 = vpop.permute.xlu1 %2859  ;;  %v2287_v39 = vadd.f32 %v5495_v18, %v2273_v29 }
0x17e4   : > { %v2866_v12 = vmul.f32 %v2865_v61, %v2860_v43  ;;  %3994 = vset.pattern.permute.xlu1 %v6277_v15  ;;  %v6282_v43 = vmov 94  }
0x17e5   : > { %3273 = vperm.xlu1 %3994, %v5565_v63   ;;  %v5633_v3 = vpop.permute.xlu0 %2541  ;;  %v2301_v2 = vadd.f32 %v5501_v1, %v2287_v39 }
0x17e6   : > { %2868 = vrot.lane.b32.xlu0 %v2866_v12, %s4116_s26 }
0x17e7   : > { %v2316_v41 = vadd.f32 %v5509_v32, %v2301_v2 }
0x17e8   : > { %v2875_v7 = vpop.permute.xlu1 %2874 }
0x17e9   : > { %v2881_v17 = vmul.f32 %v2880_v16, %v2875_v7  ;;  %3995 = vset.pattern.permute.xlu1 %v6278_v20  ;;  %v2330_v18 = vadd.f32 %v5515_v36, %v2316_v41  ;;  %v6284_v20 = vmov 97  }
0x17ea   : > { %3287 = vperm.xlu1 %3995, %v5565_v63   ;;  %v5642_v52 = vpop.permute.xlu0 %2555 }
0x17eb   : > { %2883 = vrot.lane.b32.xlu0 %v2881_v17, %s4122_s30  ;;  %v2344_v1 = vadd.f32 %v5521_v30, %v2330_v18 }
0x17ed   : > { %v2889_v56 = vpop.permute.xlu1 %2888  ;;  %v2358_v17 = vadd.f32 %v5527_v19, %v2344_v1  ;;  %v5728_v1 = vld [vmem:[#allocation3] sm:$0xf] }
0x17ee   : > { %v2895_v44 = vmul.f32 %v2894_v25, %v2889_v56  ;;  %3997 = vset.pattern.permute.xlu1 %v6279_v26  ;;  %v2979_v26 = vrot.slane %v2929_v8, %v4296_v40 }
0x17ef   : > { %3315 = vperm.xlu1 %3997, %v5565_v63   ;;  %v5650_v34 = vpop.permute.xlu0 %2569  ;;  %v2373_v36 = vadd.f32 %v5535_v37, %v2358_v17 }
0x17f0   : > { %2897 = vrot.lane.b32.xlu0 %v2895_v44, %s4122_s30 }
0x17f1   : > { %v2387_v30 = vadd.f32 %v5541_v35, %v2373_v36 }
0x17f2   : > { %v2903_v50 = vpop.permute.xlu1 %2902 }
0x17f3   : > { %v2909_v55 = vmul.f32 %v2908_v59, %v2903_v50  ;;  %3998 = vset.pattern.permute.xlu1 %v6280_v48  ;;  %v2401_v19 = vadd.f32 %v5547_v13, %v2387_v30  ;;  %v6286_v59 = vld [vmem:[#allocation47_spill] sm:$0xff] }
0x17f4   : > { %3330 = vperm.xlu1 %3998, %v5565_v63   ;;  %v5659_v47 = vpop.permute.xlu0 %2583  ;;  %v2986_v35 = vmul.f32 %v5271_v51, %v6286_v59 }
0x17f5   : > { %2911 = vrot.lane.b32.xlu0 %v2909_v55, %s4122_s30  ;;  %v2415_v37 = vadd.f32 %v5553_v28, %v2401_v19  ;;  %v6287_v55 = vmov 100  }
0x17f6   : > { %v2994_v28 = vrot.slane %v2986_v35, %v6196_v60  ;;  %v3022_v2 = vrot.slane %v2986_v35, %v4277_v31 }
0x17f7   : > { %v2917_v49 = vpop.permute.xlu1 %2916  ;;  %v2430_v45 = vadd.f32 %v5568_v62, %v2415_v37 }
0x17f8   : > { %v2923_v61 = vmul.f32 %v2922_v54, %v2917_v49  ;;  %4000 = vset.pattern.permute.xlu1 %v6282_v43  ;;  %v6288_v49 = vmov 101  }
0x17f9   : > { %3358 = vperm.xlu1 %4000, %v5565_v63   ;;  %v5669_v33 = vpop.permute.xlu0 %2598  ;;  %v2444_v48 = vadd.f32 %v5576_v58, %v2430_v45  ;;  %v3008_v58 = vrot.slane %v2986_v35, %v4253_v6 }
0x17fa   : > { %2925 = vrot.lane.b32.xlu0 %v2923_v61, %s4122_s30 }
0x17fb   : > { %v2458_v23 = vadd.f32 %v5585_v27, %v2444_v48  ;;  %v6290_v27 = vmov 103  }
0x17fc   : > { %v2932_v12 = vpop.permute.xlu1 %2931 }
0x17fd   : > { %v2938_v15 = vmul.f32 %v2937_v11, %v2932_v12  ;;  %4001 = vset.pattern.permute.xlu1 %v6283_v46  ;;  %v2472_v51 = vadd.f32 %v5593_v22, %v2458_v23  ;;  %v6291_v12 = vmov 104  }
0x17fe   : > { %3372 = vperm.xlu1 %4001, %v5565_v63   ;;  %v5678_v16 = vpop.permute.xlu0 %2612 }
0x17ff   : > { %2940 = vrot.lane.b32.xlu0 %v2938_v15, %s4128_s14  ;;  %v2487_v9 = vadd.f32 %v5602_v24, %v2472_v51 }
0x1801   : > { %v2946_v7 = vpop.permute.xlu1 %2945  ;;  %v2501_v39 = vadd.f32 %v5610_v4, %v2487_v9 }
0x1802   : > { %v2952_v32 = vmul.f32 %v2951_v5, %v2946_v7  ;;  %4003 = vset.pattern.permute.xlu1 %v6284_v20  ;;  %v6292_v5 = vld [vmem:[#allocation52_spill] sm:$0xff] }
0x1803   : > { %3401 = vperm.xlu1 %4003, %v5565_v63   ;;  %v5686_v14 = vpop.permute.xlu0 %2626  ;;  %v2515_v22 = vadd.f32 %v5617_v10, %v2501_v39  ;;  %v3036_v10 = vrot.slane %v2986_v35, %v4296_v40 }
0x1804   : > { %2954 = vrot.lane.b32.xlu0 %v2952_v32, %s4128_s14  ;;  %v6293_v32 = vmov 106  }
0x1805   : > { %v2529_v11 = vadd.f32 %v5624_v38, %v2515_v22  ;;  %v3043_v38 = vmul.f32 %v5728_v1, %v6292_v5  ;;  %v6301_v5 = vmov 93  }
0x1806   : > { %v2960_v25 = vpop.permute.xlu1 %2959 }
0x1807   : > { %v2966_v56 = vmul.f32 %v2965_v21, %v2960_v25  ;;  %4004 = vset.pattern.permute.xlu1 %v6285_v57  ;;  %v2544_v4 = vadd.f32 %v5633_v3, %v2529_v11  ;;  %v6298_v11 = vmov 84  }
0x1808   : > { %3415 = vperm.xlu1 %4004, %v5565_v63   ;;  %v5695_v44 = vpop.permute.xlu0 %2640 }
0x1809   : > { %2968 = vrot.lane.b32.xlu0 %v2966_v56, %s4128_s14  ;;  %v2558_v46 = vadd.f32 %v5642_v52, %v2544_v4  ;;  %v3051_v52 = vrot.slane %v3043_v38, %v6196_v60 }
0x180b   : > { %v2974_v53 = vpop.permute.xlu1 %2973  ;;  %v2572_v7 = vadd.f32 %v5650_v34, %v2558_v46  ;;  %v6300_v46 = vmov 90  }
0x180c   : > { %v2980_v50 = vmul.f32 %v2979_v26, %v2974_v53  ;;  %4006 = vset.pattern.permute.xlu1 %v6287_v55  ;;  %v6295_v55 = vld [vmem:[#allocation56_spill] sm:$0xff] }
0x180d   : > { %3444 = vperm.xlu1 %4006, %v5565_v63   ;;  %v2656_v13 = vpop.permute.xlu0 %2655  ;;  %v2586_v20 = vadd.f32 %v5659_v47, %v2572_v7  ;;  %v3065_v47 = vrot.slane %v3043_v38, %v4253_v6  ;;  %v5753_v48 = vmul.f32 %v5728_v1, %v6295_v55 }
0x180e   : > { %2982 = vrot.lane.b32.xlu0 %v2980_v50, %s4128_s14  ;;  %v3093_v50 = vrot.slane %v3043_v38, %v4296_v40  ;;  %s249_s14 = scalar_lea.vmem %s5877_s6, %s3625_s24 }
0x180f   : > { %v2601_v36 = vadd.f32 %v5669_v33, %v2586_v20  ;;  %v6303_v20 = vmov 99  }
0x1810   : > { %v2989_v29 = vpop.permute.xlu1 %2988 }
0x1811   : > { %v2995_v54 = vmul.f32 %v2994_v28, %v2989_v29  ;;  %4007 = vset.pattern.permute.xlu1 %v6288_v49  ;;  %v2615_v34 = vadd.f32 %v5678_v16, %v2601_v36 }
0x1812   : > { %3458 = vperm.xlu1 %4007, %v5565_v63   ;;  %v2670_v62 = vpop.permute.xlu0 %2669 }
0x1813   : > { %2997 = vrot.lane.b32.xlu0 %v2995_v54, %s6289_s16  ;;  %v2629_v56 = vadd.f32 %v5686_v14, %v2615_v34  ;;  %v3108_v54 = vrot.slane %v5753_v48, %v6196_v60 }
0x1815   : > { %v3003_v8 = vpop.permute.xlu1 %3002  ;;  %v2643_v19 = vadd.f32 %v5695_v44, %v2629_v56  ;;  %v6305_v56 = vmov 105  }
0x1816   : > { %v3009_v61 = vmul.f32 %v3008_v58, %v3003_v8  ;;  %4009 = vset.pattern.permute.xlu1 %v6290_v27 }
0x1817   : > { %3486 = vperm.xlu1 %4009, %v5565_v63   ;;  %v2684_v43 = vpop.permute.xlu0 %2683  ;;  %v2658_v26 = vadd.f32 %v2656_v13, %v2643_v19 }
0x1818   : > { %3011 = vrot.lane.b32.xlu0 %v3009_v61, %s6289_s16 }
0x1819   : > { %v2672_v16 = vadd.f32 %v2670_v62, %v2658_v26  ;;  %v3150_v26 = vrot.slane %v5753_v48, %v4296_v40 }
0x181a   : > { %v3017_v24 = vpop.permute.xlu1 %3016 }
0x181b   : > { %v3023_v41 = vmul.f32 %v3022_v2, %v3017_v24  ;;  %4010 = vset.pattern.permute.xlu1 %v6291_v12  ;;  %v2686_v35 = vadd.f32 %v2684_v43, %v2672_v16  ;;  %v6297_v43 = vmov 81   ;;  %v6299_v12 = vmov 87  }
0x181c   : > { %3501 = vperm.xlu1 %4010, %v5565_v63   ;;  %v2698_v15 = vpop.permute.xlu0 %2697 }
0x181d   : > { %3025 = vrot.lane.b32.xlu0 %v3023_v41, %s6289_s16  ;;  %v2700_v14 = vadd.f32 %v2698_v15, %v2686_v35 }
0x181f   : > { %v3031_v18 = vpop.permute.xlu1 %3030 }
0x1820   : > { %v3037_v17 = vmul.f32 %v3036_v10, %v3031_v18  ;;  %4012 = vset.pattern.permute.xlu1 %v6293_v32 }
0x1821   : > { %3529 = vperm.xlu1 %4012, %v5565_v63   ;;  %v2713_v3 = vpop.permute.xlu0 %2712 }
0x1822   : > { %3039 = vrot.lane.b32.xlu0 %v3037_v17, %s6289_s16  ;;  %v2715_v13 = vadd.f32 %v2713_v3, %v2700_v14  ;;  %v6302_v17 = vmov 96  }
0x1824   : > { %v3046_v21 = vpop.permute.xlu1 %3045 }
0x1825   : > { %v3052_v30 = vmul.f32 %v3051_v52, %v3046_v21  ;;  %4013 = vset.pattern.permute.xlu1 %v4190_v0  ;;  %v3079_v0 = vrot.slane %v3043_v38, %v4277_v31  ;;  %v6304_v21 = vmov 102  }
0x1826   : > { %3543 = vperm.xlu1 %4013, %v5565_v63   ;;  %v2727_v25 = vpop.permute.xlu0 %2726 }
0x1827   : > { %3054 = vrot.lane.b32.xlu0 %v3052_v30, %s6294_s17  ;;  %v2729_v29 = vadd.f32 %v2727_v25, %v2715_v13 }
0x1829   : > { %v3060_v57 = vpop.permute.xlu1 %3059 }
0x182a   : > { %v3066_v37 = vmul.f32 %v3065_v47, %v3060_v57  ;;  %4014 = vset.pattern.permute.xlu1 %v6119_v42  ;;  %v3122_v47 = vrot.slane %v5753_v48, %v4253_v6 }
0x182b   : > { %v2741_v33 = vpop.permute.xlu0 %2740 }
0x182c   : > { %3068 = vrot.lane.b32.xlu0 %v3066_v37, %s6294_s17  ;;  %v2743_v49 = vadd.f32 %v2741_v33, %v2729_v29 }
0x182e   : > { %v3074_v53 = vpop.permute.xlu1 %3073 }
0x182f   : > { %v3080_v59 = vmul.f32 %v3079_v0, %v3074_v53 }
0x1830   : > { %v2755_v45 = vpop.permute.xlu0 %2754 }
0x1831   : > { %3082 = vrot.lane.b32.xlu0 %v3080_v59, %s6294_s17  ;;  %v2757_v9 = vadd.f32 %v2755_v45, %v2743_v49 }
0x1833   : > { %v3088_v44 = vpop.permute.xlu1 %3087 }
0x1834   : > { %v3094_v28 = vmul.f32 %v3093_v50, %v3088_v44 }
0x1835   : > { %v2770_v23 = vpop.permute.xlu0 %2769 }
0x1836   : > { %3096 = vrot.lane.b32.xlu0 %v3094_v28, %s6294_s17  ;;  %v2772_v8 = vadd.f32 %v2770_v23, %v2757_v9 }
0x1838   : > { %v3103_v51 = vpop.permute.xlu1 %3102 }
0x1839   : > { %v3109_v62 = vmul.f32 %v3108_v54, %v3103_v51 }
0x183a   : > { %v2784_v58 = vpop.permute.xlu0 %2783 }
0x183b   : > { %3111 = vrot.lane.b32.xlu0 %v3109_v62, %s6296_s18  ;;  %v2786_v39 = vadd.f32 %v2784_v58, %v2772_v8 }
0x183d   : > { %v3117_v25 = vpop.permute.xlu1 %3116 }
0x183e   : > { %v3123_v37 = vmul.f32 %v3122_v47, %v3117_v25 }
0x183f   : > { %v2798_v61 = vpop.permute.xlu0 %2797  ;;  %3130 = vperm.xlu0 %3984, %v5565_v63  }
0x1840   : > { %v2800_v27 = vadd.f32 %v2798_v61, %v2786_v39 }
0x1842   : > { %v3145_v33 = vpop.permute.xlu1 %3144 }
0x1843   : > { %3987 = vset.pattern.permute.xlu0 %v6297_v43  ;;  %v3151_v16 = vmul.f32 %v3150_v26, %v3145_v33 }
0x1844   : > { %v2812_v22 = vpop.permute.xlu0 %2811  ;;  %3173 = vperm.xlu0 %3987, %v5565_v63  }
0x1845   : > { %v2814_v2 = vadd.f32 %v2812_v22, %v2800_v27 }
0x1847   : > { %v3160_v13 = vpop.permute.xlu1 %3159 }
0x1848   : > { %3990 = vset.pattern.permute.xlu0 %v6298_v11 }
0x1849   : > { %v2827_v24 = vpop.permute.xlu0 %2826  ;;  %3216 = vperm.xlu0 %3990, %v5565_v63  }
0x184a   : > { %v2829_v41 = vadd.f32 %v2827_v24, %v2814_v2 }
0x184c   : > { %v3188_v29 = vpop.permute.xlu1 %3187 }
0x184d   : > { %3993 = vset.pattern.permute.xlu0 %v6299_v12 }
0x184e   : > { %v2841_v4 = vpop.permute.xlu0 %2840  ;;  %3258 = vperm.xlu0 %3993, %v5565_v63  }
0x184f   : > { %v2843_v15 = vadd.f32 %v2841_v4, %v2829_v41 }
0x1851   : > { %v3202_v51 = vpop.permute.xlu1 %3201 }
0x1852   : > { %3996 = vset.pattern.permute.xlu0 %v6300_v46 }
0x1853   : > { %v2855_v10 = vpop.permute.xlu0 %2854  ;;  %3301 = vperm.xlu0 %3996, %v5565_v63  }
0x1854   : > { %v2857_v18 = vadd.f32 %v2855_v10, %v2843_v15  ;;  %v6306_v10 = vld [vmem:[#allocation60_spill] sm:$0xff] }
0x1856   : > { %v3231_v58 = vpop.permute.xlu1 %3230 }
0x1857   : > { %3999 = vset.pattern.permute.xlu0 %v6301_v5  ;;  %v3136_v5 = vrot.slane %v5753_v48, %v4277_v31 }
0x1858   : > { %v2869_v38 = vpop.permute.xlu0 %2868  ;;  %3344 = vperm.xlu0 %3999, %v5565_v63  }
0x1859   : > { %v2871_v7 = vadd.f32 %v2869_v38, %v2857_v18  ;;  %v3157_v18 = vmul.f32 %v5728_v1, %v6306_v10 }
0x185b   : > { %v3245_v27 = vpop.permute.xlu1 %3244  ;;  %v3207_v48 = vrot.slane %v3157_v18, %v4296_v40 }
0x185c   : > { %4002 = vset.pattern.permute.xlu0 %v6302_v17  ;;  %v3165_v17 = vrot.slane %v3157_v18, %v6196_v60 }
0x185d   : > { %v2884_v32 = vpop.permute.xlu0 %2883  ;;  %3387 = vperm.xlu0 %4002, %v5565_v63  }
0x185e   : > { %v2886_v3 = vadd.f32 %v2884_v32, %v2871_v7 }
0x1860   : > { %v3274_v2 = vpop.permute.xlu1 %3273 }
0x1861   : > { %4005 = vset.pattern.permute.xlu0 %v6303_v20  ;;  %v3166_v20 = vmul.f32 %v3165_v17, %v3160_v13 }
0x1862   : > { %v2898_v52 = vpop.permute.xlu0 %2897  ;;  %3429 = vperm.xlu0 %4005, %v5565_v63  }
0x1863   : > { %v2900_v36 = vadd.f32 %v2898_v52, %v2886_v3  ;;  %v3179_v3 = vrot.slane %v3157_v18, %v4253_v6 }
0x1865   : > { %v3288_v41 = vpop.permute.xlu1 %3287 }
0x1866   : > { %4008 = vset.pattern.permute.xlu0 %v6304_v21  ;;  %v3193_v21 = vrot.slane %v3157_v18, %v4277_v31 }
0x1867   : > { %v2912_v30 = vpop.permute.xlu0 %2911  ;;  %3472 = vperm.xlu0 %4008, %v5565_v63  }
0x1868   : > { %v2914_v34 = vadd.f32 %v2912_v30, %v2900_v36  ;;  %v6307_v30 = vld [vmem:[#allocation64_spill] sm:$0xff]  ;;  %v3194_v25 = vmul.f32 %v3193_v21, %v3188_v29  ;;  %v6311_v29 = vld [vmem:[#allocation73_spill] sm:$0xff] }
0x186a   : > { %v3316_v15 = vpop.permute.xlu1 %3315 }
0x186b   : > { %4011 = vset.pattern.permute.xlu0 %v6305_v56  ;;  %v3208_v56 = vmul.f32 %v3207_v48, %v3202_v51 }
0x186c   : > { %v2926_v57 = vpop.permute.xlu0 %2925  ;;  %3515 = vperm.xlu0 %4011, %v5565_v63  }
0x186d   : > { %v2928_v19 = vadd.f32 %v2926_v57, %v2914_v34  ;;  %v3214_v34 = vmul.f32 %v5728_v1, %v6307_v30 }
0x186f   : > { %v3331_v46 = vpop.permute.xlu1 %3330 }
0x1870   : > { %3125 = vrot.lane.b32.xlu0 %v3123_v37, %s6296_s18  ;;  %v3236_v37 = vrot.slane %v3214_v34, %v4253_v6 }
0x1871   : > { %v2941_v0 = vpop.permute.xlu0 %2940  ;;  %4015 = vset.pattern.permute.xlu0 %v6119_v42 }
0x1872   : > { %v2943_v53 = vadd.f32 %v2941_v0, %v2928_v19  ;;  %v3222_v19 = vrot.slane %v3214_v34, %v6196_v60  ;;  %v3237_v26 = vmul.f32 %v3236_v37, %v3231_v58  ;;  %v3250_v0 = vrot.slane %v3214_v34, %v4277_v31 }
0x1874   : > { %3153 = vrot.lane.b32.xlu0 %v3151_v16, %s6296_s18  ;;  %v3359_v32 = vpop.permute.xlu1 %3358  ;;  %v6309_v16 = vld [vmem:[#allocation68_spill] sm:$0xff] }
0x1876   : > { %v2955_v59 = vpop.permute.xlu0 %2954 }
0x1877   : > { %v2957_v35 = vadd.f32 %v2955_v59, %v2943_v53  ;;  %v3271_v53 = vmul.f32 %v5728_v1, %v6309_v16 }
0x1879   : > { %v3373_v47 = vpop.permute.xlu1 %3372  ;;  %v3321_v51 = vrot.slane %v3271_v53, %v4296_v40 }
0x187b   : > { %v2969_v45 = vpop.permute.xlu0 %2968 }
0x187c   : > { %v2971_v14 = vadd.f32 %v2969_v45, %v2957_v35  ;;  %v3264_v45 = vrot.slane %v3214_v34, %v4296_v40 }
0x187e   : > { %v3402_v35 = vpop.permute.xlu1 %3401 }
0x1880   : > { %v2983_v63 = vpop.permute.xlu0 %2982 }
0x1881   : > { %v2985_v50 = vadd.f32 %v2983_v63, %v2971_v14  ;;  %v3251_v14 = vmul.f32 %v3250_v0, %v3245_v27 }
0x1885   : > { %v2998_v44 = vpop.permute.xlu0 %2997 }
0x1886   : > { %v3000_v55 = vadd.f32 %v2998_v44, %v2985_v50  ;;  %v3279_v50 = vrot.slane %v3271_v53, %v6196_v60  ;;  %v3293_v44 = vrot.slane %v3271_v53, %v4253_v6 }
0x188a   : > { %v3012_v28 = vpop.permute.xlu0 %3011 }
0x188b   : > { %v3014_v23 = vadd.f32 %v3012_v28, %v3000_v55  ;;  %v3280_v55 = vmul.f32 %v3279_v50, %v3274_v2  ;;  %v3294_v28 = vmul.f32 %v3293_v44, %v3288_v41 }
0x188f   : > { %v3026_v54 = vpop.permute.xlu0 %3025 }
0x1890   : > { %v3028_v49 = vadd.f32 %v3026_v54, %v3014_v23  ;;  %v3416_v23 = vpop.permute.xlu1 %3415  ;;  %v3328_v54 = vmul.f32 %v5728_v1, %v6311_v29 }
0x1894   : > { %v3040_v42 = vpop.permute.xlu0 %3039 }
0x1895   : > { %v3042_v62 = vadd.f32 %v3040_v42, %v3028_v49  ;;  %v3307_v49 = vrot.slane %v3271_v53, %v4277_v31 }
0x1899   : > { %v3055_v9 = vpop.permute.xlu0 %3054 }
0x189a   : > { %v3057_v8 = vadd.f32 %v3055_v9, %v3042_v62  ;;  %v3322_v62 = vmul.f32 %v3321_v51, %v3316_v15  ;;  %v3336_v9 = vrot.slane %v3328_v54, %v6196_v60 }
0x189e   : > { %v3069_v39 = vpop.permute.xlu0 %3068 }
0x189f   : > { %v3071_v61 = vadd.f32 %v3069_v39, %v3057_v8  ;;  %v3445_v8 = vpop.permute.xlu1 %3444  ;;  %v3350_v39 = vrot.slane %v3328_v54, %v4253_v6 }
0x18a3   : > { %v3083_v43 = vpop.permute.xlu0 %3082  ;;  %v3459_v15 = vpop.permute.xlu1 %3458 }
0x18a4   : > { %v3085_v22 = vadd.f32 %v3083_v43, %v3071_v61  ;;  %v3337_v61 = vmul.f32 %v3336_v9, %v3331_v46  ;;  %v3364_v43 = vrot.slane %v3328_v54, %v4277_v31 }
0x18a8   : > { %v3097_v11 = vpop.permute.xlu0 %3096 }
0x18a9   : > { %v3099_v24 = vadd.f32 %v3097_v11, %v3085_v22  ;;  %v6313_v22 = vld [vmem:[#allocation78_spill] sm:$0xff]  ;;  %v3378_v11 = vrot.slane %v3328_v54, %v4296_v40 }
0x18aa   : > { %v3385_v2 = vmul.f32 %v5728_v1, %v6313_v22 }
0x18ac   : > { %v3393_v10 = vrot.slane %v3385_v2, %v6196_v60  ;;  %v3407_v46 = vrot.slane %v3385_v2, %v4253_v6 }
0x18ad   : > { %v3112_v12 = vpop.permute.xlu0 %3111 }
0x18ae   : > { %v5785_v4 = vadd.f32 %v3112_v12, %v3099_v24  ;;  %v3365_v24 = vmul.f32 %v3364_v43, %v3359_v32  ;;  %v3379_v12 = vmul.f32 %v3378_v11, %v3373_v47  ;;  %v3487_v32 = vpop.permute.xlu1 %3486  ;;  %v6317_v47 = vld [vmem:[#allocation86_spill] sm:$0xff] }
0x18ba   : > { %v3131_v38 = vpop.permute.xlu0 %3130 }
0x18bb   : > { %v3137_v7 = vmul.f32 %v3136_v5, %v3131_v38  ;;  %v3408_v5 = vmul.f32 %v3407_v46, %v3402_v35  ;;  %v3421_v38 = vrot.slane %v3385_v2, %v4277_v31 }
0x18bd   : > { %3139 = vrot.lane.b32.xlu1 %v3137_v7, %s6296_s18  ;;  %v6315_v7 = vld [vmem:[#allocation82_spill] sm:$0xff] }
0x18be   : > { %v3442_v17 = vmul.f32 %v5728_v1, %v6315_v7 }
0x18bf   : > { %v3174_v52 = vpop.permute.xlu0 %3173 }
0x18c0   : > { %v3180_v36 = vmul.f32 %v3179_v3, %v3174_v52  ;;  %v3422_v52 = vmul.f32 %v3421_v38, %v3416_v23  ;;  %v3450_v21 = vrot.slane %v3442_v17, %v6196_v60  ;;  %v3464_v30 = vrot.slane %v3442_v17, %v4253_v6 }
0x18c1   : > { %3168 = vrot.lane.b32.xlu1 %v3166_v20, %s6308_s19  ;;  %v3435_v20 = vrot.slane %v3385_v2, %v4296_v40  ;;  %v3492_v37 = vrot.slane %v3442_v17, %v4296_v40 }
0x18c2   : > { %3182 = vrot.lane.b32.xlu0 %v3180_v36, %s6308_s19  ;;  %v3451_v34 = vmul.f32 %v3450_v21, %v3445_v8 }
0x18c4   : > { %v3217_v57 = vpop.permute.xlu0 %3216 }
0x18c5   : > { %3196 = vrot.lane.b32.xlu1 %v3194_v25, %s6308_s19  ;;  %v3223_v33 = vmul.f32 %v3222_v19, %v3217_v57  ;;  %v3465_v25 = vmul.f32 %v3464_v30, %v3459_v15  ;;  %v3499_v57 = vmul.f32 %v5728_v1, %v6317_v47  ;;  %v3478_v19 = vrot.slane %v3442_v17, %v4277_v31 }
0x18c6   : > { %3210 = vrot.lane.b32.xlu0 %v3208_v56, %s6308_s19  ;;  %v3502_v56 = vpop.permute.xlu1 %3501 }
0x18c7   : > { %v3507_v0 = vrot.slane %v3499_v57, %v6196_v60  ;;  %v2024_v60 = vld [vmem:[%s5876_s5] sm:$0xff]  ;;  %v3549_v50 = vrot.slane %v3499_v57, %v4296_v40 }
0x18c9   : > { %v3259_v59 = vpop.permute.xlu0 %3258  ;;  %3225 = vrot.lane.b32.xlu1 %v3223_v33, %s6310_s20  ;;  %v3508_v1 = vmul.f32 %v3507_v0, %v3502_v56 }
0x18ca   : > { %3239 = vrot.lane.b32.xlu0 %v3237_v26, %s6310_s20  ;;  %v3265_v63 = vmul.f32 %v3264_v45, %v3259_v59  ;;  %v3493_v26 = vmul.f32 %v3492_v37, %v3487_v32  ;;  %v3530_v53 = vpop.permute.xlu1 %3529  ;;  %v3521_v59 = vrot.slane %v3499_v57, %v4253_v6  ;;  %v3535_v45 = vrot.slane %v3499_v57, %v4277_v31 }
0x18cd   : > { %3253 = vrot.lane.b32.xlu1 %v3251_v14, %s6310_s20  ;;  %v3536_v14 = vmul.f32 %v3535_v45, %v3530_v53 }
0x18ce   : > { %3267 = vrot.lane.b32.xlu0 %v3265_v63, %s6310_s20  ;;  %v3302_v13 = vpop.permute.xlu0 %3301  ;;  %v3544_v63 = vpop.permute.xlu1 %3543 }
0x18cf   : > { %v3308_v42 = vmul.f32 %v3307_v49, %v3302_v13  ;;  %v3550_v6 = vmul.f32 %v3549_v50, %v3544_v63 }
0x18d1   : > { %3282 = vrot.lane.b32.xlu1 %v3280_v55, %s6312_s23 }
0x18d2   : > { %3296 = vrot.lane.b32.xlu0 %v3294_v28, %s6312_s23 }
0x18d3   : > { %v3345_v58 = vpop.permute.xlu0 %3344 }
0x18d4   : > { %v3351_v27 = vmul.f32 %v3350_v39, %v3345_v58 }
0x18d5   : > { %3310 = vrot.lane.b32.xlu1 %v3308_v42, %s6312_s23 }
0x18d6   : > { %3324 = vrot.lane.b32.xlu0 %v3322_v62, %s6312_s23 }
0x18d8   : > { %v3388_v41 = vpop.permute.xlu0 %3387 }
0x18d9   : > { %3339 = vrot.lane.b32.xlu1 %v3337_v61, %s6314_s27  ;;  %v3394_v18 = vmul.f32 %v3393_v10, %v3388_v41 }
0x18da   : > { %3353 = vrot.lane.b32.xlu0 %v3351_v27, %s6314_s27 }
0x18dd   : > { %3367 = vrot.lane.b32.xlu1 %v3365_v24, %s6314_s27  ;;  %v3430_v3 = vpop.permute.xlu0 %3429 }
0x18de   : > { %3381 = vrot.lane.b32.xlu0 %v3379_v12, %s6314_s27  ;;  %v3436_v36 = vmul.f32 %v3435_v20, %v3430_v3 }
0x18e1   : > { %3396 = vrot.lane.b32.xlu1 %v3394_v18, %s6316_s29 }
0x18e2   : > { %3410 = vrot.lane.b32.xlu0 %v3408_v5, %s6316_s29  ;;  %v3473_v48 = vpop.permute.xlu0 %3472 }
0x18e3   : > { %v3479_v33 = vmul.f32 %v3478_v19, %v3473_v48 }
0x18e5   : > { %3424 = vrot.lane.b32.xlu1 %v3422_v52, %s6316_s29 }
0x18e6   : > { %3438 = vrot.lane.b32.xlu0 %v3436_v36, %s6316_s29 }
0x18e7   : > { %v3516_v16 = vpop.permute.xlu0 %3515 }
0x18e8   : > { %v3522_v35 = vmul.f32 %v3521_v59, %v3516_v16 }
0x18e9   : > { %3453 = vrot.lane.b32.xlu1 %v3451_v34, %s6318_s7 }
0x18ea   : > { %3467 = vrot.lane.b32.xlu0 %v3465_v25, %s6318_s7 }
0x18eb   : > { %v3126_v44 = vpop.permute.xlu0 %3125 }
0x18ec   : > { %v3128_v55 = vadd.f32 %v3126_v44, %v5785_v4 }
0x18ed   : > { %3481 = vrot.lane.b32.xlu1 %v3479_v33, %s6318_s7 }
0x18ee   : > { %3495 = vrot.lane.b32.xlu0 %v3493_v26, %s6318_s7 }
0x18ef   : > { %v3154_v13 = vpop.permute.xlu0 %3153 }
0x18f1   : > { %3510 = vrot.lane.b32.xlu1 %v3508_v1, %s4188_s11 }
0x18f2   : > { %3524 = vrot.lane.b32.xlu0 %v3522_v35, %s4188_s11 }
0x18f5   : > { %3558 = vperm.xlu1 %4014, %v2024_v60  }
0x18f6   : > { %3538 = vrot.lane.b32.xlu0 %v3536_v14, %s4188_s11 }
0x18f9   : > { %3552 = vrot.lane.b32.xlu1 %v3550_v6, %s4188_s11 }
0x192f   : > { %v3140_v31 = vpop.permute.xlu1 %3139 }
0x1930   : > { %v3142_v28 = vadd.f32 %v3140_v31, %v3128_v55 }
0x1932   : > { %v3156_v23 = vadd.f32 %v3154_v13, %v3142_v28 }
0x1933   : > { %v3169_v29 = vpop.permute.xlu1 %3168 }
0x1934   : > { %v3171_v54 = vadd.f32 %v3169_v29, %v3156_v23  ;;  %v3183_v49 = vpop.permute.xlu0 %3182 }
0x1936   : > { %v3185_v51 = vadd.f32 %v3183_v49, %v3171_v54 }
0x1937   : > { %v3197_v42 = vpop.permute.xlu1 %3196 }
0x1938   : > { %v3199_v62 = vadd.f32 %v3197_v42, %v3185_v51  ;;  %v3211_v40 = vpop.permute.xlu0 %3210 }
0x193a   : > { %v3213_v9 = vadd.f32 %v3211_v40, %v3199_v62 }
0x193b   : > { %v3226_v58 = vpop.permute.xlu1 %3225 }
0x193c   : > { %v3228_v8 = vadd.f32 %v3226_v58, %v3213_v9  ;;  %v3240_v39 = vpop.permute.xlu0 %3239 }
0x193e   : > { %v3242_v61 = vadd.f32 %v3240_v39, %v3228_v8 }
0x193f   : > { %v3254_v27 = vpop.permute.xlu1 %3253 }
0x1940   : > { %v3256_v43 = vadd.f32 %v3254_v27, %v3242_v61  ;;  %v3268_v22 = vpop.permute.xlu0 %3267 }
0x1942   : > { %v3270_v4 = vadd.f32 %v3268_v22, %v3256_v43 }
0x1943   : > { %v3283_v2 = vpop.permute.xlu1 %3282 }
0x1944   : > { %v3285_v11 = vadd.f32 %v3283_v2, %v3270_v4  ;;  %v3297_v24 = vpop.permute.xlu0 %3296 }
0x1946   : > { %v3299_v41 = vadd.f32 %v3297_v24, %v3285_v11 }
0x1947   : > { %v3311_v12 = vpop.permute.xlu1 %3310 }
0x1948   : > { %v3313_v15 = vadd.f32 %v3311_v12, %v3299_v41  ;;  %v3325_v10 = vpop.permute.xlu0 %3324 }
0x194a   : > { %v3327_v46 = vadd.f32 %v3325_v10, %v3313_v15 }
0x194b   : > { %v3340_v18 = vpop.permute.xlu1 %3339 }
0x194c   : > { %v3342_v5 = vadd.f32 %v3340_v18, %v3327_v46  ;;  %v3354_v38 = vpop.permute.xlu0 %3353 }
0x194e   : > { %v3356_v7 = vadd.f32 %v3354_v38, %v3342_v5 }
0x194f   : > { %v3368_v17 = vpop.permute.xlu1 %3367 }
0x1950   : > { %v3370_v3 = vadd.f32 %v3368_v17, %v3356_v7  ;;  %v3382_v32 = vpop.permute.xlu0 %3381 }
0x1952   : > { %v3384_v20 = vadd.f32 %v3382_v32, %v3370_v3 }
0x1953   : > { %v3397_v52 = vpop.permute.xlu1 %3396 }
0x1954   : > { %v3399_v36 = vadd.f32 %v3397_v52, %v3384_v20  ;;  %v3411_v21 = vpop.permute.xlu0 %3410 }
0x1956   : > { %v3413_v30 = vadd.f32 %v3411_v21, %v3399_v36 }
0x1957   : > { %v3425_v34 = vpop.permute.xlu1 %3424 }
0x1958   : > { %v3427_v48 = vadd.f32 %v3425_v34, %v3413_v30  ;;  %v3439_v25 = vpop.permute.xlu0 %3438 }
0x195a   : > { %v3441_v56 = vadd.f32 %v3439_v25, %v3427_v48 }
0x195b   : > { %v3454_v47 = vpop.permute.xlu1 %3453 }
0x195c   : > { %v3456_v57 = vadd.f32 %v3454_v47, %v3441_v56  ;;  %v3468_v19 = vpop.permute.xlu0 %3467 }
0x195e   : > { %v3470_v37 = vadd.f32 %v3468_v19, %v3456_v57 }
0x195f   : > { %v3482_v33 = vpop.permute.xlu1 %3481 }
0x1960   : > { %v3484_v26 = vadd.f32 %v3482_v33, %v3470_v37  ;;  %v3496_v0 = vpop.permute.xlu0 %3495 }
0x1962   : > { %v3498_v16 = vadd.f32 %v3496_v0, %v3484_v26 }
0x1963   : > { %v3511_v53 = vpop.permute.xlu1 %3510 }
0x1964   : > { %v3525_v59 = vpop.permute.xlu0 %3524  ;;  %v3513_v1 = vadd.f32 %v3511_v53, %v3498_v16 }
0x1966   : > { %v3527_v35 = vadd.f32 %v3525_v59, %v3513_v1 }
0x1968   : > { %v3539_v45 = vpop.permute.xlu0 %3538 }
0x1969   : > { %v3541_v14 = vadd.f32 %v3539_v45, %v3527_v35 }
0x1970   : > { %v3559_v60 = vpop.permute.xlu1 %3558 }
0x1974   : > { %v3553_v63 = vpop.permute.xlu1 %3552 }
0x1975   : > { %v3555_v50 = vadd.f32 %v3553_v63, %v3541_v14 }
0x1977   : > { %v3561_v6 = vadd.f32 %v3559_v60, %v3555_v50 }
0x1979   : > { %v3562_v44 = vmax.f32 %v3561_v6, 0.0 }
0x197b   : > { %3564 = vst.msk [vmem:[%s249_s14] sm:$0xff] %vm3563_vm2, %v3562_v44 }
0x197c PF: > { %s16_s21 = sadd.s32 1, %s4028_s21  }
0x197d   : > { %p13_p4 = scmp.ge.s32.totalorder %s16_s21, 4  }
0x197f   :  { %15 = sbr.rel (!%p13_p4) target bundleno = 1 (0x1), region = 74 }

</bundles_post_ra>
